<compile_context>
chip_gen: v6e
topology: v6e:2x2x1
jax: 0.10.0
libtpu: 0.0.40
codegen_flags: <defaults>
</compile_context>

<pallas_src>
import functools
import math

import jax
import jax.numpy as jnp
from jax.experimental import pallas as pl
from jax.experimental.pallas import tpu as pltpu

# ---------------- small-BERT config ----------------
VOCAB = 100
MAX_POS = 32
TYPE_VOCAB = 2
HIDDEN = 128
N_LAYERS = 2
N_HEADS = 4
HEAD_DIM = HIDDEN // N_HEADS
HPAD = 128                    # per-head lane-padded width (32 -> 128)
QKV_W = 3 * N_HEADS * HPAD    # fused, padded QKV projection width = 1536
INTERMEDIATE = 512
LN_EPS = 1e-12
DA_HIDDEN = 512
DA_OUT = 256
CL_HIDDEN = 128
NUM_CLASSES = 2
HEAD_PAD = 128                # lane-padded classifier output width
NEG = -1e9


def _vmem():
    return pl.BlockSpec(memory_space=pltpu.MemorySpace.VMEM)


def _bf16(x):
    return x.astype(jnp.bfloat16)


def _ln(x, g, b):
    """LayerNorm over the last axis, f32 math, two-pass variance."""
    mu = jnp.mean(x, axis=-1, keepdims=True)
    xc = x - mu
    var = jnp.mean(xc * xc, axis=-1, keepdims=True)
    return xc * jax.lax.rsqrt(var + LN_EPS) * g + b


# ---------------- whole-model fused kernel ----------------
def _model_kernel(x_ref, bias_ref, emb_g_ref, emb_b_ref,
                  wqkv_ref, bqkv_ref, wo_ref, bo_ref, ln1g_ref, ln1b_ref,
                  wi_ref, bi_ref, wo2_ref, bo2_ref, ln2g_ref, ln2b_ref,
                  pw_ref, pb_ref, d1w_ref, d1b_ref, d2w_ref, d2b_ref,
                  c1w_ref, c1b_ref, c2w_ref, c2b_ref,
                  o_ref, *, batch, seq):
    # Embedding LayerNorm (gathers/adds are XLA glue outside the kernel).
    h = _ln(x_ref[...], emb_g_ref[...], emb_b_ref[...])          # [M, H] f32
    bias = bias_ref[...]                                          # [M, M] additive

    koff = N_HEADS * HPAD
    voff = 2 * N_HEADS * HPAD

    for l in range(N_LAYERS):                                     # unrolled, static
        # Fused QKV projection (head-padded, 1/sqrt(D) pre-folded into Q).
        qkv = jnp.dot(_bf16(h), wqkv_ref[l],
                      preferred_element_type=jnp.float32) + bqkv_ref[l]  # [M, 1536]
        qkv_bf = _bf16(qkv)                                       # one cast, reused

        # Per-head attention over the whole [M, M] block-diagonal score matrix.
        ctx_heads = []
        for hh in range(N_HEADS):
            q = qkv_bf[:, hh * HPAD:(hh + 1) * HPAD]              # lane-aligned views
            k = qkv_bf[:, koff + hh * HPAD:koff + (hh + 1) * HPAD]
            v = qkv_bf[:, voff + hh * HPAD:voff + (hh + 1) * HPAD]
            s = jax.lax.dot_general(q, k, (((1,), (1,)), ((), ())),
                                    preferred_element_type=jnp.float32) + bias
            s = s - jnp.max(s, axis=-1, keepdims=True)
            p = jnp.exp(s)
            p = p / jnp.sum(p, axis=-1, keepdims=True)            # exact softmax
            ctx_heads.append(jnp.dot(_bf16(p), v,
                                     preferred_element_type=jnp.float32))
        ctx = jnp.concatenate(ctx_heads, axis=-1)                 # [M, NH*128]

        # Single fused output projection (== concat(heads) @ Wo).
        attn = jnp.dot(_bf16(ctx), wo_ref[l],
                       preferred_element_type=jnp.float32) + bo_ref[l]
        h = _ln(h + attn, ln1g_ref[l], ln1b_ref[l])

        # FFN: GELU intermediate, residual + LayerNorm.
        # TODO(synk): tanh-approx GELU; HF bert-base uses the exact erf GELU.
        mid = jax.nn.gelu(
            jnp.dot(_bf16(h), wi_ref[l], preferred_element_type=jnp.float32)
            + bi_ref[l], approximate=True)
        ffn = jnp.dot(_bf16(mid), wo2_ref[l],
                      preferred_element_type=jnp.float32) + bo2_ref[l]
        h = _ln(h + ffn, ln2g_ref[l], ln2b_ref[l])

    # [CLS] extraction inside the kernel (static sublane slices, row b*seq).
    cls = jnp.concatenate([h[b * seq:b * seq + 1, :] for b in range(batch)],
                          axis=0)                                 # [B, H]

    # Pooler -> domain_adapter -> classifier (dropouts are identity).
    pooled = jnp.tanh(jnp.dot(_bf16(cls), pw_ref[...],
                              preferred_element_type=jnp.float32) + pb_ref[...])
    d = jnp.maximum(jnp.dot(_bf16(pooled), d1w_ref[...],
                            preferred_element_type=jnp.float32) + d1b_ref[...], 0.0)
    d = jnp.dot(_bf16(d), d2w_ref[...],
                preferred_element_type=jnp.float32) + d2b_ref[...]
    c = jnp.maximum(jnp.dot(_bf16(d), c1w_ref[...],
                            preferred_element_type=jnp.float32) + c1b_ref[...], 0.0)
    # Lane-dense 128-wide padded logits store (sliced to [B, 2] outside).
    o_ref[...] = (jnp.dot(_bf16(c), c2w_ref[...],
                          preferred_element_type=jnp.float32)
                  + c2b_ref[...]).astype(o_ref.dtype)


# ---------------- head-padding helpers (init-time, plain JAX) ----------------
def _pad_heads_cols(w):
    """[H, H] -> [H, NH*128]; head h's 32 columns start at lane h*128."""
    w3 = w.reshape(HIDDEN, N_HEADS, HEAD_DIM)
    pad = jnp.zeros((HIDDEN, N_HEADS, HPAD - HEAD_DIM), jnp.float32)
    return jnp.concatenate([w3, pad], axis=-1).reshape(HIDDEN, N_HEADS * HPAD)


def _pad_heads_vec(b):
    """[H] -> [NH*128] with the same per-head padding."""
    b3 = b.reshape(N_HEADS, HEAD_DIM)
    pad = jnp.zeros((N_HEADS, HPAD - HEAD_DIM), jnp.float32)
    return jnp.concatenate([b3, pad], axis=-1).reshape(N_HEADS * HPAD)


def _pad_heads_rows(w):
    """[H, H] -> [NH*128, H]; head h's 32 rows start at row h*128."""
    w3 = w.reshape(N_HEADS, HEAD_DIM, HIDDEN)
    pad = jnp.zeros((N_HEADS, HPAD - HEAD_DIM, HIDDEN), jnp.float32)
    return jnp.concatenate([w3, pad], axis=1).reshape(N_HEADS * HPAD, HIDDEN)


# ---------------- deterministic parameter init (f32 masters) ----------------
def init_params(key):
    keys = iter(jax.random.split(key, 64))

    def nrm(shape):
        return jax.random.normal(next(keys), shape, jnp.float32) * 0.02

    p = {}
    p["word_emb"] = nrm((VOCAB, HIDDEN))
    p["pos_emb"] = nrm((MAX_POS, HIDDEN))
    p["type_emb"] = nrm((TYPE_VOCAB, HIDDEN))
    p["emb_ln_g"] = jnp.ones((1, HIDDEN), jnp.float32)
    p["emb_ln_b"] = jnp.zeros((1, HIDDEN), jnp.float32)

    scale = 1.0 / math.sqrt(HEAD_DIM)
    wqkv, bqkv, wo, bo = [], [], [], []
    ln1g, ln1b, wi, bi, wo2, bo2, ln2g, ln2b = [], [], [], [], [], [], [], []
    for _ in range(N_LAYERS):
        wq, wk, wv = nrm((HIDDEN, HIDDEN)), nrm((HIDDEN, HIDDEN)), nrm((HIDDEN, HIDDEN))
        bq = jnp.zeros((HIDDEN,), jnp.float32)
        bk = jnp.zeros((HIDDEN,), jnp.float32)
        bv = jnp.zeros((HIDDEN,), jnp.float32)
        # 1/sqrt(head_dim) folded into the Q columns; heads padded 32 -> 128 lanes.
        wqkv.append(jnp.concatenate(
            [_pad_heads_cols(wq * scale), _pad_heads_cols(wk), _pad_heads_cols(wv)],
            axis=1))                                              # [H, 1536]
        bqkv.append(jnp.concatenate(
            [_pad_heads_vec(bq * scale), _pad_heads_vec(bk), _pad_heads_vec(bv)])[None, :])
        wo.append(_pad_heads_rows(nrm((HIDDEN, HIDDEN))))         # [512, H]
        bo.append(jnp.zeros((1, HIDDEN), jnp.float32))
        ln1g.append(jnp.ones((1, HIDDEN), jnp.float32))
        ln1b.append(jnp.zeros((1, HIDDEN), jnp.float32))
        wi.append(nrm((HIDDEN, INTERMEDIATE)))
        bi.append(jnp.zeros((1, INTERMEDIATE), jnp.float32))
        wo2.append(nrm((INTERMEDIATE, HIDDEN)))
        bo2.append(jnp.zeros((1, HIDDEN), jnp.float32))
        ln2g.append(jnp.ones((1, HIDDEN), jnp.float32))
        ln2b.append(jnp.zeros((1, HIDDEN), jnp.float32))

    p["wqkv"] = jnp.stack(wqkv)      # [L, H, 1536]
    p["bqkv"] = jnp.stack(bqkv)      # [L, 1, 1536]
    p["wo"] = jnp.stack(wo)          # [L, 512, H]
    p["bo"] = jnp.stack(bo)
    p["ln1_g"] = jnp.stack(ln1g)
    p["ln1_b"] = jnp.stack(ln1b)
    p["wi"] = jnp.stack(wi)          # [L, H, I]
    p["bi"] = jnp.stack(bi)
    p["wo2"] = jnp.stack(wo2)        # [L, I, H]
    p["bo2"] = jnp.stack(bo2)
    p["ln2_g"] = jnp.stack(ln2g)
    p["ln2_b"] = jnp.stack(ln2b)

    p["pool_w"] = nrm((HIDDEN, HIDDEN))
    p["pool_b"] = jnp.zeros((1, HIDDEN), jnp.float32)
    p["da1_w"] = nrm((HIDDEN, DA_HIDDEN))
    p["da1_b"] = jnp.zeros((1, DA_HIDDEN), jnp.float32)
    p["da2_w"] = nrm((DA_HIDDEN, DA_OUT))
    p["da2_b"] = jnp.zeros((1, DA_OUT), jnp.float32)
    p["cl1_w"] = nrm((DA_OUT, CL_HIDDEN))
    p["cl1_b"] = jnp.zeros((1, CL_HIDDEN), jnp.float32)
    # Classifier output padded to 128 lanes (real weights in first 2 columns).
    cl2_real = nrm((CL_HIDDEN, NUM_CLASSES))
    p["cl2_w"] = jnp.zeros((CL_HIDDEN, HEAD_PAD), jnp.float32).at[:, :NUM_CLASSES].set(cl2_real)
    p["cl2_b"] = jnp.zeros((1, HEAD_PAD), jnp.float32)
    return p


# ---------------- forward (glue in JAX, everything hot in ONE Pallas call) ----------------
def forward(params, input_ids, attention_mask):
    B, S = input_ids.shape
    M = B * S

    # BERT embeddings (gather + adds are XLA glue; LN is fused in the kernel).
    word = jnp.take(params["word_emb"], input_ids, axis=0)       # [B, S, H]
    pos = params["pos_emb"][:S][None, :, :]
    typ = params["type_emb"][0][None, None, :]                   # token_type_ids = 0
    x = (word + pos + typ).reshape(M, HIDDEN)
    # TODO(synk): all dropout layers are identity here (eval/inference mode).

    # Block-diagonal additive attention bias [M, M]:
    # cross-batch = -1e9, within-batch = key-padding mask.
    addm = (1.0 - attention_mask.astype(jnp.float32)) * NEG      # [B, S]
    col_bias = addm.reshape(-1)                                  # [M]
    bidx = jnp.repeat(jnp.arange(B), S)
    same = bidx[:, None] == bidx[None, :]
    bias = jnp.where(same, col_bias[None, :], NEG)               # [M, M]

    bf = lambda a: a.astype(jnp.bfloat16)                        # bf16 MXU copies

    # Advisory cost estimate for the fused kernel.
    per_layer_flops = (2 * M * HIDDEN * QKV_W
                       + N_HEADS * 4 * M * M * HPAD
                       + 2 * M * (N_HEADS * HPAD) * HIDDEN
                       + 4 * M * HIDDEN * INTERMEDIATE)
    head_flops = 2 * B * (HIDDEN * HIDDEN + HIDDEN * DA_HIDDEN + DA_HIDDEN * DA_OUT
                          + DA_OUT * CL_HIDDEN + CL_HIDDEN * HEAD_PAD)
    flops = N_LAYERS * per_layer_flops + head_flops
    transcendentals = N_LAYERS * (N_HEADS * M * M + M * INTERMEDIATE + 3 * M) + B * HIDDEN
    weight_bytes = (N_LAYERS * (HIDDEN * QKV_W + N_HEADS * HPAD * HIDDEN
                                + 2 * HIDDEN * INTERMEDIATE) * 2
                    + (HIDDEN * HIDDEN + HIDDEN * DA_HIDDEN + DA_HIDDEN * DA_OUT
                       + DA_OUT * CL_HIDDEN + CL_HIDDEN * HEAD_PAD) * 2)
    bytes_accessed = M * HIDDEN * 4 + M * M * 4 + B * HEAD_PAD * 4 + weight_bytes

    kern = functools.partial(_model_kernel, batch=B, seq=S)
    logits_padded = pl.pallas_call(
        kern,
        out_shape=jax.ShapeDtypeStruct((B, HEAD_PAD), jnp.float32),
        in_specs=[_vmem() for _ in range(26)],
        out_specs=_vmem(),
        cost_estimate=pl.CostEstimate(flops=int(flops),
                                      transcendentals=int(transcendentals),
                                      bytes_accessed=int(bytes_accessed)),
    )(x, bias, params["emb_ln_g"], params["emb_ln_b"],
      bf(params["wqkv"]), params["bqkv"], bf(params["wo"]), params["bo"],
      params["ln1_g"], params["ln1_b"],
      bf(params["wi"]), params["bi"], bf(params["wo2"]), params["bo2"],
      params["ln2_g"], params["ln2_b"],
      bf(params["pool_w"]), params["pool_b"],
      bf(params["da1_w"]), params["da1_b"], bf(params["da2_w"]), params["da2_b"],
      bf(params["cl1_w"]), params["cl1_b"], bf(params["cl2_w"]), params["cl2_b"])

    return logits_padded[:, :NUM_CLASSES]                        # [B, 2]


if __name__ == "__main__":
    key = jax.random.PRNGKey(0)
    pkey, ikey = jax.random.split(key)
    params = init_params(pkey)

    B, S = 2, 8
    input_ids = jax.random.randint(ikey, (B, S), 0, VOCAB, dtype=jnp.int32)
    attention_mask = jnp.ones((B, S), dtype=jnp.int32)
    attention_mask = attention_mask.at[1, 6:].set(0)   # second sequence padded

    logits = jax.jit(forward)(params, input_ids, attention_mask)
    jax.block_until_ready(logits)
    assert logits.shape == (B, NUM_CLASSES) and logits.dtype == jnp.float32
    assert bool(jnp.all(jnp.isfinite(logits)))
    print("KERNEL_OK")
</pallas_src>

<mosaic_0001>
module attributes {stable_mosaic.version = 11 : i64} {
  func.func @_model_kernel(%arg0: memref<16x128xf32, #tpu.memory_space<vmem>>, %arg1: memref<16x16xf32, #tpu.memory_space<vmem>>, %arg2: memref<1x128xf32, #tpu.memory_space<vmem>>, %arg3: memref<1x128xf32, #tpu.memory_space<vmem>>, %arg4: memref<2x128x1536xbf16, #tpu.memory_space<vmem>>, %arg5: memref<2x1x1536xf32, #tpu.memory_space<vmem>>, %arg6: memref<2x512x128xbf16, #tpu.memory_space<vmem>>, %arg7: memref<2x1x128xf32, #tpu.memory_space<vmem>>, %arg8: memref<2x1x128xf32, #tpu.memory_space<vmem>>, %arg9: memref<2x1x128xf32, #tpu.memory_space<vmem>>, %arg10: memref<2x128x512xbf16, #tpu.memory_space<vmem>>, %arg11: memref<2x1x512xf32, #tpu.memory_space<vmem>>, %arg12: memref<2x512x128xbf16, #tpu.memory_space<vmem>>, %arg13: memref<2x1x128xf32, #tpu.memory_space<vmem>>, %arg14: memref<2x1x128xf32, #tpu.memory_space<vmem>>, %arg15: memref<2x1x128xf32, #tpu.memory_space<vmem>>, %arg16: memref<128x128xbf16, #tpu.memory_space<vmem>>, %arg17: memref<1x128xf32, #tpu.memory_space<vmem>>, %arg18: memref<128x512xbf16, #tpu.memory_space<vmem>>, %arg19: memref<1x512xf32, #tpu.memory_space<vmem>>, %arg20: memref<512x256xbf16, #tpu.memory_space<vmem>>, %arg21: memref<1x256xf32, #tpu.memory_space<vmem>>, %arg22: memref<256x128xbf16, #tpu.memory_space<vmem>>, %arg23: memref<1x128xf32, #tpu.memory_space<vmem>>, %arg24: memref<128x128xbf16, #tpu.memory_space<vmem>>, %arg25: memref<1x128xf32, #tpu.memory_space<vmem>>, %arg26: memref<2x128xf32, #tpu.memory_space<vmem>>) attributes {dimension_semantics = [], scalar_prefetch = 0 : i64, scratch_operands = 0 : i64, tpu.core_type = #tpu.core_type<tc>} {
    %c0 = arith.constant 0 : index
    %c0_0 = arith.constant 0 : index
    %0 = vector.load %arg0[%c0, %c0_0] : memref<16x128xf32, #tpu.memory_space<vmem>>, vector<16x128xf32>
    %c0_1 = arith.constant 0 : index
    %c0_2 = arith.constant 0 : index
    %1 = vector.load %arg2[%c0_1, %c0_2] : memref<1x128xf32, #tpu.memory_space<vmem>>, vector<1x128xf32>
    %c0_3 = arith.constant 0 : index
    %c0_4 = arith.constant 0 : index
    %2 = vector.load %arg3[%c0_3, %c0_4] : memref<1x128xf32, #tpu.memory_space<vmem>>, vector<1x128xf32>
    %cst = arith.constant dense<0.000000e+00> : vector<16xf32>
    %3 = vector.multi_reduction <add>, %0, %cst [1] : vector<16x128xf32> to vector<16xf32>
    %4 = vector.shape_cast %3 : vector<16xf32> to vector<16x1xf32>
    %cst_5 = arith.constant 1.280000e+02 : f32
    %5 = vector.broadcast %cst_5 : f32 to vector<16x1xf32>
    %6 = arith.divf %4, %5 : vector<16x1xf32>
    %7 = vector.broadcast %6 : vector<16x1xf32> to vector<16x128xf32>
    %8 = arith.subf %0, %7 : vector<16x128xf32>
    %9 = arith.mulf %8, %8 : vector<16x128xf32>
    %cst_6 = arith.constant dense<0.000000e+00> : vector<16xf32>
    %10 = vector.multi_reduction <add>, %9, %cst_6 [1] : vector<16x128xf32> to vector<16xf32>
    %11 = vector.shape_cast %10 : vector<16xf32> to vector<16x1xf32>
    %cst_7 = arith.constant 1.280000e+02 : f32
    %12 = vector.broadcast %cst_7 : f32 to vector<16x1xf32>
    %13 = arith.divf %11, %12 : vector<16x1xf32>
    %cst_8 = arith.constant 9.99999996E-13 : f32
    %14 = vector.broadcast %cst_8 : f32 to vector<16x1xf32>
    %15 = arith.addf %13, %14 : vector<16x1xf32>
    %16 = math.rsqrt %15 : vector<16x1xf32>
    %17 = vector.broadcast %16 : vector<16x1xf32> to vector<16x128xf32>
    %18 = arith.mulf %8, %17 : vector<16x128xf32>
    %19 = vector.broadcast %1 : vector<1x128xf32> to vector<16x128xf32>
    %20 = arith.mulf %18, %19 : vector<16x128xf32>
    %21 = vector.broadcast %2 : vector<1x128xf32> to vector<16x128xf32>
    %22 = arith.addf %20, %21 : vector<16x128xf32>
    %c0_9 = arith.constant 0 : index
    %c0_10 = arith.constant 0 : index
    %23 = vector.load %arg1[%c0_9, %c0_10] : memref<16x16xf32, #tpu.memory_space<vmem>>, vector<16x16xf32>
    %24 = arith.truncf %22 : vector<16x128xf32> to vector<16x128xbf16>
    %c0_11 = arith.constant 0 : index
    %c0_12 = arith.constant 0 : index
    %c0_13 = arith.constant 0 : index
    %25 = vector.load %arg4[%c0_11, %c0_12, %c0_13] : memref<2x128x1536xbf16, #tpu.memory_space<vmem>>, vector<1x128x1536xbf16>
    %26 = vector.shape_cast %25 : vector<1x128x1536xbf16> to vector<128x1536xbf16>
    %cst_14 = arith.constant dense<0.000000e+00> : vector<16x1536xf32>
    %27 = tpu.matmul %24, %26, %cst_14 {dimension_numbers = #tpu.dot_dimension_numbers<[1], [0], [0], [1], [0, 0, 1, 1], [], []>} : vector<16x128xbf16>, vector<128x1536xbf16>, vector<16x1536xf32> -> vector<16x1536xf32>
    %c0_15 = arith.constant 0 : index
    %c0_16 = arith.constant 0 : index
    %c0_17 = arith.constant 0 : index
    %28 = vector.load %arg5[%c0_15, %c0_16, %c0_17] : memref<2x1x1536xf32, #tpu.memory_space<vmem>>, vector<1x1x1536xf32>
    %29 = vector.shape_cast %28 : vector<1x1x1536xf32> to vector<1x1536xf32>
    %30 = vector.broadcast %29 : vector<1x1536xf32> to vector<16x1536xf32>
    %31 = arith.addf %27, %30 : vector<16x1536xf32>
    %32 = arith.truncf %31 : vector<16x1536xf32> to vector<16x1536xbf16>
    %33 = vector.extract_strided_slice %32 {offsets = [0, 0], sizes = [16, 128], strides = [1, 1]} : vector<16x1536xbf16> to vector<16x128xbf16>
    %34 = vector.extract_strided_slice %32 {offsets = [0, 512], sizes = [16, 128], strides = [1, 1]} : vector<16x1536xbf16> to vector<16x128xbf16>
    %35 = vector.extract_strided_slice %32 {offsets = [0, 1024], sizes = [16, 128], strides = [1, 1]} : vector<16x1536xbf16> to vector<16x128xbf16>
    %cst_18 = arith.constant dense<0.000000e+00> : vector<16x16xf32>
    %36 = tpu.matmul %33, %34, %cst_18 {dimension_numbers = #tpu.dot_dimension_numbers<[1], [1], [0], [0], [0, 0, 1, 0], [], []>} : vector<16x128xbf16>, vector<16x128xbf16>, vector<16x16xf32> -> vector<16x16xf32>
    %37 = arith.addf %36, %23 : vector<16x16xf32>
    %cst_19 = arith.constant dense<0xFF800000> : vector<16xf32>
    %38 = vector.multi_reduction <maximumf>, %37, %cst_19 [1] : vector<16x16xf32> to vector<16xf32>
    %39 = vector.shape_cast %38 : vector<16xf32> to vector<16x1xf32>
    %40 = vector.broadcast %39 : vector<16x1xf32> to vector<16x16xf32>
    %41 = arith.subf %37, %40 : vector<16x16xf32>
    %42 = math.exp %41 : vector<16x16xf32>
    %cst_20 = arith.constant dense<0.000000e+00> : vector<16xf32>
    %43 = vector.multi_reduction <add>, %42, %cst_20 [1] : vector<16x16xf32> to vector<16xf32>
    %44 = vector.shape_cast %43 : vector<16xf32> to vector<16x1xf32>
    %45 = vector.broadcast %44 : vector<16x1xf32> to vector<16x16xf32>
    %46 = arith.divf %42, %45 : vector<16x16xf32>
    %47 = arith.truncf %46 : vector<16x16xf32> to vector<16x16xbf16>
    %cst_21 = arith.constant dense<0.000000e+00> : vector<16x128xf32>
    %48 = tpu.matmul %47, %35, %cst_21 {dimension_numbers = #tpu.dot_dimension_numbers<[1], [0], [0], [1], [0, 0, 1, 1], [], []>} : vector<16x16xbf16>, vector<16x128xbf16>, vector<16x128xf32> -> vector<16x128xf32>
    %49 = vector.extract_strided_slice %32 {offsets = [0, 128], sizes = [16, 128], strides = [1, 1]} : vector<16x1536xbf16> to vector<16x128xbf16>
    %50 = vector.extract_strided_slice %32 {offsets = [0, 640], sizes = [16, 128], strides = [1, 1]} : vector<16x1536xbf16> to vector<16x128xbf16>
    %51 = vector.extract_strided_slice %32 {offsets = [0, 1152], sizes = [16, 128], strides = [1, 1]} : vector<16x1536xbf16> to vector<16x128xbf16>
    %cst_22 = arith.constant dense<0.000000e+00> : vector<16x16xf32>
    %52 = tpu.matmul %49, %50, %cst_22 {dimension_numbers = #tpu.dot_dimension_numbers<[1], [1], [0], [0], [0, 0, 1, 0], [], []>} : vector<16x128xbf16>, vector<16x128xbf16>, vector<16x16xf32> -> vector<16x16xf32>
    %53 = arith.addf %52, %23 : vector<16x16xf32>
    %cst_23 = arith.constant dense<0xFF800000> : vector<16xf32>
    %54 = vector.multi_reduction <maximumf>, %53, %cst_23 [1] : vector<16x16xf32> to vector<16xf32>
    %55 = vector.shape_cast %54 : vector<16xf32> to vector<16x1xf32>
    %56 = vector.broadcast %55 : vector<16x1xf32> to vector<16x16xf32>
    %57 = arith.subf %53, %56 : vector<16x16xf32>
    %58 = math.exp %57 : vector<16x16xf32>
    %cst_24 = arith.constant dense<0.000000e+00> : vector<16xf32>
    %59 = vector.multi_reduction <add>, %58, %cst_24 [1] : vector<16x16xf32> to vector<16xf32>
    %60 = vector.shape_cast %59 : vector<16xf32> to vector<16x1xf32>
    %61 = vector.broadcast %60 : vector<16x1xf32> to vector<16x16xf32>
    %62 = arith.divf %58, %61 : vector<16x16xf32>
    %63 = arith.truncf %62 : vector<16x16xf32> to vector<16x16xbf16>
    %cst_25 = arith.constant dense<0.000000e+00> : vector<16x128xf32>
    %64 = tpu.matmul %63, %51, %cst_25 {dimension_numbers = #tpu.dot_dimension_numbers<[1], [0], [0], [1], [0, 0, 1, 1], [], []>} : vector<16x16xbf16>, vector<16x128xbf16>, vector<16x128xf32> -> vector<16x128xf32>
    %65 = vector.extract_strided_slice %32 {offsets = [0, 256], sizes = [16, 128], strides = [1, 1]} : vector<16x1536xbf16> to vector<16x128xbf16>
    %66 = vector.extract_strided_slice %32 {offsets = [0, 768], sizes = [16, 128], strides = [1, 1]} : vector<16x1536xbf16> to vector<16x128xbf16>
    %67 = vector.extract_strided_slice %32 {offsets = [0, 1280], sizes = [16, 128], strides = [1, 1]} : vector<16x1536xbf16> to vector<16x128xbf16>
    %cst_26 = arith.constant dense<0.000000e+00> : vector<16x16xf32>
    %68 = tpu.matmul %65, %66, %cst_26 {dimension_numbers = #tpu.dot_dimension_numbers<[1], [1], [0], [0], [0, 0, 1, 0], [], []>} : vector<16x128xbf16>, vector<16x128xbf16>, vector<16x16xf32> -> vector<16x16xf32>
    %69 = arith.addf %68, %23 : vector<16x16xf32>
    %cst_27 = arith.constant dense<0xFF800000> : vector<16xf32>
    %70 = vector.multi_reduction <maximumf>, %69, %cst_27 [1] : vector<16x16xf32> to vector<16xf32>
    %71 = vector.shape_cast %70 : vector<16xf32> to vector<16x1xf32>
    %72 = vector.broadcast %71 : vector<16x1xf32> to vector<16x16xf32>
    %73 = arith.subf %69, %72 : vector<16x16xf32>
    %74 = math.exp %73 : vector<16x16xf32>
    %cst_28 = arith.constant dense<0.000000e+00> : vector<16xf32>
    %75 = vector.multi_reduction <add>, %74, %cst_28 [1] : vector<16x16xf32> to vector<16xf32>
    %76 = vector.shape_cast %75 : vector<16xf32> to vector<16x1xf32>
    %77 = vector.broadcast %76 : vector<16x1xf32> to vector<16x16xf32>
    %78 = arith.divf %74, %77 : vector<16x16xf32>
    %79 = arith.truncf %78 : vector<16x16xf32> to vector<16x16xbf16>
    %cst_29 = arith.constant dense<0.000000e+00> : vector<16x128xf32>
    %80 = tpu.matmul %79, %67, %cst_29 {dimension_numbers = #tpu.dot_dimension_numbers<[1], [0], [0], [1], [0, 0, 1, 1], [], []>} : vector<16x16xbf16>, vector<16x128xbf16>, vector<16x128xf32> -> vector<16x128xf32>
    %81 = vector.extract_strided_slice %32 {offsets = [0, 384], sizes = [16, 128], strides = [1, 1]} : vector<16x1536xbf16> to vector<16x128xbf16>
    %82 = vector.extract_strided_slice %32 {offsets = [0, 896], sizes = [16, 128], strides = [1, 1]} : vector<16x1536xbf16> to vector<16x128xbf16>
    %83 = vector.extract_strided_slice %32 {offsets = [0, 1408], sizes = [16, 128], strides = [1, 1]} : vector<16x1536xbf16> to vector<16x128xbf16>
    %cst_30 = arith.constant dense<0.000000e+00> : vector<16x16xf32>
    %84 = tpu.matmul %81, %82, %cst_30 {dimension_numbers = #tpu.dot_dimension_numbers<[1], [1], [0], [0], [0, 0, 1, 0], [], []>} : vector<16x128xbf16>, vector<16x128xbf16>, vector<16x16xf32> -> vector<16x16xf32>
    %85 = arith.addf %84, %23 : vector<16x16xf32>
    %cst_31 = arith.constant dense<0xFF800000> : vector<16xf32>
    %86 = vector.multi_reduction <maximumf>, %85, %cst_31 [1] : vector<16x16xf32> to vector<16xf32>
    %87 = vector.shape_cast %86 : vector<16xf32> to vector<16x1xf32>
    %88 = vector.broadcast %87 : vector<16x1xf32> to vector<16x16xf32>
    %89 = arith.subf %85, %88 : vector<16x16xf32>
    %90 = math.exp %89 : vector<16x16xf32>
    %cst_32 = arith.constant dense<0.000000e+00> : vector<16xf32>
    %91 = vector.multi_reduction <add>, %90, %cst_32 [1] : vector<16x16xf32> to vector<16xf32>
    %92 = vector.shape_cast %91 : vector<16xf32> to vector<16x1xf32>
    %93 = vector.broadcast %92 : vector<16x1xf32> to vector<16x16xf32>
    %94 = arith.divf %90, %93 : vector<16x16xf32>
    %95 = arith.truncf %94 : vector<16x16xf32> to vector<16x16xbf16>
    %cst_33 = arith.constant dense<0.000000e+00> : vector<16x128xf32>
    %96 = tpu.matmul %95, %83, %cst_33 {dimension_numbers = #tpu.dot_dimension_numbers<[1], [0], [0], [1], [0, 0, 1, 1], [], []>} : vector<16x16xbf16>, vector<16x128xbf16>, vector<16x128xf32> -> vector<16x128xf32>
    %97 = tpu.concatenate %48, %64, %80, %96 in 1 : vector<16x128xf32>, vector<16x128xf32>, vector<16x128xf32>, vector<16x128xf32> -> vector<16x512xf32>
    %98 = arith.truncf %97 : vector<16x512xf32> to vector<16x512xbf16>
    %c0_34 = arith.constant 0 : index
    %c0_35 = arith.constant 0 : index
    %c0_36 = arith.constant 0 : index
    %99 = vector.load %arg6[%c0_34, %c0_35, %c0_36] : memref<2x512x128xbf16, #tpu.memory_space<vmem>>, vector<1x512x128xbf16>
    %100 = vector.shape_cast %99 : vector<1x512x128xbf16> to vector<512x128xbf16>
    %cst_37 = arith.constant dense<0.000000e+00> : vector<16x128xf32>
    %101 = tpu.matmul %98, %100, %cst_37 {dimension_numbers = #tpu.dot_dimension_numbers<[1], [0], [0], [1], [0, 0, 1, 1], [], []>} : vector<16x512xbf16>, vector<512x128xbf16>, vector<16x128xf32> -> vector<16x128xf32>
    %c0_38 = arith.constant 0 : index
    %c0_39 = arith.constant 0 : index
    %c0_40 = arith.constant 0 : index
    %102 = vector.load %arg7[%c0_38, %c0_39, %c0_40] : memref<2x1x128xf32, #tpu.memory_space<vmem>>, vector<1x1x128xf32>
    %103 = vector.shape_cast %102 : vector<1x1x128xf32> to vector<1x128xf32>
    %104 = vector.broadcast %103 : vector<1x128xf32> to vector<16x128xf32>
    %105 = arith.addf %101, %104 : vector<16x128xf32>
    %106 = arith.addf %22, %105 : vector<16x128xf32>
    %c0_41 = arith.constant 0 : index
    %c0_42 = arith.constant 0 : index
    %c0_43 = arith.constant 0 : index
    %107 = vector.load %arg8[%c0_41, %c0_42, %c0_43] : memref<2x1x128xf32, #tpu.memory_space<vmem>>, vector<1x1x128xf32>
    %108 = vector.shape_cast %107 : vector<1x1x128xf32> to vector<1x128xf32>
    %c0_44 = arith.constant 0 : index
    %c0_45 = arith.constant 0 : index
    %c0_46 = arith.constant 0 : index
    %109 = vector.load %arg9[%c0_44, %c0_45, %c0_46] : memref<2x1x128xf32, #tpu.memory_space<vmem>>, vector<1x1x128xf32>
    %110 = vector.shape_cast %109 : vector<1x1x128xf32> to vector<1x128xf32>
    %cst_47 = arith.constant dense<0.000000e+00> : vector<16xf32>
    %111 = vector.multi_reduction <add>, %106, %cst_47 [1] : vector<16x128xf32> to vector<16xf32>
    %112 = vector.shape_cast %111 : vector<16xf32> to vector<16x1xf32>
    %cst_48 = arith.constant 1.280000e+02 : f32
    %113 = vector.broadcast %cst_48 : f32 to vector<16x1xf32>
    %114 = arith.divf %112, %113 : vector<16x1xf32>
    %115 = vector.broadcast %114 : vector<16x1xf32> to vector<16x128xf32>
    %116 = arith.subf %106, %115 : vector<16x128xf32>
    %117 = arith.mulf %116, %116 : vector<16x128xf32>
    %cst_49 = arith.constant dense<0.000000e+00> : vector<16xf32>
    %118 = vector.multi_reduction <add>, %117, %cst_49 [1] : vector<16x128xf32> to vector<16xf32>
    %119 = vector.shape_cast %118 : vector<16xf32> to vector<16x1xf32>
    %cst_50 = arith.constant 1.280000e+02 : f32
    %120 = vector.broadcast %cst_50 : f32 to vector<16x1xf32>
    %121 = arith.divf %119, %120 : vector<16x1xf32>
    %cst_51 = arith.constant 9.99999996E-13 : f32
    %122 = vector.broadcast %cst_51 : f32 to vector<16x1xf32>
    %123 = arith.addf %121, %122 : vector<16x1xf32>
    %124 = math.rsqrt %123 : vector<16x1xf32>
    %125 = vector.broadcast %124 : vector<16x1xf32> to vector<16x128xf32>
    %126 = arith.mulf %116, %125 : vector<16x128xf32>
    %127 = vector.broadcast %108 : vector<1x128xf32> to vector<16x128xf32>
    %128 = arith.mulf %126, %127 : vector<16x128xf32>
    %129 = vector.broadcast %110 : vector<1x128xf32> to vector<16x128xf32>
    %130 = arith.addf %128, %129 : vector<16x128xf32>
    %131 = arith.truncf %130 : vector<16x128xf32> to vector<16x128xbf16>
    %c0_52 = arith.constant 0 : index
    %c0_53 = arith.constant 0 : index
    %c0_54 = arith.constant 0 : index
    %132 = vector.load %arg10[%c0_52, %c0_53, %c0_54] : memref<2x128x512xbf16, #tpu.memory_space<vmem>>, vector<1x128x512xbf16>
    %133 = vector.shape_cast %132 : vector<1x128x512xbf16> to vector<128x512xbf16>
    %cst_55 = arith.constant dense<0.000000e+00> : vector<16x512xf32>
    %134 = tpu.matmul %131, %133, %cst_55 {dimension_numbers = #tpu.dot_dimension_numbers<[1], [0], [0], [1], [0, 0, 1, 1], [], []>} : vector<16x128xbf16>, vector<128x512xbf16>, vector<16x512xf32> -> vector<16x512xf32>
    %c0_56 = arith.constant 0 : index
    %c0_57 = arith.constant 0 : index
    %c0_58 = arith.constant 0 : index
    %135 = vector.load %arg11[%c0_56, %c0_57, %c0_58] : memref<2x1x512xf32, #tpu.memory_space<vmem>>, vector<1x1x512xf32>
    %136 = vector.shape_cast %135 : vector<1x1x512xf32> to vector<1x512xf32>
    %137 = vector.broadcast %136 : vector<1x512xf32> to vector<16x512xf32>
    %138 = arith.addf %134, %137 : vector<16x512xf32>
    %139 = arith.mulf %138, %138 : vector<16x512xf32>
    %140 = arith.mulf %138, %139 : vector<16x512xf32>
    %cst_59 = arith.constant 4.471500e-02 : f32
    %141 = vector.broadcast %cst_59 : f32 to vector<16x512xf32>
    %142 = arith.mulf %141, %140 : vector<16x512xf32>
    %143 = arith.addf %138, %142 : vector<16x512xf32>
    %cst_60 = arith.constant 0.797884583 : f32
    %144 = vector.broadcast %cst_60 : f32 to vector<16x512xf32>
    %145 = arith.mulf %144, %143 : vector<16x512xf32>
    %146 = math.tanh %145 : vector<16x512xf32>
    %cst_61 = arith.constant 1.000000e+00 : f32
    %147 = vector.broadcast %cst_61 : f32 to vector<16x512xf32>
    %148 = arith.addf %147, %146 : vector<16x512xf32>
    %cst_62 = arith.constant 5.000000e-01 : f32
    %149 = vector.broadcast %cst_62 : f32 to vector<16x512xf32>
    %150 = arith.mulf %149, %148 : vector<16x512xf32>
    %151 = arith.mulf %138, %150 : vector<16x512xf32>
    %152 = arith.truncf %151 : vector<16x512xf32> to vector<16x512xbf16>
    %c0_63 = arith.constant 0 : index
    %c0_64 = arith.constant 0 : index
    %c0_65 = arith.constant 0 : index
    %153 = vector.load %arg12[%c0_63, %c0_64, %c0_65] : memref<2x512x128xbf16, #tpu.memory_space<vmem>>, vector<1x512x128xbf16>
    %154 = vector.shape_cast %153 : vector<1x512x128xbf16> to vector<512x128xbf16>
    %cst_66 = arith.constant dense<0.000000e+00> : vector<16x128xf32>
    %155 = tpu.matmul %152, %154, %cst_66 {dimension_numbers = #tpu.dot_dimension_numbers<[1], [0], [0], [1], [0, 0, 1, 1], [], []>} : vector<16x512xbf16>, vector<512x128xbf16>, vector<16x128xf32> -> vector<16x128xf32>
    %c0_67 = arith.constant 0 : index
    %c0_68 = arith.constant 0 : index
    %c0_69 = arith.constant 0 : index
    %156 = vector.load %arg13[%c0_67, %c0_68, %c0_69] : memref<2x1x128xf32, #tpu.memory_space<vmem>>, vector<1x1x128xf32>
    %157 = vector.shape_cast %156 : vector<1x1x128xf32> to vector<1x128xf32>
    %158 = vector.broadcast %157 : vector<1x128xf32> to vector<16x128xf32>
    %159 = arith.addf %155, %158 : vector<16x128xf32>
    %160 = arith.addf %130, %159 : vector<16x128xf32>
    %c0_70 = arith.constant 0 : index
    %c0_71 = arith.constant 0 : index
    %c0_72 = arith.constant 0 : index
    %161 = vector.load %arg14[%c0_70, %c0_71, %c0_72] : memref<2x1x128xf32, #tpu.memory_space<vmem>>, vector<1x1x128xf32>
    %162 = vector.shape_cast %161 : vector<1x1x128xf32> to vector<1x128xf32>
    %c0_73 = arith.constant 0 : index
    %c0_74 = arith.constant 0 : index
    %c0_75 = arith.constant 0 : index
    %163 = vector.load %arg15[%c0_73, %c0_74, %c0_75] : memref<2x1x128xf32, #tpu.memory_space<vmem>>, vector<1x1x128xf32>
    %164 = vector.shape_cast %163 : vector<1x1x128xf32> to vector<1x128xf32>
    %cst_76 = arith.constant dense<0.000000e+00> : vector<16xf32>
    %165 = vector.multi_reduction <add>, %160, %cst_76 [1] : vector<16x128xf32> to vector<16xf32>
    %166 = vector.shape_cast %165 : vector<16xf32> to vector<16x1xf32>
    %cst_77 = arith.constant 1.280000e+02 : f32
    %167 = vector.broadcast %cst_77 : f32 to vector<16x1xf32>
    %168 = arith.divf %166, %167 : vector<16x1xf32>
    %169 = vector.broadcast %168 : vector<16x1xf32> to vector<16x128xf32>
    %170 = arith.subf %160, %169 : vector<16x128xf32>
    %171 = arith.mulf %170, %170 : vector<16x128xf32>
    %cst_78 = arith.constant dense<0.000000e+00> : vector<16xf32>
    %172 = vector.multi_reduction <add>, %171, %cst_78 [1] : vector<16x128xf32> to vector<16xf32>
    %173 = vector.shape_cast %172 : vector<16xf32> to vector<16x1xf32>
    %cst_79 = arith.constant 1.280000e+02 : f32
    %174 = vector.broadcast %cst_79 : f32 to vector<16x1xf32>
    %175 = arith.divf %173, %174 : vector<16x1xf32>
    %cst_80 = arith.constant 9.99999996E-13 : f32
    %176 = vector.broadcast %cst_80 : f32 to vector<16x1xf32>
    %177 = arith.addf %175, %176 : vector<16x1xf32>
    %178 = math.rsqrt %177 : vector<16x1xf32>
    %179 = vector.broadcast %178 : vector<16x1xf32> to vector<16x128xf32>
    %180 = arith.mulf %170, %179 : vector<16x128xf32>
    %181 = vector.broadcast %162 : vector<1x128xf32> to vector<16x128xf32>
    %182 = arith.mulf %180, %181 : vector<16x128xf32>
    %183 = vector.broadcast %164 : vector<1x128xf32> to vector<16x128xf32>
    %184 = arith.addf %182, %183 : vector<16x128xf32>
    %185 = arith.truncf %184 : vector<16x128xf32> to vector<16x128xbf16>
    %c1 = arith.constant 1 : index
    %c0_81 = arith.constant 0 : index
    %c0_82 = arith.constant 0 : index
    %186 = vector.load %arg4[%c1, %c0_81, %c0_82] : memref<2x128x1536xbf16, #tpu.memory_space<vmem>>, vector<1x128x1536xbf16>
    %187 = vector.shape_cast %186 : vector<1x128x1536xbf16> to vector<128x1536xbf16>
    %cst_83 = arith.constant dense<0.000000e+00> : vector<16x1536xf32>
    %188 = tpu.matmul %185, %187, %cst_83 {dimension_numbers = #tpu.dot_dimension_numbers<[1], [0], [0], [1], [0, 0, 1, 1], [], []>} : vector<16x128xbf16>, vector<128x1536xbf16>, vector<16x1536xf32> -> vector<16x1536xf32>
    %c1_84 = arith.constant 1 : index
    %c0_85 = arith.constant 0 : index
    %c0_86 = arith.constant 0 : index
    %189 = vector.load %arg5[%c1_84, %c0_85, %c0_86] : memref<2x1x1536xf32, #tpu.memory_space<vmem>>, vector<1x1x1536xf32>
    %190 = vector.shape_cast %189 : vector<1x1x1536xf32> to vector<1x1536xf32>
    %191 = vector.broadcast %190 : vector<1x1536xf32> to vector<16x1536xf32>
    %192 = arith.addf %188, %191 : vector<16x1536xf32>
    %193 = arith.truncf %192 : vector<16x1536xf32> to vector<16x1536xbf16>
    %194 = vector.extract_strided_slice %193 {offsets = [0, 0], sizes = [16, 128], strides = [1, 1]} : vector<16x1536xbf16> to vector<16x128xbf16>
    %195 = vector.extract_strided_slice %193 {offsets = [0, 512], sizes = [16, 128], strides = [1, 1]} : vector<16x1536xbf16> to vector<16x128xbf16>
    %196 = vector.extract_strided_slice %193 {offsets = [0, 1024], sizes = [16, 128], strides = [1, 1]} : vector<16x1536xbf16> to vector<16x128xbf16>
    %cst_87 = arith.constant dense<0.000000e+00> : vector<16x16xf32>
    %197 = tpu.matmul %194, %195, %cst_87 {dimension_numbers = #tpu.dot_dimension_numbers<[1], [1], [0], [0], [0, 0, 1, 0], [], []>} : vector<16x128xbf16>, vector<16x128xbf16>, vector<16x16xf32> -> vector<16x16xf32>
    %198 = arith.addf %197, %23 : vector<16x16xf32>
    %cst_88 = arith.constant dense<0xFF800000> : vector<16xf32>
    %199 = vector.multi_reduction <maximumf>, %198, %cst_88 [1] : vector<16x16xf32> to vector<16xf32>
    %200 = vector.shape_cast %199 : vector<16xf32> to vector<16x1xf32>
    %201 = vector.broadcast %200 : vector<16x1xf32> to vector<16x16xf32>
    %202 = arith.subf %198, %201 : vector<16x16xf32>
    %203 = math.exp %202 : vector<16x16xf32>
    %cst_89 = arith.constant dense<0.000000e+00> : vector<16xf32>
    %204 = vector.multi_reduction <add>, %203, %cst_89 [1] : vector<16x16xf32> to vector<16xf32>
    %205 = vector.shape_cast %204 : vector<16xf32> to vector<16x1xf32>
    %206 = vector.broadcast %205 : vector<16x1xf32> to vector<16x16xf32>
    %207 = arith.divf %203, %206 : vector<16x16xf32>
    %208 = arith.truncf %207 : vector<16x16xf32> to vector<16x16xbf16>
    %cst_90 = arith.constant dense<0.000000e+00> : vector<16x128xf32>
    %209 = tpu.matmul %208, %196, %cst_90 {dimension_numbers = #tpu.dot_dimension_numbers<[1], [0], [0], [1], [0, 0, 1, 1], [], []>} : vector<16x16xbf16>, vector<16x128xbf16>, vector<16x128xf32> -> vector<16x128xf32>
    %210 = vector.extract_strided_slice %193 {offsets = [0, 128], sizes = [16, 128], strides = [1, 1]} : vector<16x1536xbf16> to vector<16x128xbf16>
    %211 = vector.extract_strided_slice %193 {offsets = [0, 640], sizes = [16, 128], strides = [1, 1]} : vector<16x1536xbf16> to vector<16x128xbf16>
    %212 = vector.extract_strided_slice %193 {offsets = [0, 1152], sizes = [16, 128], strides = [1, 1]} : vector<16x1536xbf16> to vector<16x128xbf16>
    %cst_91 = arith.constant dense<0.000000e+00> : vector<16x16xf32>
    %213 = tpu.matmul %210, %211, %cst_91 {dimension_numbers = #tpu.dot_dimension_numbers<[1], [1], [0], [0], [0, 0, 1, 0], [], []>} : vector<16x128xbf16>, vector<16x128xbf16>, vector<16x16xf32> -> vector<16x16xf32>
    %214 = arith.addf %213, %23 : vector<16x16xf32>
    %cst_92 = arith.constant dense<0xFF800000> : vector<16xf32>
    %215 = vector.multi_reduction <maximumf>, %214, %cst_92 [1] : vector<16x16xf32> to vector<16xf32>
    %216 = vector.shape_cast %215 : vector<16xf32> to vector<16x1xf32>
    %217 = vector.broadcast %216 : vector<16x1xf32> to vector<16x16xf32>
    %218 = arith.subf %214, %217 : vector<16x16xf32>
    %219 = math.exp %218 : vector<16x16xf32>
    %cst_93 = arith.constant dense<0.000000e+00> : vector<16xf32>
    %220 = vector.multi_reduction <add>, %219, %cst_93 [1] : vector<16x16xf32> to vector<16xf32>
    %221 = vector.shape_cast %220 : vector<16xf32> to vector<16x1xf32>
    %222 = vector.broadcast %221 : vector<16x1xf32> to vector<16x16xf32>
    %223 = arith.divf %219, %222 : vector<16x16xf32>
    %224 = arith.truncf %223 : vector<16x16xf32> to vector<16x16xbf16>
    %cst_94 = arith.constant dense<0.000000e+00> : vector<16x128xf32>
    %225 = tpu.matmul %224, %212, %cst_94 {dimension_numbers = #tpu.dot_dimension_numbers<[1], [0], [0], [1], [0, 0, 1, 1], [], []>} : vector<16x16xbf16>, vector<16x128xbf16>, vector<16x128xf32> -> vector<16x128xf32>
    %226 = vector.extract_strided_slice %193 {offsets = [0, 256], sizes = [16, 128], strides = [1, 1]} : vector<16x1536xbf16> to vector<16x128xbf16>
    %227 = vector.extract_strided_slice %193 {offsets = [0, 768], sizes = [16, 128], strides = [1, 1]} : vector<16x1536xbf16> to vector<16x128xbf16>
    %228 = vector.extract_strided_slice %193 {offsets = [0, 1280], sizes = [16, 128], strides = [1, 1]} : vector<16x1536xbf16> to vector<16x128xbf16>
    %cst_95 = arith.constant dense<0.000000e+00> : vector<16x16xf32>
    %229 = tpu.matmul %226, %227, %cst_95 {dimension_numbers = #tpu.dot_dimension_numbers<[1], [1], [0], [0], [0, 0, 1, 0], [], []>} : vector<16x128xbf16>, vector<16x128xbf16>, vector<16x16xf32> -> vector<16x16xf32>
    %230 = arith.addf %229, %23 : vector<16x16xf32>
    %cst_96 = arith.constant dense<0xFF800000> : vector<16xf32>
    %231 = vector.multi_reduction <maximumf>, %230, %cst_96 [1] : vector<16x16xf32> to vector<16xf32>
    %232 = vector.shape_cast %231 : vector<16xf32> to vector<16x1xf32>
    %233 = vector.broadcast %232 : vector<16x1xf32> to vector<16x16xf32>
    %234 = arith.subf %230, %233 : vector<16x16xf32>
    %235 = math.exp %234 : vector<16x16xf32>
    %cst_97 = arith.constant dense<0.000000e+00> : vector<16xf32>
    %236 = vector.multi_reduction <add>, %235, %cst_97 [1] : vector<16x16xf32> to vector<16xf32>
    %237 = vector.shape_cast %236 : vector<16xf32> to vector<16x1xf32>
    %238 = vector.broadcast %237 : vector<16x1xf32> to vector<16x16xf32>
    %239 = arith.divf %235, %238 : vector<16x16xf32>
    %240 = arith.truncf %239 : vector<16x16xf32> to vector<16x16xbf16>
    %cst_98 = arith.constant dense<0.000000e+00> : vector<16x128xf32>
    %241 = tpu.matmul %240, %228, %cst_98 {dimension_numbers = #tpu.dot_dimension_numbers<[1], [0], [0], [1], [0, 0, 1, 1], [], []>} : vector<16x16xbf16>, vector<16x128xbf16>, vector<16x128xf32> -> vector<16x128xf32>
    %242 = vector.extract_strided_slice %193 {offsets = [0, 384], sizes = [16, 128], strides = [1, 1]} : vector<16x1536xbf16> to vector<16x128xbf16>
    %243 = vector.extract_strided_slice %193 {offsets = [0, 896], sizes = [16, 128], strides = [1, 1]} : vector<16x1536xbf16> to vector<16x128xbf16>
    %244 = vector.extract_strided_slice %193 {offsets = [0, 1408], sizes = [16, 128], strides = [1, 1]} : vector<16x1536xbf16> to vector<16x128xbf16>
    %cst_99 = arith.constant dense<0.000000e+00> : vector<16x16xf32>
    %245 = tpu.matmul %242, %243, %cst_99 {dimension_numbers = #tpu.dot_dimension_numbers<[1], [1], [0], [0], [0, 0, 1, 0], [], []>} : vector<16x128xbf16>, vector<16x128xbf16>, vector<16x16xf32> -> vector<16x16xf32>
    %246 = arith.addf %245, %23 : vector<16x16xf32>
    %cst_100 = arith.constant dense<0xFF800000> : vector<16xf32>
    %247 = vector.multi_reduction <maximumf>, %246, %cst_100 [1] : vector<16x16xf32> to vector<16xf32>
    %248 = vector.shape_cast %247 : vector<16xf32> to vector<16x1xf32>
    %249 = vector.broadcast %248 : vector<16x1xf32> to vector<16x16xf32>
    %250 = arith.subf %246, %249 : vector<16x16xf32>
    %251 = math.exp %250 : vector<16x16xf32>
    %cst_101 = arith.constant dense<0.000000e+00> : vector<16xf32>
    %252 = vector.multi_reduction <add>, %251, %cst_101 [1] : vector<16x16xf32> to vector<16xf32>
    %253 = vector.shape_cast %252 : vector<16xf32> to vector<16x1xf32>
    %254 = vector.broadcast %253 : vector<16x1xf32> to vector<16x16xf32>
    %255 = arith.divf %251, %254 : vector<16x16xf32>
    %256 = arith.truncf %255 : vector<16x16xf32> to vector<16x16xbf16>
    %cst_102 = arith.constant dense<0.000000e+00> : vector<16x128xf32>
    %257 = tpu.matmul %256, %244, %cst_102 {dimension_numbers = #tpu.dot_dimension_numbers<[1], [0], [0], [1], [0, 0, 1, 1], [], []>} : vector<16x16xbf16>, vector<16x128xbf16>, vector<16x128xf32> -> vector<16x128xf32>
    %258 = tpu.concatenate %209, %225, %241, %257 in 1 : vector<16x128xf32>, vector<16x128xf32>, vector<16x128xf32>, vector<16x128xf32> -> vector<16x512xf32>
    %259 = arith.truncf %258 : vector<16x512xf32> to vector<16x512xbf16>
    %c1_103 = arith.constant 1 : index
    %c0_104 = arith.constant 0 : index
    %c0_105 = arith.constant 0 : index
    %260 = vector.load %arg6[%c1_103, %c0_104, %c0_105] : memref<2x512x128xbf16, #tpu.memory_space<vmem>>, vector<1x512x128xbf16>
    %261 = vector.shape_cast %260 : vector<1x512x128xbf16> to vector<512x128xbf16>
    %cst_106 = arith.constant dense<0.000000e+00> : vector<16x128xf32>
    %262 = tpu.matmul %259, %261, %cst_106 {dimension_numbers = #tpu.dot_dimension_numbers<[1], [0], [0], [1], [0, 0, 1, 1], [], []>} : vector<16x512xbf16>, vector<512x128xbf16>, vector<16x128xf32> -> vector<16x128xf32>
    %c1_107 = arith.constant 1 : index
    %c0_108 = arith.constant 0 : index
    %c0_109 = arith.constant 0 : index
    %263 = vector.load %arg7[%c1_107, %c0_108, %c0_109] : memref<2x1x128xf32, #tpu.memory_space<vmem>>, vector<1x1x128xf32>
    %264 = vector.shape_cast %263 : vector<1x1x128xf32> to vector<1x128xf32>
    %265 = vector.broadcast %264 : vector<1x128xf32> to vector<16x128xf32>
    %266 = arith.addf %262, %265 : vector<16x128xf32>
    %267 = arith.addf %184, %266 : vector<16x128xf32>
    %c1_110 = arith.constant 1 : index
    %c0_111 = arith.constant 0 : index
    %c0_112 = arith.constant 0 : index
    %268 = vector.load %arg8[%c1_110, %c0_111, %c0_112] : memref<2x1x128xf32, #tpu.memory_space<vmem>>, vector<1x1x128xf32>
    %269 = vector.shape_cast %268 : vector<1x1x128xf32> to vector<1x128xf32>
    %c1_113 = arith.constant 1 : index
    %c0_114 = arith.constant 0 : index
    %c0_115 = arith.constant 0 : index
    %270 = vector.load %arg9[%c1_113, %c0_114, %c0_115] : memref<2x1x128xf32, #tpu.memory_space<vmem>>, vector<1x1x128xf32>
    %271 = vector.shape_cast %270 : vector<1x1x128xf32> to vector<1x128xf32>
    %cst_116 = arith.constant dense<0.000000e+00> : vector<16xf32>
    %272 = vector.multi_reduction <add>, %267, %cst_116 [1] : vector<16x128xf32> to vector<16xf32>
    %273 = vector.shape_cast %272 : vector<16xf32> to vector<16x1xf32>
    %cst_117 = arith.constant 1.280000e+02 : f32
    %274 = vector.broadcast %cst_117 : f32 to vector<16x1xf32>
    %275 = arith.divf %273, %274 : vector<16x1xf32>
    %276 = vector.broadcast %275 : vector<16x1xf32> to vector<16x128xf32>
    %277 = arith.subf %267, %276 : vector<16x128xf32>
    %278 = arith.mulf %277, %277 : vector<16x128xf32>
    %cst_118 = arith.constant dense<0.000000e+00> : vector<16xf32>
    %279 = vector.multi_reduction <add>, %278, %cst_118 [1] : vector<16x128xf32> to vector<16xf32>
    %280 = vector.shape_cast %279 : vector<16xf32> to vector<16x1xf32>
    %cst_119 = arith.constant 1.280000e+02 : f32
    %281 = vector.broadcast %cst_119 : f32 to vector<16x1xf32>
    %282 = arith.divf %280, %281 : vector<16x1xf32>
    %cst_120 = arith.constant 9.99999996E-13 : f32
    %283 = vector.broadcast %cst_120 : f32 to vector<16x1xf32>
    %284 = arith.addf %282, %283 : vector<16x1xf32>
    %285 = math.rsqrt %284 : vector<16x1xf32>
    %286 = vector.broadcast %285 : vector<16x1xf32> to vector<16x128xf32>
    %287 = arith.mulf %277, %286 : vector<16x128xf32>
    %288 = vector.broadcast %269 : vector<1x128xf32> to vector<16x128xf32>
    %289 = arith.mulf %287, %288 : vector<16x128xf32>
    %290 = vector.broadcast %271 : vector<1x128xf32> to vector<16x128xf32>
    %291 = arith.addf %289, %290 : vector<16x128xf32>
    %292 = arith.truncf %291 : vector<16x128xf32> to vector<16x128xbf16>
    %c1_121 = arith.constant 1 : index
    %c0_122 = arith.constant 0 : index
    %c0_123 = arith.constant 0 : index
    %293 = vector.load %arg10[%c1_121, %c0_122, %c0_123] : memref<2x128x512xbf16, #tpu.memory_space<vmem>>, vector<1x128x512xbf16>
    %294 = vector.shape_cast %293 : vector<1x128x512xbf16> to vector<128x512xbf16>
    %cst_124 = arith.constant dense<0.000000e+00> : vector<16x512xf32>
    %295 = tpu.matmul %292, %294, %cst_124 {dimension_numbers = #tpu.dot_dimension_numbers<[1], [0], [0], [1], [0, 0, 1, 1], [], []>} : vector<16x128xbf16>, vector<128x512xbf16>, vector<16x512xf32> -> vector<16x512xf32>
    %c1_125 = arith.constant 1 : index
    %c0_126 = arith.constant 0 : index
    %c0_127 = arith.constant 0 : index
    %296 = vector.load %arg11[%c1_125, %c0_126, %c0_127] : memref<2x1x512xf32, #tpu.memory_space<vmem>>, vector<1x1x512xf32>
    %297 = vector.shape_cast %296 : vector<1x1x512xf32> to vector<1x512xf32>
    %298 = vector.broadcast %297 : vector<1x512xf32> to vector<16x512xf32>
    %299 = arith.addf %295, %298 : vector<16x512xf32>
    %300 = arith.mulf %299, %299 : vector<16x512xf32>
    %301 = arith.mulf %299, %300 : vector<16x512xf32>
    %cst_128 = arith.constant 4.471500e-02 : f32
    %302 = vector.broadcast %cst_128 : f32 to vector<16x512xf32>
    %303 = arith.mulf %302, %301 : vector<16x512xf32>
    %304 = arith.addf %299, %303 : vector<16x512xf32>
    %cst_129 = arith.constant 0.797884583 : f32
    %305 = vector.broadcast %cst_129 : f32 to vector<16x512xf32>
    %306 = arith.mulf %305, %304 : vector<16x512xf32>
    %307 = math.tanh %306 : vector<16x512xf32>
    %cst_130 = arith.constant 1.000000e+00 : f32
    %308 = vector.broadcast %cst_130 : f32 to vector<16x512xf32>
    %309 = arith.addf %308, %307 : vector<16x512xf32>
    %cst_131 = arith.constant 5.000000e-01 : f32
    %310 = vector.broadcast %cst_131 : f32 to vector<16x512xf32>
    %311 = arith.mulf %310, %309 : vector<16x512xf32>
    %312 = arith.mulf %299, %311 : vector<16x512xf32>
    %313 = arith.truncf %312 : vector<16x512xf32> to vector<16x512xbf16>
    %c1_132 = arith.constant 1 : index
    %c0_133 = arith.constant 0 : index
    %c0_134 = arith.constant 0 : index
    %314 = vector.load %arg12[%c1_132, %c0_133, %c0_134] : memref<2x512x128xbf16, #tpu.memory_space<vmem>>, vector<1x512x128xbf16>
    %315 = vector.shape_cast %314 : vector<1x512x128xbf16> to vector<512x128xbf16>
    %cst_135 = arith.constant dense<0.000000e+00> : vector<16x128xf32>
    %316 = tpu.matmul %313, %315, %cst_135 {dimension_numbers = #tpu.dot_dimension_numbers<[1], [0], [0], [1], [0, 0, 1, 1], [], []>} : vector<16x512xbf16>, vector<512x128xbf16>, vector<16x128xf32> -> vector<16x128xf32>
    %c1_136 = arith.constant 1 : index
    %c0_137 = arith.constant 0 : index
    %c0_138 = arith.constant 0 : index
    %317 = vector.load %arg13[%c1_136, %c0_137, %c0_138] : memref<2x1x128xf32, #tpu.memory_space<vmem>>, vector<1x1x128xf32>
    %318 = vector.shape_cast %317 : vector<1x1x128xf32> to vector<1x128xf32>
    %319 = vector.broadcast %318 : vector<1x128xf32> to vector<16x128xf32>
    %320 = arith.addf %316, %319 : vector<16x128xf32>
    %321 = arith.addf %291, %320 : vector<16x128xf32>
    %c1_139 = arith.constant 1 : index
    %c0_140 = arith.constant 0 : index
    %c0_141 = arith.constant 0 : index
    %322 = vector.load %arg14[%c1_139, %c0_140, %c0_141] : memref<2x1x128xf32, #tpu.memory_space<vmem>>, vector<1x1x128xf32>
    %323 = vector.shape_cast %322 : vector<1x1x128xf32> to vector<1x128xf32>
    %c1_142 = arith.constant 1 : index
    %c0_143 = arith.constant 0 : index
    %c0_144 = arith.constant 0 : index
    %324 = vector.load %arg15[%c1_142, %c0_143, %c0_144] : memref<2x1x128xf32, #tpu.memory_space<vmem>>, vector<1x1x128xf32>
    %325 = vector.shape_cast %324 : vector<1x1x128xf32> to vector<1x128xf32>
    %cst_145 = arith.constant dense<0.000000e+00> : vector<16xf32>
    %326 = vector.multi_reduction <add>, %321, %cst_145 [1] : vector<16x128xf32> to vector<16xf32>
    %327 = vector.shape_cast %326 : vector<16xf32> to vector<16x1xf32>
    %cst_146 = arith.constant 1.280000e+02 : f32
    %328 = vector.broadcast %cst_146 : f32 to vector<16x1xf32>
    %329 = arith.divf %327, %328 : vector<16x1xf32>
    %330 = vector.broadcast %329 : vector<16x1xf32> to vector<16x128xf32>
    %331 = arith.subf %321, %330 : vector<16x128xf32>
    %332 = arith.mulf %331, %331 : vector<16x128xf32>
    %cst_147 = arith.constant dense<0.000000e+00> : vector<16xf32>
    %333 = vector.multi_reduction <add>, %332, %cst_147 [1] : vector<16x128xf32> to vector<16xf32>
    %334 = vector.shape_cast %333 : vector<16xf32> to vector<16x1xf32>
    %cst_148 = arith.constant 1.280000e+02 : f32
    %335 = vector.broadcast %cst_148 : f32 to vector<16x1xf32>
    %336 = arith.divf %334, %335 : vector<16x1xf32>
    %cst_149 = arith.constant 9.99999996E-13 : f32
    %337 = vector.broadcast %cst_149 : f32 to vector<16x1xf32>
    %338 = arith.addf %336, %337 : vector<16x1xf32>
    %339 = math.rsqrt %338 : vector<16x1xf32>
    %340 = vector.broadcast %339 : vector<16x1xf32> to vector<16x128xf32>
    %341 = arith.mulf %331, %340 : vector<16x128xf32>
    %342 = vector.broadcast %323 : vector<1x128xf32> to vector<16x128xf32>
    %343 = arith.mulf %341, %342 : vector<16x128xf32>
    %344 = vector.broadcast %325 : vector<1x128xf32> to vector<16x128xf32>
    %345 = arith.addf %343, %344 : vector<16x128xf32>
    %346 = vector.extract_strided_slice %345 {offsets = [0, 0], sizes = [1, 128], strides = [1, 1]} : vector<16x128xf32> to vector<1x128xf32>
    %347 = vector.extract_strided_slice %345 {offsets = [8, 0], sizes = [1, 128], strides = [1, 1]} : vector<16x128xf32> to vector<1x128xf32>
    %348 = tpu.concatenate %346, %347 in 0 : vector<1x128xf32>, vector<1x128xf32> -> vector<2x128xf32>
    %349 = arith.truncf %348 : vector<2x128xf32> to vector<2x128xbf16>
    %c0_150 = arith.constant 0 : index
    %c0_151 = arith.constant 0 : index
    %350 = vector.load %arg16[%c0_150, %c0_151] : memref<128x128xbf16, #tpu.memory_space<vmem>>, vector<128x128xbf16>
    %cst_152 = arith.constant dense<0.000000e+00> : vector<2x128xf32>
    %351 = tpu.matmul %349, %350, %cst_152 {dimension_numbers = #tpu.dot_dimension_numbers<[1], [0], [0], [1], [0, 0, 1, 1], [], []>} : vector<2x128xbf16>, vector<128x128xbf16>, vector<2x128xf32> -> vector<2x128xf32>
    %c0_153 = arith.constant 0 : index
    %c0_154 = arith.constant 0 : index
    %352 = vector.load %arg17[%c0_153, %c0_154] : memref<1x128xf32, #tpu.memory_space<vmem>>, vector<1x128xf32>
    %353 = vector.broadcast %352 : vector<1x128xf32> to vector<2x128xf32>
    %354 = arith.addf %351, %353 : vector<2x128xf32>
    %355 = math.tanh %354 : vector<2x128xf32>
    %356 = arith.truncf %355 : vector<2x128xf32> to vector<2x128xbf16>
    %c0_155 = arith.constant 0 : index
    %c0_156 = arith.constant 0 : index
    %357 = vector.load %arg18[%c0_155, %c0_156] : memref<128x512xbf16, #tpu.memory_space<vmem>>, vector<128x512xbf16>
    %cst_157 = arith.constant dense<0.000000e+00> : vector<2x512xf32>
    %358 = tpu.matmul %356, %357, %cst_157 {dimension_numbers = #tpu.dot_dimension_numbers<[1], [0], [0], [1], [0, 0, 1, 1], [], []>} : vector<2x128xbf16>, vector<128x512xbf16>, vector<2x512xf32> -> vector<2x512xf32>
    %c0_158 = arith.constant 0 : index
    %c0_159 = arith.constant 0 : index
    %359 = vector.load %arg19[%c0_158, %c0_159] : memref<1x512xf32, #tpu.memory_space<vmem>>, vector<1x512xf32>
    %360 = vector.broadcast %359 : vector<1x512xf32> to vector<2x512xf32>
    %361 = arith.addf %358, %360 : vector<2x512xf32>
    %cst_160 = arith.constant 0.000000e+00 : f32
    %362 = vector.broadcast %cst_160 : f32 to vector<2x512xf32>
    %363 = arith.maximumf %361, %362 : vector<2x512xf32>
    %364 = arith.truncf %363 : vector<2x512xf32> to vector<2x512xbf16>
    %c0_161 = arith.constant 0 : index
    %c0_162 = arith.constant 0 : index
    %365 = vector.load %arg20[%c0_161, %c0_162] : memref<512x256xbf16, #tpu.memory_space<vmem>>, vector<512x256xbf16>
    %cst_163 = arith.constant dense<0.000000e+00> : vector<2x256xf32>
    %366 = tpu.matmul %364, %365, %cst_163 {dimension_numbers = #tpu.dot_dimension_numbers<[1], [0], [0], [1], [0, 0, 1, 1], [], []>} : vector<2x512xbf16>, vector<512x256xbf16>, vector<2x256xf32> -> vector<2x256xf32>
    %c0_164 = arith.constant 0 : index
    %c0_165 = arith.constant 0 : index
    %367 = vector.load %arg21[%c0_164, %c0_165] : memref<1x256xf32, #tpu.memory_space<vmem>>, vector<1x256xf32>
    %368 = vector.broadcast %367 : vector<1x256xf32> to vector<2x256xf32>
    %369 = arith.addf %366, %368 : vector<2x256xf32>
    %370 = arith.truncf %369 : vector<2x256xf32> to vector<2x256xbf16>
    %c0_166 = arith.constant 0 : index
    %c0_167 = arith.constant 0 : index
    %371 = vector.load %arg22[%c0_166, %c0_167] : memref<256x128xbf16, #tpu.memory_space<vmem>>, vector<256x128xbf16>
    %cst_168 = arith.constant dense<0.000000e+00> : vector<2x128xf32>
    %372 = tpu.matmul %370, %371, %cst_168 {dimension_numbers = #tpu.dot_dimension_numbers<[1], [0], [0], [1], [0, 0, 1, 1], [], []>} : vector<2x256xbf16>, vector<256x128xbf16>, vector<2x128xf32> -> vector<2x128xf32>
    %c0_169 = arith.constant 0 : index
    %c0_170 = arith.constant 0 : index
    %373 = vector.load %arg23[%c0_169, %c0_170] : memref<1x128xf32, #tpu.memory_space<vmem>>, vector<1x128xf32>
    %374 = vector.broadcast %373 : vector<1x128xf32> to vector<2x128xf32>
    %375 = arith.addf %372, %374 : vector<2x128xf32>
    %cst_171 = arith.constant 0.000000e+00 : f32
    %376 = vector.broadcast %cst_171 : f32 to vector<2x128xf32>
    %377 = arith.maximumf %375, %376 : vector<2x128xf32>
    %378 = arith.truncf %377 : vector<2x128xf32> to vector<2x128xbf16>
    %c0_172 = arith.constant 0 : index
    %c0_173 = arith.constant 0 : index
    %379 = vector.load %arg24[%c0_172, %c0_173] : memref<128x128xbf16, #tpu.memory_space<vmem>>, vector<128x128xbf16>
    %cst_174 = arith.constant dense<0.000000e+00> : vector<2x128xf32>
    %380 = tpu.matmul %378, %379, %cst_174 {dimension_numbers = #tpu.dot_dimension_numbers<[1], [0], [0], [1], [0, 0, 1, 1], [], []>} : vector<2x128xbf16>, vector<128x128xbf16>, vector<2x128xf32> -> vector<2x128xf32>
    %c0_175 = arith.constant 0 : index
    %c0_176 = arith.constant 0 : index
    %381 = vector.load %arg25[%c0_175, %c0_176] : memref<1x128xf32, #tpu.memory_space<vmem>>, vector<1x128xf32>
    %382 = vector.broadcast %381 : vector<1x128xf32> to vector<2x128xf32>
    %383 = arith.addf %380, %382 : vector<2x128xf32>
    %c0_177 = arith.constant 0 : index
    %c0_178 = arith.constant 0 : index
    %384 = vector.load %arg26[%c0_177, %c0_178] : memref<2x128xf32, #tpu.memory_space<vmem>>, vector<2x128xf32>
    tpu.vector_store %arg26[%c0_177, %c0_178], %383 {strides = array<i32>} : memref<2x128xf32, #tpu.memory_space<vmem>>, vector<2x128xf32>,
    return
  }
}

</mosaic_0001>

<bundles_post_ra>
// kernel: forward.1
= control target key start
LH: loop header
LB: loop body
LE: loop exit
PB: predicated region body
PF: predicated region fallthrough
CT: control target
= control target key end

     0   :  { %s10637_s0 = inlined_call_operand.vmem [shape: f32[16,128], index: 0, kind: input, shape index: {}]   ;;  %s10638_s1 = inlined_call_operand.vmem [shape: f32[16,16], index: 1, kind: input, shape index: {}]   ;;  %s10639_s2 = inlined_call_operand.vmem [shape: f32[1,128], index: 2, kind: input, shape index: {}]   ;;  %s10640_s3 = inlined_call_operand.vmem [shape: f32[1,128], index: 3, kind: input, shape index: {}]   ;;  %s10641_s4 = inlined_call_operand.vmem [shape: bf16[2,128,1536], index: 4, kind: input, shape index: {}]   ;;  %s10642_s5 = inlined_call_operand.vmem [shape: f32[2,1,1536], index: 5, kind: input, shape index: {}]   ;;  %s10643_s6 = inlined_call_operand.vmem [shape: bf16[2,512,128], index: 6, kind: input, shape index: {}]   ;;  %s10644_s7 = inlined_call_operand.vmem [shape: f32[2,1,128], index: 7, kind: input, shape index: {}]   ;;  %s10645_s8 = inlined_call_operand.vmem [shape: f32[2,1,128], index: 8, kind: input, shape index: {}]   ;;  %s10646_s9 = inlined_call_operand.vmem [shape: f32[2,1,128], index: 9, kind: input, shape index: {}]   ;;  %s10647_s10 = inlined_call_operand.vmem [shape: bf16[2,128,512], index: 10, kind: input, shape index: {}]   ;;  %s10648_s11 = inlined_call_operand.vmem [shape: f32[2,1,512], index: 11, kind: input, shape index: {}]   ;;  %s10649_s12 = inlined_call_operand.vmem [shape: bf16[2,512,128], index: 12, kind: input, shape index: {}]   ;;  %s10650_s13 = inlined_call_operand.vmem [shape: f32[2,1,128], index: 13, kind: input, shape index: {}]   ;;  %s10651_s14 = inlined_call_operand.vmem [shape: f32[2,1,128], index: 14, kind: input, shape index: {}]   ;;  %s10652_s15 = inlined_call_operand.vmem [shape: f32[2,1,128], index: 15, kind: input, shape index: {}]   ;;  %s10653_s16 = inlined_call_operand.vmem [shape: bf16[128,128], index: 16, kind: input, shape index: {}]   ;;  %s10654_s17 = inlined_call_operand.vmem [shape: f32[1,128], index: 17, kind: input, shape index: {}]   ;;  %s10655_s18 = inlined_call_operand.vmem [shape: bf16[128,512], index: 18, kind: input, shape index: {}]   ;;  %s10656_s19 = inlined_call_operand.vmem [shape: f32[1,512], index: 19, kind: input, shape index: {}]   ;;  %s10657_s20 = inlined_call_operand.vmem [shape: bf16[512,256], index: 20, kind: input, shape index: {}]   ;;  %s10658_s21 = inlined_call_operand.vmem [shape: f32[1,256], index: 21, kind: input, shape index: {}]   ;;  %s10659_s22 = inlined_call_operand.vmem [shape: bf16[256,128], index: 22, kind: input, shape index: {}]   ;;  %s10660_s23 = inlined_call_operand.vmem [shape: f32[1,128], index: 23, kind: input, shape index: {}]   ;;  %s10661_s24 = inlined_call_operand.vmem [shape: bf16[128,128], index: 24, kind: input, shape index: {}]   ;;  %s10662_s25 = inlined_call_operand.vmem [shape: f32[1,128], index: 25, kind: input, shape index: {}]   ;;  %s10663_s26 = inlined_call_operand.hbm [shape: f32[2,128], index: 26, kind: output, shape index: {}]  }
   0x1   :  { %10673 = sst [smem:[#allocation5_spill]] %s10637_s0 }
   0x2   :  { %10674 = sst [smem:[#allocation6_spill]] %s10638_s1 }
   0x3   :  { %10675 = sst [smem:[#allocation7_spill]] %s10639_s2 }
   0x4   :  { %10676 = sst [smem:[#allocation8_spill]] %s10640_s3 }
   0x5   :  { %10677 = sst [smem:[#allocation9_spill]] %s10641_s4 }
   0x6   :  { %10678 = sst [smem:[#allocation10_spill]] %s10642_s5 }
   0x7   :  { %10679 = sst [smem:[#allocation11_spill]] %s10643_s6 }
   0x8   :  { %10680 = sst [smem:[#allocation12_spill]] %s10644_s7 }
   0x9   :  { %10681 = sst [smem:[#allocation13_spill]] %s10645_s8 }
   0xa   :  { %10682 = sst [smem:[#allocation14_spill]] %s10646_s9 }
   0xb   :  { %10683 = sst [smem:[#allocation15_spill]] %s10647_s10 }
   0xc   :  { %10684 = sst [smem:[#allocation16_spill]] %s10658_s21 }
   0xd   :  { %10685 = sst [smem:[#allocation17_spill]] %s10660_s23 }
   0xe   :  { %10686 = sst [smem:[#allocation18_spill]] %s10662_s25 }
   0xf   :  { %10687 = sst [smem:[#allocation19_spill]] %s10663_s26 }
  0x10   :  { %s10688_s7 = sld [smem:[#allocation5_spill]]  ;;  %v8365_v44 = vmov 0  }
  0x11   :  { %s10689_s0 = sld [smem:[#allocation9_spill]]  ;;  %803 = vmatprep.mubr.bf16.mxu0 %v8365_v44  ;;  %846 = vmatprep.mubr.bf16.mxu1 %v8365_v44 }
  0x16   :  { %v85_v0 = vld [vmem:[%s10688_s7] sm:$0xff]  ;;  %v86_v1 = vld [vmem:[%s10688_s7 + $0x8] sm:$0xff] }
  0x17   :  { %89 = vadd.xlane.f32.xlu0 %v85_v0  ;;  %v7535_v2 = vld [vmem:[%s10689_s0 + $0x2a4] ss:$48 sps:$4 sm:$0xff]   ;;  %v7537_v3 = vld [vmem:[%s10689_s0 + $0x2ac] ss:$48 sps:$4 sm:$0xff]   ;;  %v7539_v4 = vld [vmem:[%s10689_s0 + $0x2a0] ss:$48 sps:$4 sm:$0xff]  }
  0x18   :  { %v7540_v5 = vld [vmem:[%s10689_s0 + $0x2a8] ss:$48 sps:$4 sm:$0xff]   ;;  %771 = vmatprep.subr.bf16.mxu0 %v7535_v2  ;;  %814 = vmatprep.subr.bf16.mxu1 %v7537_v3  ;;  %v7541_v14 = vld [vmem:[%s10689_s0 + $0x244] ss:$48 sps:$4 sm:$0xff]   ;;  %v7543_v15 = vld [vmem:[%s10689_s0 + $0x24c] ss:$48 sps:$4 sm:$0xff]  }
  0x19   :  { %772 = vmatpush1.bf16.msra.mxu0 %v7539_v4  ;;  %815 = vmatpush1.bf16.msra.mxu1 %v7540_v5  ;;  %v7545_v16 = vld [vmem:[%s10689_s0 + $0x240] ss:$48 sps:$4 sm:$0xff]   ;;  %v7546_v17 = vld [vmem:[%s10689_s0 + $0x248] ss:$48 sps:$4 sm:$0xff]   ;;  %v7547_v18 = vld [vmem:[%s10689_s0 + $0x1e4] ss:$48 sps:$4 sm:$0xff]  }
  0x1a   :  { %773 = vmatprep.subr.bf16.mxu0 %v7541_v14  ;;  %816 = vmatprep.subr.bf16.mxu1 %v7543_v15  ;;  %v7549_v19 = vld [vmem:[%s10689_s0 + $0x1ec] ss:$48 sps:$4 sm:$0xff]   ;;  %v7551_v20 = vld [vmem:[%s10689_s0 + $0x1e0] ss:$48 sps:$4 sm:$0xff]   ;;  %v7552_v21 = vld [vmem:[%s10689_s0 + $0x1e8] ss:$48 sps:$4 sm:$0xff]  }
  0x1b   :  { %91 = vadd.xlane.f32.xlu0 %v86_v1  ;;  %v7553_v22 = vld [vmem:[%s10689_s0 + $0x184] ss:$48 sps:$4 sm:$0xff]   ;;  %v7555_v23 = vld [vmem:[%s10689_s0 + $0x18c] ss:$48 sps:$4 sm:$0xff]   ;;  %v7557_v24 = vld [vmem:[%s10689_s0 + $0x180] ss:$48 sps:$4 sm:$0xff]  }
  0x1c   :  { %v7558_v25 = vld [vmem:[%s10689_s0 + $0x188] ss:$48 sps:$4 sm:$0xff]   ;;  %v7559_v26 = vld [vmem:[%s10689_s0 + $0x124] ss:$48 sps:$4 sm:$0xff]   ;;  %v7561_v27 = vld [vmem:[%s10689_s0 + $0x12c] ss:$48 sps:$4 sm:$0xff]  }
  0x1d   :  { %774 = vmatpush1.bf16.msra.mxu0 %v7545_v16  ;;  %817 = vmatpush1.bf16.msra.mxu1 %v7546_v17  ;;  %v7563_v28 = vld [vmem:[%s10689_s0 + $0x120] ss:$48 sps:$4 sm:$0xff]   ;;  %v7564_v29 = vld [vmem:[%s10689_s0 + $0x128] ss:$48 sps:$4 sm:$0xff]   ;;  %v7565_v30 = vld [vmem:[%s10689_s0 + $0xc4] ss:$48 sps:$4 sm:$0xff]  }
  0x1e   :  { %775 = vmatprep.subr.bf16.mxu0 %v7547_v18  ;;  %818 = vmatprep.subr.bf16.mxu1 %v7549_v19  ;;  %v7567_v31 = vld [vmem:[%s10689_s0 + $0xcc] ss:$48 sps:$4 sm:$0xff]   ;;  %v7569_v32 = vld [vmem:[%s10689_s0 + $0xc0] ss:$48 sps:$4 sm:$0xff]   ;;  %v7570_v33 = vld [vmem:[%s10689_s0 + $0xc8] ss:$48 sps:$4 sm:$0xff]  }
  0x1f   :  { %v7571_v34 = vld [vmem:[%s10689_s0 + $0x64] ss:$48 sps:$4 sm:$0xff]   ;;  %v7573_v35 = vld [vmem:[%s10689_s0 + $0x6c] ss:$48 sps:$4 sm:$0xff]   ;;  %v7575_v36 = vld [vmem:[%s10689_s0 + $0x60] ss:$48 sps:$4 sm:$0xff]  }
  0x20   :  { %v7576_v37 = vld [vmem:[%s10689_s0 + $0x68] ss:$48 sps:$4 sm:$0xff]   ;;  %v7577_v38 = vld [vmem:[%s10689_s0 + $0x4] ss:$48 sps:$4 sm:$0xff]   ;;  %v7579_v39 = vld [vmem:[%s10689_s0 + $0xc] ss:$48 sps:$4 sm:$0xff]  }
  0x21   :  { %776 = vmatpush1.bf16.msra.mxu0 %v7551_v20  ;;  %819 = vmatpush1.bf16.msra.mxu1 %v7552_v21  ;;  %v7581_v40 = vld [vmem:[%s10689_s0] ss:$48 sps:$4 sm:$0xff]   ;;  %v7582_v41 = vld [vmem:[%s10689_s0 + $0x8] ss:$48 sps:$4 sm:$0xff]   ;;  %v7585_v42 = vld [vmem:[%s10689_s0 + $0x2b4] ss:$48 sps:$4 sm:$0xff]  }
  0x22   :  { %777 = vmatprep.subr.bf16.mxu0 %v7553_v22  ;;  %820 = vmatprep.subr.bf16.mxu1 %v7555_v23  ;;  %v7588_v43 = vld [vmem:[%s10689_s0 + $0x2bc] ss:$48 sps:$4 sm:$0xff]  }
  0x25   :  { %778 = vmatpush1.bf16.msra.mxu0 %v7557_v24  ;;  %821 = vmatpush1.bf16.msra.mxu1 %v7558_v25 }
  0x26   :  { %779 = vmatprep.subr.bf16.mxu0 %v7559_v26  ;;  %822 = vmatprep.subr.bf16.mxu1 %v7561_v27 }
  0x29   :  { %780 = vmatpush1.bf16.msra.mxu0 %v7563_v28  ;;  %823 = vmatpush1.bf16.msra.mxu1 %v7564_v29 }
  0x2a   :  { %781 = vmatprep.subr.bf16.mxu0 %v7565_v30  ;;  %824 = vmatprep.subr.bf16.mxu1 %v7567_v31 }
  0x2d   :  { %782 = vmatpush1.bf16.msra.mxu0 %v7569_v32  ;;  %825 = vmatpush1.bf16.msra.mxu1 %v7570_v33 }
  0x2e   :  { %783 = vmatprep.subr.bf16.mxu0 %v7571_v34  ;;  %826 = vmatprep.subr.bf16.mxu1 %v7573_v35 }
  0x31   :  { %784 = vmatpush1.bf16.msra.mxu0 %v7575_v36  ;;  %827 = vmatpush1.bf16.msra.mxu1 %v7576_v37 }
  0x32   :  { %785 = vmatprep.subr.bf16.mxu0 %v7577_v38  ;;  %828 = vmatprep.subr.bf16.mxu1 %v7579_v39 }
  0x35   :  { %786 = vmatpush1.bf16.msra.mxu0 %v7581_v40  ;;  %829 = vmatpush1.bf16.msra.mxu1 %v7582_v41 }
  0x36   :  { %857 = vmatprep.subr.bf16.mxu0 %v7585_v42  ;;  %900 = vmatprep.subr.bf16.mxu1 %v7588_v43 }
  0xa0   :  { %v90_v6 = vpop.xlane.xlu0 %89 }
  0xa1   :  { %v94_v7 = vmul.f32 0.0078125, %v90_v6 }
  0xa3   :  { %v8522_v8 = vsub.f32 %v85_v0, %v94_v7 }
  0xa4   :  { %v92_v9 = vpop.xlane.xlu0 %91 }
  0xa5   :  { %v95_v10 = vmul.f32 0.0078125, %v92_v9  ;;  %v98_v11 = vmul.f32 %v8522_v8, %v8522_v8 }
  0xa7   :  { %v8526_v12 = vsub.f32 %v86_v1, %v95_v10  ;;  %100 = vadd.xlane.f32.xlu1 %v98_v11 }
  0xa9   :  { %v99_v13 = vmul.f32 %v8526_v12, %v8526_v12 }
  0xab   :  { %102 = vadd.xlane.f32.xlu1 %v99_v13 }
  0xac   :  { %31 = vsyncpa [#allocation3], 0  ;;  %s10690_s4 = sld [smem:[#allocation7_spill]]  ;;  %v7583_v61 = vld [vmem:[%s10689_s0 + $0x2b0] ss:$48 sps:$4 sm:$0xff]   ;;  %vm8367_vm0 = vmmov 0  }
  0xad   :  { %s10691_s30 = sld [smem:[#allocation8_spill]]  ;;  %v7586_v62 = vld [vmem:[%s10689_s0 + $0x2b8] ss:$48 sps:$4 sm:$0xff]   ;;  %v7591_v0 = vld [vmem:[%s10689_s0 + $0x254] ss:$48 sps:$4 sm:$0xff]   ;;  %vm1082_vm1 = vcmask 130048  }
  0xae   :  { %v7594_v1 = vld [vmem:[%s10689_s0 + $0x25c] ss:$48 sps:$4 sm:$0xff]   ;;  %v7589_v2 = vld [vmem:[%s10689_s0 + $0x250] ss:$48 sps:$4 sm:$0xff]   ;;  %v7592_v3 = vld [vmem:[%s10689_s0 + $0x258] ss:$48 sps:$4 sm:$0xff]  }
  0xaf   :  { %v7597_v4 = vld [vmem:[%s10689_s0 + $0x1f4] ss:$48 sps:$4 sm:$0xff]   ;;  %v7600_v5 = vld [vmem:[%s10689_s0 + $0x1fc] ss:$48 sps:$4 sm:$0xff]   ;;  %v7595_v6 = vld [vmem:[%s10689_s0 + $0x1f0] ss:$48 sps:$4 sm:$0xff]  }
  0xb0   :  { %v7598_v7 = vld [vmem:[%s10689_s0 + $0x1f8] ss:$48 sps:$4 sm:$0xff]   ;;  %v7606_v9 = vld [vmem:[%s10689_s0 + $0x19c] ss:$48 sps:$4 sm:$0xff]   ;;  %v7601_v10 = vld [vmem:[%s10689_s0 + $0x190] ss:$48 sps:$4 sm:$0xff]  }
  0xb1   :  { %v7604_v11 = vld [vmem:[%s10689_s0 + $0x198] ss:$48 sps:$4 sm:$0xff]   ;;  %v7612_v13 = vld [vmem:[%s10689_s0 + $0x13c] ss:$48 sps:$4 sm:$0xff]   ;;  %v7607_v14 = vld [vmem:[%s10689_s0 + $0x130] ss:$48 sps:$4 sm:$0xff]  }
  0xb2   :  { %v6345_v53 = vld [vmem:[%s10690_s4] ss:$0 sm:$0xff]  ;;  %v7610_v15 = vld [vmem:[%s10689_s0 + $0x138] ss:$48 sps:$4 sm:$0xff]   ;;  %v7615_v16 = vld [vmem:[%s10689_s0 + $0xd4] ss:$48 sps:$4 sm:$0xff]  }
  0xb3   :  { %v6346_v57 = vld [vmem:[%s10691_s30] ss:$0 sm:$0xff]  ;;  %v7618_v17 = vld [vmem:[%s10689_s0 + $0xdc] ss:$48 sps:$4 sm:$0xff]   ;;  %v7616_v19 = vld [vmem:[%s10689_s0 + $0xd8] ss:$48 sps:$4 sm:$0xff]  }
  0xb4   :  { %v7613_v18 = vld [vmem:[%s10689_s0 + $0xd0] ss:$48 sps:$4 sm:$0xff]   ;;  %v7621_v20 = vld [vmem:[%s10689_s0 + $0x74] ss:$48 sps:$4 sm:$0xff]   ;;  %v7624_v21 = vld [vmem:[%s10689_s0 + $0x7c] ss:$48 sps:$4 sm:$0xff]  }
  0xb5   :  { %v7619_v22 = vld [vmem:[%s10689_s0 + $0x70] ss:$48 sps:$4 sm:$0xff]   ;;  %v7622_v23 = vld [vmem:[%s10689_s0 + $0x78] ss:$48 sps:$4 sm:$0xff]   ;;  %v7627_v24 = vld [vmem:[%s10689_s0 + $0x14] ss:$48 sps:$4 sm:$0xff]  }
  0xb6   :  { %v7630_v25 = vld [vmem:[%s10689_s0 + $0x1c] ss:$48 sps:$4 sm:$0xff]   ;;  %v7625_v26 = vld [vmem:[%s10689_s0 + $0x10] ss:$48 sps:$4 sm:$0xff]   ;;  %v7628_v27 = vld [vmem:[%s10689_s0 + $0x18] ss:$48 sps:$4 sm:$0xff]  }
  0xb7   :  { %v7633_v28 = vld [vmem:[%s10689_s0 + $0x2c4] ss:$48 sps:$4 sm:$0xff]   ;;  %v7636_v29 = vld [vmem:[%s10689_s0 + $0x2cc] ss:$48 sps:$4 sm:$0xff]   ;;  %v7631_v30 = vld [vmem:[%s10689_s0 + $0x2c0] ss:$48 sps:$4 sm:$0xff]  }
  0xb8   :  { %v7634_v31 = vld [vmem:[%s10689_s0 + $0x2c8] ss:$48 sps:$4 sm:$0xff]   ;;  %v7639_v32 = vld [vmem:[%s10689_s0 + $0x264] ss:$48 sps:$4 sm:$0xff]   ;;  %v7642_v33 = vld [vmem:[%s10689_s0 + $0x26c] ss:$48 sps:$4 sm:$0xff]  }
  0xb9   :  { %v7637_v34 = vld [vmem:[%s10689_s0 + $0x260] ss:$48 sps:$4 sm:$0xff]   ;;  %v7640_v35 = vld [vmem:[%s10689_s0 + $0x268] ss:$48 sps:$4 sm:$0xff]   ;;  %v7645_v36 = vld [vmem:[%s10689_s0 + $0x204] ss:$48 sps:$4 sm:$0xff]  }
  0xba   :  { %v7648_v37 = vld [vmem:[%s10689_s0 + $0x20c] ss:$48 sps:$4 sm:$0xff]   ;;  %v7643_v38 = vld [vmem:[%s10689_s0 + $0x200] ss:$48 sps:$4 sm:$0xff]   ;;  %v7646_v39 = vld [vmem:[%s10689_s0 + $0x208] ss:$48 sps:$4 sm:$0xff]  }
  0xbb   :  { %v7651_v40 = vld [vmem:[%s10689_s0 + $0x1a4] ss:$48 sps:$4 sm:$0xff]   ;;  %v7654_v41 = vld [vmem:[%s10689_s0 + $0x1ac] ss:$48 sps:$4 sm:$0xff]   ;;  %v7649_v42 = vld [vmem:[%s10689_s0 + $0x1a0] ss:$48 sps:$4 sm:$0xff]  }
  0xbc   :  { %v7652_v43 = vld [vmem:[%s10689_s0 + $0x1a8] ss:$48 sps:$4 sm:$0xff]   ;;  %s10692_s2 = sld [smem:[#allocation10_spill]]  ;;  %vm5142_vm2 = vcmask 1040384   ;;  %s8368_s7 = smov [#allocation2]  }
  0xbd   :  { %s10693_s27 = sld [smem:[#allocation6_spill]] }
  0xbe   :  { %s10694_s4 = sld [smem:[#allocation11_spill]] }
  0xbf   :  { %s10695_s28 = sld [smem:[#allocation12_spill]] }
  0xc0   :  { %s10696_s9 = sld [smem:[#allocation15_spill]] }
  0xc1   :  { %s10697_s5 = sld [smem:[#allocation13_spill]] }
  0xc2   :  { %s10698_s1 = sld [smem:[#allocation14_spill]] }
  0xc3   :  { %s10700_s26 = sld [smem:[#allocation17_spill]] }
 0x130   :  { %v101_v45 = vpop.xlane.xlu1 %100 }
 0x131   :  { %v104_v46 = vmul.f32 0.0078125, %v101_v45  ;;  %v7657_v45 = vld [vmem:[%s10689_s0 + $0x144] ss:$48 sps:$4 sm:$0xff]  }
 0x133   :  { %v106_v47 = vadd.f32 1e-12, %v104_v46  ;;  %v7660_v46 = vld [vmem:[%s10689_s0 + $0x14c] ss:$48 sps:$4 sm:$0xff]  }
 0x134   :  { %v103_v48 = vpop.xlane.xlu1 %102 }
 0x135   :  { %8223 = vrsqrt.f32 %v106_v47  ;;  %v105_v49 = vmul.f32 0.0078125, %v103_v48  ;;  %v7655_v47 = vld [vmem:[%s10689_s0 + $0x140] ss:$48 sps:$4 sm:$0xff]   ;;  %v7658_v48 = vld [vmem:[%s10689_s0 + $0x148] ss:$48 sps:$4 sm:$0xff]  }
 0x137   :  { %v107_v50 = vadd.f32 1e-12, %v105_v49  ;;  %v7663_v49 = vld [vmem:[%s10689_s0 + $0xe4] ss:$48 sps:$4 sm:$0xff]  }
 0x139   :  { %8225 = vrsqrt.f32 %v107_v50  ;;  %v7666_v50 = vld [vmem:[%s10689_s0 + $0xec] ss:$48 sps:$4 sm:$0xff]  }
 0x142   :  { %v8224_v51 = vpop.eup %8223 }
 0x143   :  { %v110_v52 = vmul.f32 %v8224_v51, %v8522_v8  ;;  %v7603_v8 = vld [vmem:[%s10689_s0 + $0x194] ss:$48 sps:$4 sm:$0xff]   ;;  %v7661_v51 = vld [vmem:[%s10689_s0 + $0xe0] ss:$48 sps:$4 sm:$0xff]  }
 0x145   :  { %v118_v55 = vmul.f32 %v6345_v53, %v110_v52  ;;  %v7664_v52 = vld [vmem:[%s10689_s0 + $0xe8] ss:$48 sps:$4 sm:$0xff]  }
 0x146   :  { %v8226_v54 = vpop.eup %8225 }
 0x147   :  { %v111_v56 = vmul.f32 %v8226_v54, %v8526_v12  ;;  %v8630_v59 = vadd.f32 %v6346_v57, %v118_v55  ;;  %v7609_v12 = vld [vmem:[%s10689_s0 + $0x134] ss:$48 sps:$4 sm:$0xff]   ;;  %v7672_v54 = vld [vmem:[%s10689_s0 + $0x8c] ss:$48 sps:$4 sm:$0xff]   ;;  %v7667_v55 = vld [vmem:[%s10689_s0 + $0x80] ss:$48 sps:$4 sm:$0xff]  }
 0x149   :  { %v119_v58 = vmul.f32 %v6345_v53, %v111_v56  ;;  %v7669_v53 = vld [vmem:[%s10689_s0 + $0x84] ss:$48 sps:$4 sm:$0xff]   ;;  %v7670_v56 = vld [vmem:[%s10689_s0 + $0x88] ss:$48 sps:$4 sm:$0xff]  }
 0x14b   :  { %v8632_v60 = vadd.f32 %v6346_v57, %v119_v58  ;;  %v7675_v57 = vld [vmem:[%s10689_s0 + $0x24] ss:$48 sps:$4 sm:$0xff]   ;;  %v7678_v58 = vld [vmem:[%s10689_s0 + $0x2c] ss:$48 sps:$4 sm:$0xff]  }
 0x14d   :  { %v8642_v63 = vpack.c.bf16 %v8632_v60, %v8630_v59 }
 0x14f   :  { %804 = vmatmul.mubr.bf16.vlgmr.msra.gmra.mxu0 %v8642_v63  ;;  %847 = vmatmul.mubr.bf16.vlgmr.msra.gmra.mxu1 %v8642_v63 }
 0x150   :  { %858 = vmatpush1.bf16.msra.mxu0 %v7583_v61  ;;  %901 = vmatpush1.bf16.msra.mxu1 %v7586_v62  ;;  %v7673_v61 = vld [vmem:[%s10689_s0 + $0x20] ss:$48 sps:$4 sm:$0xff]   ;;  %v7676_v62 = vld [vmem:[%s10689_s0 + $0x28] ss:$48 sps:$4 sm:$0xff]  }
 0x151   :  { %859 = vmatprep.subr.bf16.mxu0 %v7591_v0  ;;  %902 = vmatprep.subr.bf16.mxu1 %v7594_v1  ;;  %v8366_v0 = vmov 0.0   ;;  %v231_v1 = vlaneseq }
 0x152   :  { %889 = vmatprep.mubr.bf16.mxu0 %v8365_v44  ;;  %932 = vmatprep.mubr.bf16.mxu1 %v8365_v44 }
 0x154   :  { %860 = vmatpush1.bf16.msra.mxu0 %v7589_v2  ;;  %903 = vmatpush1.bf16.msra.mxu1 %v7592_v3  ;;  %v8840_v2 = vshrl.u32 %v231_v1, 7 }
 0x155   :  { %861 = vmatprep.subr.bf16.mxu0 %v7597_v4  ;;  %904 = vmatprep.subr.bf16.mxu1 %v7600_v5 }
 0x156   :  { %v8843_v3 = vsub.s32 1, %v8840_v2 }
 0x158   :  { %862 = vmatpush1.bf16.msra.mxu0 %v7595_v6  ;;  %905 = vmatpush1.bf16.msra.mxu1 %v7598_v7 }
 0x159   :  { %863 = vmatprep.subr.bf16.mxu0 %v7603_v8  ;;  %906 = vmatprep.subr.bf16.mxu1 %v7606_v9 }
 0x15c   :  { %864 = vmatpush1.bf16.msra.mxu0 %v7601_v10  ;;  %907 = vmatpush1.bf16.msra.mxu1 %v7604_v11 }
 0x15d   :  { %865 = vmatprep.subr.bf16.mxu0 %v7609_v12  ;;  %908 = vmatprep.subr.bf16.mxu1 %v7612_v13 }
 0x160   :  { %866 = vmatpush1.bf16.msra.mxu0 %v7607_v14  ;;  %909 = vmatpush1.bf16.msra.mxu1 %v7610_v15  ;;  %v249_v15 = vsub.s32 4, %v8840_v2 }
 0x161   :  { %867 = vmatprep.subr.bf16.mxu0 %v7615_v16  ;;  %910 = vmatprep.subr.bf16.mxu1 %v7618_v17  ;;  %v257_v16 = vsub.s32 6, %v8840_v2 }
 0x164   :  { %868 = vmatpush1.bf16.msra.mxu0 %v7613_v18  ;;  %911 = vmatpush1.bf16.msra.mxu1 %v7616_v19  ;;  %v253_v18 = vsub.s32 5, %v8840_v2 }
 0x165   :  { %869 = vmatprep.subr.bf16.mxu0 %v7621_v20  ;;  %912 = vmatprep.subr.bf16.mxu1 %v7624_v21 }
 0x168   :  { %870 = vmatpush1.bf16.msra.mxu0 %v7619_v22  ;;  %913 = vmatpush1.bf16.msra.mxu1 %v7622_v23 }
 0x169   :  { %871 = vmatprep.subr.bf16.mxu0 %v7627_v24  ;;  %914 = vmatprep.subr.bf16.mxu1 %v7630_v25 }
 0x16c   :  { %872 = vmatpush1.bf16.msra.mxu0 %v7625_v26  ;;  %915 = vmatpush1.bf16.msra.mxu1 %v7628_v27  ;;  %v8865_v26 = vsub.s32 0, %v8840_v2  ;;  %v8868_v27 = vsub.s32 2, %v8840_v2 }
 0x16d   :  { %943 = vmatprep.subr.bf16.mxu0 %v7633_v28  ;;  %986 = vmatprep.subr.bf16.mxu1 %v7636_v29  ;;  %v261_v28 = vsub.s32 7, %v8840_v2 }
 0x16f   :  { %890 = vmatmul.mubr.bf16.vlgmr.msra.gmra.mxu0 %v8642_v63  ;;  %933 = vmatmul.mubr.bf16.vlgmr.msra.gmra.mxu1 %v8642_v63 }
 0x170   :  { %944 = vmatpush1.bf16.msra.mxu0 %v7631_v30  ;;  %987 = vmatpush1.bf16.msra.mxu1 %v7634_v31 }
 0x171   :  { %945 = vmatprep.subr.bf16.mxu0 %v7639_v32  ;;  %988 = vmatprep.subr.bf16.mxu1 %v7642_v33 }
 0x172   :  { %975 = vmatprep.mubr.bf16.mxu0 %v8365_v44  ;;  %1018 = vmatprep.mubr.bf16.mxu1 %v8365_v44 }
 0x174   :  { %946 = vmatpush1.bf16.msra.mxu0 %v7637_v34  ;;  %989 = vmatpush1.bf16.msra.mxu1 %v7640_v35 }
 0x175   :  { %947 = vmatprep.subr.bf16.mxu0 %v7645_v36  ;;  %990 = vmatprep.subr.bf16.mxu1 %v7648_v37 }
 0x178   :  { %948 = vmatpush1.bf16.msra.mxu0 %v7643_v38  ;;  %991 = vmatpush1.bf16.msra.mxu1 %v7646_v39 }
 0x179   :  { %949 = vmatprep.subr.bf16.mxu0 %v7651_v40  ;;  %992 = vmatprep.subr.bf16.mxu1 %v7654_v41 }
 0x17c   :  { %950 = vmatpush1.bf16.msra.mxu0 %v7649_v42  ;;  %993 = vmatpush1.bf16.msra.mxu1 %v7652_v43 }
 0x17d   :  { %951 = vmatprep.subr.bf16.mxu0 %v7657_v45  ;;  %994 = vmatprep.subr.bf16.mxu1 %v7660_v46 }
 0x180   :  { %952 = vmatpush1.bf16.msra.mxu0 %v7655_v47  ;;  %995 = vmatpush1.bf16.msra.mxu1 %v7658_v48 }
 0x181   :  { %953 = vmatprep.subr.bf16.mxu0 %v7663_v49  ;;  %996 = vmatprep.subr.bf16.mxu1 %v7666_v50 }
 0x184   :  { %954 = vmatpush1.bf16.msra.mxu0 %v7661_v51  ;;  %997 = vmatpush1.bf16.msra.mxu1 %v7664_v52  ;;  %v8884_v51 = vsub.s32 3, %v8840_v2 }
 0x185   :  { %955 = vmatprep.subr.bf16.mxu0 %v7669_v53  ;;  %998 = vmatprep.subr.bf16.mxu1 %v7672_v54 }
 0x188   :  { %956 = vmatpush1.bf16.msra.mxu0 %v7667_v55  ;;  %999 = vmatpush1.bf16.msra.mxu1 %v7670_v56 }
 0x189   :  { %957 = vmatprep.subr.bf16.mxu0 %v7675_v57  ;;  %1000 = vmatprep.subr.bf16.mxu1 %v7678_v58 }
 0x18c   :  { %958 = vmatpush1.bf16.msra.mxu0 %v7673_v61  ;;  %1001 = vmatpush1.bf16.msra.mxu1 %v7676_v62  ;;  %v228_v62 = vld [vmem:[%s10692_s2 + $0x8] sm:$0xf] }
 0x18d   :  { %7395 = vmatprep.subr.bf16.mxu1 %v8366_v0  ;;  %7419 = vmatprep.subr.bf16.mxu0 %v8366_v0  ;;  %v274_v1 = vrot.slane %v228_v62, %v8868_v27 }
 0x18f   :  { %976 = vmatmul.mubr.bf16.vlgmr.msra.gmra.mxu0 %v8642_v63  ;;  %1019 = vmatmul.mubr.bf16.vlgmr.msra.gmra.mxu1 %v8642_v63  ;;  %v227_v63 = vld [vmem:[%s10692_s2] sm:$0xff] }
 0x190   :  { %7397 = vmatprep.mubr.msk.bf16.mxu1 %vm8367_vm0, %v8366_v0  ;;  %7421 = vmatprep.mubr.msk.bf16.mxu0 %vm8367_vm0, %v8366_v0  ;;  %v238_v6 = vrot.slane %v227_v63, %v8843_v3  ;;  %v250_v21 = vrot.slane %v227_v63, %v249_v15  ;;  %v258_v22 = vrot.slane %v227_v63, %v257_v16 }
 0x191   :  { %v254_v25 = vrot.slane %v227_v63, %v253_v18  ;;  %v234_v40 = vrot.slane %v227_v63, %v8865_v26  ;;  %v242_v41 = vrot.slane %v227_v63, %v8868_v27  ;;  %v262_v43 = vrot.slane %v227_v63, %v261_v28 }
 0x192   :  { %v246_v56 = vrot.slane %v227_v63, %v8884_v51  ;;  %v278_v63 = vrot.slane %v228_v62, %v8884_v51 }
 0x20f   :  { %v805_v4 = vpop.f32.mrf.mxu0  ;;  %v848_v12 = vpop.f32.mrf.mxu1 }
 0x210   :  { %v806_v49 = vadd.f32 %v805_v4, %v234_v40  ;;  %v849_v50 = vadd.f32 %v848_v12, %v242_v41  ;;  %v270_v4 = vrot.slane %v228_v62, %v8843_v3 }
 0x211   :  { %v807_v5 = vpop.f32.mrf.mxu0  ;;  %v850_v13 = vpop.f32.mrf.mxu1 }
 0x212   :  { %v8849_v9 = vadd.f32 %v807_v5, %v238_v6  ;;  %v851_v58 = vadd.f32 %v850_v13, %v246_v56 }
 0x213   :  { %v809_v7 = vpop.f32.mrf.mxu0  ;;  %v852_v14 = vpop.f32.mrf.mxu1 }
 0x214   :  { %v810_v46 = vadd.f32 %v809_v7, %v234_v40  ;;  %v853_v47 = vadd.f32 %v852_v14, %v242_v41  ;;  %v266_v7 = vrot.slane %v228_v62, %v8865_v26 }
 0x215   :  { %v811_v8 = vpop.f32.mrf.mxu0  ;;  %v854_v17 = vpop.f32.mrf.mxu1 }
 0x216   :  { %v8851_v10 = vadd.f32 %v811_v8, %v238_v6  ;;  %v1029_v53 = vpack.c.bf16 %v810_v46, %v806_v49  ;;  %v1031_v54 = vpack.c.bf16 %v853_v47, %v849_v50  ;;  %v855_v57 = vadd.f32 %v854_v17, %v246_v56 }
 0x218   :  { %v1030_v11 = vpack.c.bf16 %v8851_v10, %v8849_v9  ;;  %v1032_v61 = vpack.c.bf16 %v855_v57, %v851_v58 }
 0x22f   :  { %v891_v19 = vpop.f32.mrf.mxu0  ;;  %v934_v20 = vpop.f32.mrf.mxu1 }
 0x230   :  { %v892_v31 = vadd.f32 %v891_v19, %v250_v21  ;;  %v935_v32 = vadd.f32 %v934_v20, %v258_v22 }
 0x231   :  { %v893_v23 = vpop.f32.mrf.mxu0  ;;  %v936_v24 = vpop.f32.mrf.mxu1 }
 0x232   :  { %v8871_v36 = vadd.f32 %v893_v23, %v254_v25  ;;  %v937_v52 = vadd.f32 %v936_v24, %v262_v43 }
 0x233   :  { %v895_v29 = vpop.f32.mrf.mxu0  ;;  %v938_v30 = vpop.f32.mrf.mxu1 }
 0x234   :  { %v896_v33 = vadd.f32 %v895_v29, %v250_v21  ;;  %v939_v34 = vadd.f32 %v938_v30, %v258_v22 }
 0x235   :  { %v897_v35 = vpop.f32.mrf.mxu0  ;;  %v940_v42 = vpop.f32.mrf.mxu1 }
 0x236   :  { %v1033_v37 = vpack.c.bf16 %v896_v33, %v892_v31  ;;  %v1035_v38 = vpack.c.bf16 %v939_v34, %v935_v32  ;;  %v8873_v39 = vadd.f32 %v897_v35, %v254_v25  ;;  %v941_v48 = vadd.f32 %v940_v42, %v262_v43  ;;  %v8917_v35 = vld [vmem:[%s10693_s27] sm:$0xff]  ;;  %v8923_v43 = vld [vmem:[%s10693_s27 + $0x8] sm:$0xff] }
 0x238   :  { %v1034_v45 = vpack.c.bf16 %v8873_v39, %v8871_v36  ;;  %7396 = vmatpush3.bf16.xpose.msra.mxu1 %v1033_v37  ;;  %7420 = vmatpush3.bf16.xpose.msra.mxu0 %v1035_v38  ;;  %v1036_v55 = vpack.c.bf16 %v941_v48, %v937_v52 }
 0x239   :  { %7431 = vmatprep.subr.bf16.mxu0 %v8366_v0  ;;  %7401 = vmatprep.subr.bf16.mxu1 %v8366_v0 }
 0x23f   :  { %7398 = vmatmul.mubr.bf16.vlgmr.msra.gmra.mxu1 %v1029_v53  ;;  %7422 = vmatmul.mubr.bf16.vlgmr.msra.gmra.mxu0 %v1031_v54 }
 0x240   :  { %7432 = vmatpush3.bf16.xpose.msra.mxu0 %v1036_v55  ;;  %7433 = vmatprep.mubr.msk.bf16.mxu0 %vm8367_vm0, %v8366_v0 }
 0x241   :  { %7403 = vmatprep.mubr.msk.bf16.mxu1 %vm8367_vm0, %v8366_v0 }
 0x247   :  { %7434 = vmatmul.mubr.bf16.vlgmr.msra.gmra.mxu0 %v1032_v61 }
 0x24f   :  { %v977_v5 = vpop.f32.mrf.mxu0  ;;  %v1020_v6 = vpop.f32.mrf.mxu1 }
 0x250   :  { %v8898_v8 = vadd.f32 %v1020_v6, %v274_v1  ;;  %v978_v21 = vadd.f32 %v977_v5, %v266_v7 }
 0x251   :  { %v979_v12 = vpop.f32.mrf.mxu0  ;;  %v1022_v13 = vpop.f32.mrf.mxu1 }
 0x252   :  { %v8900_v14 = vadd.f32 %v979_v12, %v270_v4  ;;  %v8902_v17 = vadd.f32 %v1022_v13, %v278_v63 }
 0x253   :  { %v981_v19 = vpop.f32.mrf.mxu0  ;;  %v1024_v20 = vpop.f32.mrf.mxu1 }
 0x254   :  { %v982_v22 = vadd.f32 %v981_v19, %v266_v7  ;;  %v8904_v23 = vadd.f32 %v1024_v20, %v274_v1 }
 0x255   :  { %v983_v24 = vpop.f32.mrf.mxu0  ;;  %v1026_v25 = vpop.f32.mrf.mxu1 }
 0x256   :  { %v1037_v29 = vpack.c.bf16 %v982_v22, %v978_v21  ;;  %v1039_v30 = vpack.c.bf16 %v8904_v23, %v8898_v8  ;;  %v984_v31 = vadd.f32 %v983_v24, %v270_v4  ;;  %v8908_v32 = vadd.f32 %v1026_v25, %v278_v63 }
 0x258   :  { %v1038_v33 = vpack.c.bf16 %v984_v31, %v8900_v14  ;;  %v1040_v34 = vpack.c.bf16 %v8908_v32, %v8902_v17  ;;  %7402 = vmatpush3.bf16.msra.mxu1 %v1037_v29  ;;  %v7694_v17 = vld [vmem:[%s10694_s4 + $0xb0] sm:$0xff]   ;;  %v7695_v32 = vld [vmem:[%s10694_s4 + $0x48] sm:$0xff]  }
 0x259   :  { %7407 = vmatprep.subr.bf16.mxu1 %v8366_v0 }
 0x2ff   :  { %v1075_v37 = vpop.f32.mrf.mxu1  ;;  %v1292_v38 = vpop.f32.mrf.mxu0 }
 0x300   :  { %v1076_v40 = vadd.f32 %v1075_v37, %v8917_v35  ;;  %v1293_v10 = vadd.f32 %v1292_v38, %v8917_v35 }
 0x301   :  { %v7399_v41 = vpop.f32.mrf.mxu1  ;;  %v7423_v42 = vpop.f32.mrf.mxu0 }
 0x302   :  { %v1083_v46 = vsel %vm1082_vm1, %v1076_v40, -inf }
 0x303   :  { %v1295_v47 = vpop.f32.mrf.mxu0  ;;  %1084 = vmax.xlane.f32.xlu0 %v1083_v46  ;;  %v1078_v48 = vpop.f32.mrf.mxu1 }
 0x304   :  { %v1079_v49 = vadd.f32 %v1078_v48, %v8923_v43  ;;  %v1296_v42 = vadd.f32 %v1295_v47, %v8923_v43  ;;  %v1299_v48 = vsel %vm1082_vm1, %v1293_v10, -inf }
 0x305   :  { %v7400_v50 = vpop.f32.mrf.mxu1  ;;  %v7424_v52 = vpop.f32.mrf.mxu0 }
 0x306   :  { %v1086_v53 = vsel %vm1082_vm1, %v1079_v49, -inf  ;;  %v1302_v52 = vsel %vm1082_vm1, %v1296_v42, -inf }
 0x307   :  { %v1400_v54 = vpop.f32.mrf.mxu0  ;;  %1087 = vmax.xlane.f32.xlu1 %v1086_v53 }
 0x308   :  { %v1401_v46 = vadd.f32 %v1400_v54, %v8917_v35 }
 0x309   :  { %v7435_v55 = vpop.f32.mrf.mxu0 }
 0x30a   :  { %v1407_v38 = vsel %vm1082_vm1, %v1401_v46, -inf }
 0x30b   :  { %v1403_v56 = vpop.f32.mrf.mxu0 }
 0x30c   :  { %v1404_v50 = vadd.f32 %v1403_v56, %v8923_v43 }
 0x30d   :  { %v7436_v57 = vpop.f32.mrf.mxu0 }
 0x30e   :  { %v1410_v53 = vsel %vm1082_vm1, %v1404_v50, -inf }
 0x38c   :  { %v1085_v58 = vpop.xlane.xlu0 %1084 }
 0x38d   :  { %v1089_v61 = vsub.f32 %v1076_v40, %v1085_v58 }
 0x38f   :  { %v1091_v62 = vmul.f32 1.442695, %v1089_v61 }
 0x390   :  { %v1088_v1 = vpop.xlane.xlu1 %1087 }
 0x391   :  { %8227 = vpow2.f32 %v1091_v62  ;;  %v1090_v4 = vsub.f32 %v1079_v49, %v1088_v1 }
 0x393   :  { %v1093_v63 = vmul.f32 1.442695, %v1090_v4 }
 0x395   :  { %8229 = vpow2.f32 %v1093_v63 }
 0x39e   :  { %v8228_v5 = vpop.eup %8227 }
 0x39f   :  { %v1095_v6 = vsel %vm1082_vm1, %v8228_v5, 0.0 }
 0x3a0   :  { %1096 = vadd.xlane.f32.xlu0 %v1095_v6 }
 0x3a2   :  { %v8230_v7 = vpop.eup %8229 }
 0x3a3   :  { %v1098_v12 = vsel %vm1082_vm1, %v8230_v7, 0.0 }
 0x3a4   :  { %1099 = vadd.xlane.f32.xlu1 %v1098_v12 }
 0x429   :  { %v1097_v13 = vpop.xlane.xlu0 %1096 }
 0x42a   :  { %8231 = vrcp.f32 %v1097_v13 }
 0x42d   :  { %v1100_v14 = vpop.xlane.xlu1 %1099 }
 0x42e   :  { %8233 = vrcp.f32 %v1100_v14 }
 0x437   :  { %v8232_v19 = vpop.eup %8231 }
 0x438   :  { %v1102_v21 = vmul.f32 %v8232_v19, %v8228_v5 }
 0x43b   :  { %v8234_v20 = vpop.eup %8233 }
 0x43c   :  { %v1104_v22 = vmul.f32 %v8234_v20, %v8230_v7 }
 0x43e   :  { %v1105_v24 = vpack.c.bf16 %v1104_v22, %v1102_v21 }
 0x440   :  { %7404 = vmatmul.mubr.msk.bf16.vlgmr.msra.gmra.mxu1 %vm1082_vm1, %v1105_v24 }
 0x441   :  { %7408 = vmatpush3.bf16.xpose.msra.mxu1 %v1034_v45  ;;  %7409 = vmatprep.mubr.msk.bf16.mxu1 %vm8367_vm0, %v8366_v0 }
 0x442   :  { %7413 = vmatprep.subr.bf16.mxu1 %v8366_v0 }
 0x448   :  { %7410 = vmatmul.mubr.bf16.vlgmr.msra.gmra.mxu1 %v1030_v11 }
 0x449   :  { %7414 = vmatpush3.bf16.msra.mxu1 %v1038_v33  ;;  %7415 = vmatprep.mubr.msk.bf16.mxu1 %vm8367_vm0, %v8366_v0 }
 0x44a   :  { %7425 = vmatprep.subr.bf16.mxu1 %v8366_v0 }
 0x500   :  { %v8943_v25 = vpop.f32.mrf.mxu1 }
 0x502   :  { %v7405_v29 = vpop.f32.mrf.mxu1 }
 0x504   :  { %v8945_v36 = vpop.f32.mrf.mxu1 }
 0x505   :  { %v1474_v39 = vpack.c.bf16 %v8945_v36, %v8943_v25  ;;  %v6447_v36 = vld [vmem:[%s10695_s28] ss:$0 sm:$0xff] }
 0x506   :  { %v7406_v45 = vpop.f32.mrf.mxu1 }
 0x508   :  { %v1184_v31 = vpop.f32.mrf.mxu1 }
 0x509   :  { %v1185_v37 = vadd.f32 %v1184_v31, %v8917_v35 }
 0x50a   :  { %v7411_v9 = vpop.f32.mrf.mxu1 }
 0x50b   :  { %v1191_v11 = vsel %vm1082_vm1, %v1185_v37, -inf }
 0x50c   :  { %1192 = vmax.xlane.f32.xlu0 %v1191_v11  ;;  %v1187_v33 = vpop.f32.mrf.mxu1  ;;  %v7679_v11 = vld [vmem:[%s10694_s4 + $0x78] sm:$0xff]  }
 0x50d   :  { %v1188_v40 = vadd.f32 %v1187_v33, %v8923_v43  ;;  %v7680_v33 = vld [vmem:[%s10694_s4 + $0x38] sm:$0xff]   ;;  %7163 = vmatprep.subr.bf16.mxu0 %v7679_v11  ;;  %v7706_v11 = vld [vmem:[%s10694_s4 + $0x90] sm:$0xff]  }
 0x50e   :  { %v7412_v41 = vpop.f32.mrf.mxu1  ;;  %7164 = vmatpush3.bf16.msra.mxu0 %v7680_v33  ;;  %v7707_v33 = vld [vmem:[%s10694_s4 + $0xc8] sm:$0xff]  }
 0x50f   :  { %v1194_v49 = vsel %vm1082_vm1, %v1188_v40, -inf  ;;  %v7682_v41 = vld [vmem:[%s10694_s4 + $0x30] sm:$0xff]  }
 0x510   :  { %1300 = vmax.xlane.f32.xlu0 %v1299_v48  ;;  %1195 = vmax.xlane.f32.xlu1 %v1194_v49  ;;  %v7685_v48 = vld [vmem:[%s10694_s4 + $0x60] sm:$0xff]  }
 0x511   :  { %v7686_v49 = vld [vmem:[%s10694_s4 + $0x20] sm:$0xff]  }
 0x514   :  { %1408 = vmax.xlane.f32.xlu0 %v1407_v38  ;;  %1303 = vmax.xlane.f32.xlu1 %v1302_v52  ;;  %v7689_v38 = vld [vmem:[%s10694_s4 + $0x18] sm:$0xff]   ;;  %v7691_v52 = vld [vmem:[%s10694_s4 + $0x50] sm:$0xff]  }
 0x518   :  { %1411 = vmax.xlane.f32.xlu1 %v1410_v53  ;;  %v7693_v53 = vld [vmem:[%s10694_s4 + $0x10] sm:$0xff]  }
 0x595   :  { %v1193_v47 = vpop.xlane.xlu0 %1192 }
 0x596   :  { %v1197_v55 = vsub.f32 %v1185_v37, %v1193_v47 }
 0x598   :  { %v1199_v35 = vmul.f32 1.442695, %v1197_v55 }
 0x599   :  { %v1301_v54 = vpop.xlane.xlu0 %1300  ;;  %v1196_v57 = vpop.xlane.xlu1 %1195 }
 0x59a   :  { %8235 = vpow2.f32 %v1199_v35  ;;  %v1305_v58 = vsub.f32 %v1293_v10, %v1301_v54  ;;  %v1198_v61 = vsub.f32 %v1188_v40, %v1196_v57  ;;  %v7681_v40 = vld [vmem:[%s10694_s4 + $0x70] sm:$0xff]  }
 0x59b   :  { %7165 = vmatprep.subr.bf16.mxu0 %v7681_v40  ;;  %v7708_v40 = vld [vmem:[%s10694_s4 + $0x88] sm:$0xff]  }
 0x59c   :  { %v1307_v62 = vmul.f32 1.442695, %v1305_v58  ;;  %v1201_v1 = vmul.f32 1.442695, %v1198_v61  ;;  %7166 = vmatpush3.bf16.msra.mxu0 %v7682_v41  ;;  %v7709_v41 = vld [vmem:[%s10694_s4 + $0xc0] sm:$0xff]  }
 0x59d   :  { %v1409_v43 = vpop.xlane.xlu0 %1408  ;;  %v1304_v56 = vpop.xlane.xlu1 %1303 }
 0x59e   :  { %8237 = vpow2.f32 %v1307_v62  ;;  %v1413_v4 = vsub.f32 %v1401_v46, %v1409_v43  ;;  %v1306_v63 = vsub.f32 %v1296_v42, %v1304_v56  ;;  %v7683_v42 = vld [vmem:[%s10694_s4 + $0x68] sm:$0xff]  }
 0x59f   :  { %8239 = vpow2.f32 %v1201_v1  ;;  %v7684_v46 = vld [vmem:[%s10694_s4 + $0x28] sm:$0xff]   ;;  %7167 = vmatprep.subr.bf16.mxu0 %v7683_v42  ;;  %v7710_v42 = vld [vmem:[%s10694_s4 + $0x80] sm:$0xff]  }
 0x5a0   :  { %v1415_v5 = vmul.f32 1.442695, %v1413_v4  ;;  %v1309_v6 = vmul.f32 1.442695, %v1306_v63  ;;  %7168 = vmatpush3.bf16.msra.mxu0 %v7684_v46 }
 0x5a1   :  { %v1412_v7 = vpop.xlane.xlu1 %1411  ;;  %7169 = vmatprep.subr.bf16.mxu0 %v7685_v48 }
 0x5a2   :  { %8241 = vpow2.f32 %v1415_v5  ;;  %v1414_v12 = vsub.f32 %v1404_v50, %v1412_v7  ;;  %v7687_v50 = vld [vmem:[%s10694_s4 + $0x58] sm:$0xff]  }
 0x5a3   :  { %8243 = vpow2.f32 %v1309_v6 }
 0x5a4   :  { %v1417_v13 = vmul.f32 1.442695, %v1414_v12  ;;  %7170 = vmatpush3.bf16.msra.mxu0 %v7686_v49  ;;  %v7688_v12 = vld [vmem:[%s10694_s4 + $0xf8] sm:$0xff]  }
 0x5a5   :  { %7171 = vmatprep.subr.bf16.mxu0 %v7687_v50 }
 0x5a6   :  { %8245 = vpow2.f32 %v1417_v13 }
 0x5a7   :  { %v8236_v14 = vpop.eup %8235 }
 0x5a8   :  { %v1203_v19 = vsel %vm1082_vm1, %v8236_v14, 0.0  ;;  %7172 = vmatpush3.bf16.msra.mxu0 %v7689_v38 }
 0x5a9   :  { %1204 = vadd.xlane.f32.xlu0 %v1203_v19  ;;  %7173 = vmatprep.subr.bf16.mxu0 %v7691_v52 }
 0x5ab   :  { %v8962_v20 = vpop.eup %8237 }
 0x5ac   :  { %v8240_v21 = vpop.eup %8239  ;;  %v1311_v22 = vsel %vm1082_vm1, %v8962_v20, 0.0  ;;  %7174 = vmatpush3.bf16.msra.mxu0 %v7693_v53 }
 0x5ad   :  { %1312 = vadd.xlane.f32.xlu0 %v1311_v22  ;;  %v1206_v24 = vsel %vm1082_vm1, %v8240_v21, 0.0  ;;  %v7698_v22 = vld [vmem:[%s10694_s4 + $0xa8] sm:$0xff]   ;;  %7175 = vmatprep.subr.bf16.mxu0 %v7695_v32  ;;  %v7713_v32 = vld [vmem:[%s10696_s9 + $0xe4] ss:$16 sps:$4 sm:$0xff]  }
 0x5ae   :  { %1207 = vadd.xlane.f32.xlu1 %v1206_v24  ;;  %v7699_v24 = vld [vmem:[%s10694_s4 + $0x40] sm:$0xff]  }
 0x5af   :  { %v8967_v29 = vpop.eup %8241 }
 0x5b0   :  { %v8244_v45 = vpop.eup %8243  ;;  %v1419_v31 = vsel %vm1082_vm1, %v8967_v29, 0.0 }
 0x5b1   :  { %1420 = vadd.xlane.f32.xlu0 %v1419_v31  ;;  %v1314_v37 = vsel %vm1082_vm1, %v8244_v45, 0.0  ;;  %v7702_v31 = vld [vmem:[%s10694_s4 + $0xa0] sm:$0xff]  }
 0x5b2   :  { %1315 = vadd.xlane.f32.xlu1 %v1314_v37  ;;  %v7703_v37 = vld [vmem:[%s10694_s4 + $0xd8] sm:$0xff]  }
 0x5b3   :  { %v8246_v9 = vpop.eup %8245 }
 0x5b4   :  { %v1422_v10 = vsel %vm1082_vm1, %v8246_v9, 0.0 }
 0x5b6   :  { %1423 = vadd.xlane.f32.xlu1 %v1422_v10  ;;  %v7705_v10 = vld [vmem:[%s10694_s4 + $0xd0] sm:$0xff]  }
 0x632   :  { %v1205_v47 = vpop.xlane.xlu0 %1204 }
 0x633   :  { %8247 = vrcp.f32 %v1205_v47 }
 0x636   :  { %v1313_v35 = vpop.xlane.xlu0 %1312 }
 0x637   :  { %v1208_v55 = vpop.xlane.xlu1 %1207 }
 0x638   :  { %8249 = vrcp.f32 %v1208_v55 }
 0x63a   :  { %v1421_v61 = vpop.xlane.xlu0 %1420 }
 0x63b   :  { %v1316_v54 = vpop.xlane.xlu1 %1315 }
 0x63c   :  { %8251 = vrcp.f32 %v1316_v54 }
 0x63d   :  { %8253 = vrcp.f32 %v1313_v35 }
 0x63f   :  { %v1424_v57 = vpop.xlane.xlu1 %1423 }
 0x640   :  { %v8248_v58 = vpop.eup %8247  ;;  %8255 = vrcp.f32 %v1424_v57 }
 0x641   :  { %8257 = vrcp.f32 %v1421_v61  ;;  %v1210_v1 = vmul.f32 %v8248_v58, %v8236_v14 }
 0x645   :  { %v8250_v62 = vpop.eup %8249 }
 0x646   :  { %v1212_v43 = vmul.f32 %v8250_v62, %v8240_v21  ;;  %v7697_v21 = vld [vmem:[%s10694_s4 + $0x8] sm:$0xff]  }
 0x647   :  { %7176 = vmatpush3.bf16.msra.mxu0 %v7697_v21 }
 0x648   :  { %v1213_v56 = vpack.c.bf16 %v1212_v43, %v1210_v1  ;;  %7177 = vmatprep.subr.bf16.mxu0 %v7699_v24 }
 0x649   :  { %v8252_v4 = vpop.eup %8251 }
 0x64a   :  { %7416 = vmatmul.mubr.msk.bf16.vlgmr.msra.gmra.mxu1 %vm1082_vm1, %v1213_v56  ;;  %v8254_v63 = vpop.eup %8253  ;;  %v1320_v5 = vmul.f32 %v8252_v4, %v8244_v45  ;;  %v7701_v45 = vld [vmem:[%s10694_s4] sm:$0xff]  }
 0x64b   :  { %7426 = vmatpush3.bf16.msra.mxu1 %v1039_v30  ;;  %7427 = vmatprep.mubr.msk.bf16.mxu1 %vm8367_vm0, %v8366_v0  ;;  %v1318_v6 = vmul.f32 %v8254_v63, %v8962_v20  ;;  %v7690_v30 = vld [vmem:[%s10694_s4 + $0xb8] sm:$0xff]   ;;  %v7692_v20 = vld [vmem:[%s10694_s4 + $0xf0] sm:$0xff]  }
 0x64c   :  { %7437 = vmatprep.subr.bf16.mxu1 %v8366_v0  ;;  %7178 = vmatpush3.bf16.msra.mxu0 %v7701_v45 }
 0x64d   :  { %v1321_v7 = vpack.c.bf16 %v1320_v5, %v1318_v6  ;;  %v8256_v13 = vpop.eup %8255  ;;  %2080 = vmatprep.subr.bf16.mxu0 %v7713_v32 }
 0x64e   :  { %v8258_v14 = vpop.eup %8257  ;;  %v1428_v8 = vmul.f32 %v8256_v13, %v8246_v9  ;;  %v7704_v9 = vld [vmem:[%s10694_s4 + $0x98] sm:$0xff]  }
 0x64f   :  { %v1426_v23 = vmul.f32 %v8258_v14, %v8967_v29  ;;  %v7700_v29 = vld [vmem:[%s10694_s4 + $0xe0] sm:$0xff]  }
 0x651   :  { %v1429_v19 = vpack.c.bf16 %v1428_v8, %v1426_v23 }
 0x652   :  { %7428 = vmatmul.mubr.msk.bf16.vlgmr.msra.gmra.mxu1 %vm1082_vm1, %v1321_v7 }
 0x653   :  { %7438 = vmatpush3.bf16.msra.mxu1 %v1040_v34  ;;  %7439 = vmatprep.mubr.msk.bf16.mxu1 %vm8367_vm0, %v8366_v0  ;;  %v7696_v34 = vld [vmem:[%s10694_s4 + $0xe8] sm:$0xff]  }
 0x654   :  { %7185 = vmatprep.subr.bf16.mxu1 %v7688_v12 }
 0x65a   :  { %7440 = vmatmul.mubr.msk.bf16.vlgmr.msra.gmra.mxu1 %vm1082_vm1, %v1429_v19 }
 0x65b   :  { %7186 = vmatpush3.bf16.msra.mxu1 %v7690_v30 }
 0x65c   :  { %7187 = vmatprep.subr.bf16.mxu1 %v7692_v20 }
 0x65f   :  { %7188 = vmatpush3.bf16.msra.mxu1 %v7694_v17  ;;  %v7711_v17 = vld [vmem:[%s10696_s9 + $0xe0] ss:$16 sps:$4 sm:$0xff]  }
 0x660   :  { %7189 = vmatprep.subr.bf16.mxu1 %v7696_v34  ;;  %v7714_v34 = vld [vmem:[%s10696_s9 + $0xe8] ss:$16 sps:$4 sm:$0xff]  }
 0x663   :  { %7190 = vmatpush3.bf16.msra.mxu1 %v7698_v22 }
 0x664   :  { %7191 = vmatprep.subr.bf16.mxu1 %v7700_v29 }
 0x667   :  { %7192 = vmatpush3.bf16.msra.mxu1 %v7702_v31 }
 0x668   :  { %7193 = vmatprep.subr.bf16.mxu1 %v7703_v37 }
 0x66b   :  { %7194 = vmatpush3.bf16.msra.mxu1 %v7704_v9  ;;  %v7719_v9 = vld [vmem:[%s10696_s9 + $0xc4] ss:$16 sps:$4 sm:$0xff]  }
 0x66c   :  { %7195 = vmatprep.subr.bf16.mxu1 %v7705_v10  ;;  %v7722_v10 = vld [vmem:[%s10696_s9 + $0xcc] ss:$16 sps:$4 sm:$0xff]  }
 0x66f   :  { %7196 = vmatpush3.bf16.msra.mxu1 %v7706_v11  ;;  %v7717_v11 = vld [vmem:[%s10696_s9 + $0xc0] ss:$16 sps:$4 sm:$0xff]  }
 0x670   :  { %7197 = vmatprep.subr.bf16.mxu1 %v7707_v33  ;;  %v7720_v33 = vld [vmem:[%s10696_s9 + $0xc8] ss:$16 sps:$4 sm:$0xff]  }
 0x673   :  { %7198 = vmatpush3.bf16.msra.mxu1 %v7708_v40  ;;  %v7725_v40 = vld [vmem:[%s10696_s9 + $0xa4] ss:$16 sps:$4 sm:$0xff]  }
 0x674   :  { %7199 = vmatprep.subr.bf16.mxu1 %v7709_v41  ;;  %v7728_v41 = vld [vmem:[%s10696_s9 + $0xac] ss:$16 sps:$4 sm:$0xff]  }
 0x677   :  { %7200 = vmatpush3.bf16.msra.mxu1 %v7710_v42  ;;  %v7723_v42 = vld [vmem:[%s10696_s9 + $0xa0] ss:$16 sps:$4 sm:$0xff]  }
 0x70a   :  { %v1251_v46 = vpop.f32.mrf.mxu1 }
 0x70c   :  { %v7417_v48 = vpop.f32.mrf.mxu1 }
 0x70d   :  { %v7729_v48 = vld [vmem:[%s10696_s9 + $0x80] ss:$16 sps:$4 sm:$0xff]  }
 0x70e   :  { %v1254_v49 = vpop.f32.mrf.mxu1 }
 0x70f   :  { %v1475_v50 = vpack.c.bf16 %v1254_v49, %v1251_v46  ;;  %v7726_v46 = vld [vmem:[%s10696_s9 + $0xa8] ss:$16 sps:$4 sm:$0xff]   ;;  %v7731_v49 = vld [vmem:[%s10696_s9 + $0x84] ss:$16 sps:$4 sm:$0xff]  }
 0x710   :  { %v7418_v38 = vpop.f32.mrf.mxu1 }
 0x711   :  { %1773 = vmatprep.mubr.bf16.mxu0 %v1475_v50  ;;  %v7732_v50 = vld [vmem:[%s10696_s9 + $0x88] ss:$16 sps:$4 sm:$0xff]   ;;  %v7734_v38 = vld [vmem:[%s10696_s9 + $0x8c] ss:$16 sps:$4 sm:$0xff]  }
 0x712   :  { %v1359_v52 = vpop.f32.mrf.mxu1  ;;  %1774 = vmatmul.mubr.bf16.vlgmr.msra.gmra.mxu0 %v1474_v39 }
 0x713   :  { %2112 = vmatprep.mubr.bf16.mxu0 %v8365_v44  ;;  %2081 = vmatpush1.bf16.msra.mxu0 %v7711_v17 }
 0x714   :  { %v7429_v53 = vpop.f32.mrf.mxu1  ;;  %2082 = vmatprep.subr.bf16.mxu0 %v7719_v9  ;;  %v7767_v9 = vld [vmem:[%s10649_s12 + $0x68] sm:$0xff]  }
 0x715   :  { %v7740_v53 = vld [vmem:[%s10696_s9 + $0x6c] ss:$16 sps:$4 sm:$0xff]  }
 0x716   :  { %v1362_v47 = vpop.f32.mrf.mxu1 }
 0x717   :  { %v1476_v61 = vpack.c.bf16 %v1362_v47, %v1359_v52  ;;  %2083 = vmatpush1.bf16.msra.mxu0 %v7717_v11  ;;  %v7737_v52 = vld [vmem:[%s10696_s9 + $0x64] ss:$16 sps:$4 sm:$0xff]   ;;  %v7735_v47 = vld [vmem:[%s10696_s9 + $0x60] ss:$16 sps:$4 sm:$0xff]   ;;  %v7769_v11 = vld [vmem:[%s10649_s12 + $0x28] sm:$0xff]  }
 0x718   :  { %v7430_v55 = vpop.f32.mrf.mxu1  ;;  %2084 = vmatprep.subr.bf16.mxu0 %v7725_v40  ;;  %v7771_v40 = vld [vmem:[%s10649_s12 + $0x60] sm:$0xff]  }
 0x719   :  { %v7738_v55 = vld [vmem:[%s10696_s9 + $0x68] ss:$16 sps:$4 sm:$0xff]  }
 0x71a   :  { %v1467_v35 = vpop.f32.mrf.mxu1 }
 0x71b   :  { %2085 = vmatpush1.bf16.msra.mxu0 %v7723_v42  ;;  %v7773_v42 = vld [vmem:[%s10649_s12 + $0x20] sm:$0xff]  }
 0x71c   :  { %v7441_v54 = vpop.f32.mrf.mxu1  ;;  %2086 = vmatprep.subr.bf16.mxu0 %v7731_v49  ;;  %v7776_v49 = vld [vmem:[%s10649_s12 + $0xd8] sm:$0xff]  }
 0x71d   :  { %v7746_v54 = vld [vmem:[%s10696_s9 + $0x4c] ss:$16 sps:$4 sm:$0xff]  }
 0x71e   :  { %v1470_v57 = vpop.f32.mrf.mxu1 }
 0x71f   :  { %v1477_v58 = vpack.c.bf16 %v1470_v57, %v1467_v35  ;;  %2087 = vmatpush1.bf16.msra.mxu0 %v7729_v48  ;;  %v7743_v35 = vld [vmem:[%s10696_s9 + $0x44] ss:$16 sps:$4 sm:$0xff]   ;;  %v7741_v57 = vld [vmem:[%s10696_s9 + $0x40] ss:$16 sps:$4 sm:$0xff]   ;;  %v7775_v48 = vld [vmem:[%s10649_s12 + $0x58] sm:$0xff]  }
 0x720   :  { %v7442_v62 = vpop.f32.mrf.mxu1  ;;  %2088 = vmatprep.subr.bf16.mxu0 %v7737_v52  ;;  %v7779_v52 = vld [vmem:[%s10649_s12 + $0x50] sm:$0xff]  }
 0x721   :  { %1814 = vmatprep.mubr.bf16.mxu1 %v1477_v58  ;;  %v7744_v58 = vld [vmem:[%s10696_s9 + $0x48] ss:$16 sps:$4 sm:$0xff]   ;;  %v7752_v62 = vld [vmem:[%s10696_s9 + $0x2c] ss:$16 sps:$4 sm:$0xff]  }
 0x722   :  { %1815 = vmatmul.mubr.bf16.vlgmr.msra.gmra.mxu1 %v1476_v61  ;;  %v7749_v61 = vld [vmem:[%s10696_s9 + $0x24] ss:$16 sps:$4 sm:$0xff]  }
 0x723   :  { %2155 = vmatprep.mubr.bf16.mxu1 %v8365_v44  ;;  %2089 = vmatpush1.bf16.msra.mxu0 %v7735_v47  ;;  %v7781_v47 = vld [vmem:[%s10649_s12 + $0x10] sm:$0xff]  }
 0x724   :  { %2090 = vmatprep.subr.bf16.mxu0 %v7743_v35  ;;  %v7783_v35 = vld [vmem:[%s10649_s12 + $0x48] sm:$0xff]  }
 0x727   :  { %2091 = vmatpush1.bf16.msra.mxu0 %v7741_v57  ;;  %v7785_v57 = vld [vmem:[%s10649_s12 + $0x8] sm:$0xff]  }
 0x728   :  { %2092 = vmatprep.subr.bf16.mxu0 %v7749_v61  ;;  %v7787_v61 = vld [vmem:[%s10649_s12 + $0x40] sm:$0xff]  }
 0x7d2   :  { %v7179_v1 = vpop.f32.mrf.mxu0 }
 0x7d4   :  { %v7180_v43 = vpop.f32.mrf.mxu0 }
 0x7d5   :  { %v7181_v25 = vadd.f32 %v7180_v43, %v7179_v1  ;;  %v7747_v1 = vld [vmem:[%s10696_s9 + $0x20] ss:$16 sps:$4 sm:$0xff]   ;;  %v7750_v43 = vld [vmem:[%s10696_s9 + $0x28] ss:$16 sps:$4 sm:$0xff]  }
 0x7d6   :  { %v7182_v56 = vpop.f32.mrf.mxu0  ;;  %2093 = vmatpush1.bf16.msra.mxu0 %v7747_v1  ;;  %v7789_v1 = vld [vmem:[%s10649_s12] sm:$0xff]  }
 0x7d7   :  { %v1776_v5 = vadd.f32 %v7181_v25, %v6447_v36  ;;  %v7758_v25 = vld [vmem:[%s10696_s9 + $0xc] ss:$16 sps:$4 sm:$0xff]  }
 0x7d8   :  { %v7183_v39 = vpop.f32.mrf.mxu0 }
 0x7d9   :  { %v7184_v6 = vadd.f32 %v7183_v39, %v7182_v56  ;;  %v7755_v56 = vld [vmem:[%s10696_s9 + $0x4] ss:$16 sps:$4 sm:$0xff]   ;;  %v7756_v39 = vld [vmem:[%s10696_s9 + $0x8] ss:$16 sps:$4 sm:$0xff]  }
 0x7da   :  { %2094 = vmatprep.subr.bf16.mxu0 %v7755_v56  ;;  %v1898_v56 = vld [vmem:[%s10648_s11] sm:$0xf] }
 0x7db   :  { %v1779_v8 = vadd.f32 %v7184_v6, %v6447_v36  ;;  %v7753_v36 = vld [vmem:[%s10696_s9] ss:$16 sps:$4 sm:$0xff]  }
 0x7dc   :  { %2095 = vmatpush1.bf16.msra.mxu0 %v7753_v36  ;;  %v1911_v36 = vrot.slane %v1898_v56, %v8868_v27 }
 0x7e2   :  { %v7201_v4 = vpop.f32.mrf.mxu1 }
 0x7e4   :  { %v7202_v63 = vpop.f32.mrf.mxu1 }
 0x7e5   :  { %v7203_v7 = vadd.f32 %v7202_v63, %v7201_v4 }
 0x7e6   :  { %v7204_v12 = vpop.f32.mrf.mxu1 }
 0x7e7   :  { %v1817_v13 = vadd.f32 %v7203_v7, %v1776_v5 }
 0x7e8   :  { %v7205_v14 = vpop.f32.mrf.mxu1 }
 0x7e9   :  { %v7206_v23 = vadd.f32 %v7205_v14, %v7204_v12  ;;  %v1823_v30 = vadd.f32 %v1817_v13, %v8630_v59  ;;  %v7716_v59 = vld [vmem:[%s10696_s9 + $0xec] ss:$16 sps:$4 sm:$0xff]  }
 0x7ea   :  { %2123 = vmatprep.subr.bf16.mxu1 %v7716_v59 }
 0x7eb   :  { %v1820_v19 = vadd.f32 %v7206_v23, %v1779_v8  ;;  %1827 = vadd.xlane.f32.xlu0 %v1823_v30  ;;  %2124 = vmatpush1.bf16.msra.mxu1 %v7714_v34  ;;  %v6480_v8 = vld [vmem:[%s10697_s5] ss:$0 sm:$0xff] }
 0x7ec   :  { %2125 = vmatprep.subr.bf16.mxu1 %v7722_v10  ;;  %v7768_v10 = vld [vmem:[%s10649_s12 + $0xe8] sm:$0xff]  }
 0x7ed   :  { %v1824_v20 = vadd.f32 %v1820_v19, %v8632_v60 }
 0x7ef   :  { %1829 = vadd.xlane.f32.xlu1 %v1824_v20  ;;  %2126 = vmatpush1.bf16.msra.mxu1 %v7720_v33  ;;  %v7770_v33 = vld [vmem:[%s10649_s12 + $0xa8] sm:$0xff]  }
 0x7f0   :  { %2127 = vmatprep.subr.bf16.mxu1 %v7728_v41  ;;  %v7772_v41 = vld [vmem:[%s10649_s12 + $0xe0] sm:$0xff]  }
 0x7f3   :  { %2128 = vmatpush1.bf16.msra.mxu1 %v7726_v46  ;;  %v7774_v46 = vld [vmem:[%s10649_s12 + $0xa0] sm:$0xff]  }
 0x7f4   :  { %2129 = vmatprep.subr.bf16.mxu1 %v7734_v38  ;;  %v7778_v38 = vld [vmem:[%s10649_s12 + $0x98] sm:$0xff]  }
 0x7f7   :  { %2130 = vmatpush1.bf16.msra.mxu1 %v7732_v50  ;;  %v7777_v50 = vld [vmem:[%s10649_s12 + $0x18] sm:$0xff]  }
 0x7f8   :  { %2131 = vmatprep.subr.bf16.mxu1 %v7740_v53  ;;  %v7780_v53 = vld [vmem:[%s10649_s12 + $0xd0] sm:$0xff]  }
 0x7fb   :  { %2132 = vmatpush1.bf16.msra.mxu1 %v7738_v55  ;;  %v7782_v55 = vld [vmem:[%s10649_s12 + $0x90] sm:$0xff]  }
 0x7fc   :  { %2133 = vmatprep.subr.bf16.mxu1 %v7746_v54  ;;  %v7784_v54 = vld [vmem:[%s10649_s12 + $0xc8] sm:$0xff]  }
 0x7ff   :  { %2134 = vmatpush1.bf16.msra.mxu1 %v7744_v58  ;;  %v7786_v58 = vld [vmem:[%s10649_s12 + $0x88] sm:$0xff]  }
 0x800   :  { %2135 = vmatprep.subr.bf16.mxu1 %v7752_v62  ;;  %v7788_v62 = vld [vmem:[%s10649_s12 + $0xc0] sm:$0xff]  }
 0x803   :  { %2136 = vmatpush1.bf16.msra.mxu1 %v7750_v43  ;;  %v7790_v43 = vld [vmem:[%s10649_s12 + $0x80] sm:$0xff]  }
 0x804   :  { %2137 = vmatprep.subr.bf16.mxu1 %v7758_v25  ;;  %v1903_v25 = vrot.slane %v1898_v56, %v8865_v26 }
 0x807   :  { %2138 = vmatpush1.bf16.msra.mxu1 %v7756_v39  ;;  %v1907_v39 = vrot.slane %v1898_v56, %v8843_v3 }
 0x874   :  { %v1828_v60 = vpop.xlane.xlu0 %1827 }
 0x875   :  { %v1831_v21 = vmul.f32 0.0078125, %v1828_v60  ;;  %v7759_v60 = vld [vmem:[%s10649_s12 + $0x78] sm:$0xff]  }
 0x876   :  { %7207 = vmatprep.subr.bf16.mxu0 %v7759_v60 }
 0x877   :  { %v9107_v22 = vsub.f32 %v1823_v30, %v1831_v21  ;;  %v7760_v21 = vld [vmem:[%s10649_s12 + $0xf8] sm:$0xff]  }
 0x878   :  { %v1830_v24 = vpop.xlane.xlu1 %1829  ;;  %7229 = vmatprep.subr.bf16.mxu1 %v7760_v21 }
 0x879   :  { %v1832_v29 = vmul.f32 0.0078125, %v1830_v24  ;;  %v1835_v45 = vmul.f32 %v9107_v22, %v9107_v22  ;;  %v7762_v24 = vld [vmem:[%s10649_s12 + $0xb8] sm:$0xff]  }
 0x87b   :  { %v9111_v31 = vsub.f32 %v1824_v20, %v1832_v29  ;;  %1837 = vadd.xlane.f32.xlu0 %v1835_v45  ;;  %v6481_v20 = vld [vmem:[%s10698_s1] ss:$0 sm:$0xff]  ;;  %v7763_v29 = vld [vmem:[%s10649_s12 + $0x70] sm:$0xff]  }
 0x87c   :  { %v7764_v45 = vld [vmem:[%s10649_s12 + $0xf0] sm:$0xff]  }
 0x87d   :  { %v1836_v37 = vmul.f32 %v9111_v31, %v9111_v31 }
 0x87f   :  { %1839 = vadd.xlane.f32.xlu1 %v1836_v37  ;;  %v7766_v37 = vld [vmem:[%s10649_s12 + $0xb0] sm:$0xff]  }
 0x904   :  { %v1838_v4 = vpop.xlane.xlu0 %1837 }
 0x905   :  { %v1841_v63 = vmul.f32 0.0078125, %v1838_v4  ;;  %v1915_v4 = vrot.slane %v1898_v56, %v8884_v51 }
 0x907   :  { %v1843_v5 = vadd.f32 1e-12, %v1841_v63 }
 0x908   :  { %v1840_v6 = vpop.xlane.xlu1 %1839 }
 0x909   :  { %8259 = vrsqrt.f32 %v1843_v5  ;;  %v1842_v7 = vmul.f32 0.0078125, %v1840_v6 }
 0x90b   :  { %v1844_v12 = vadd.f32 1e-12, %v1842_v7 }
 0x90d   :  { %8261 = vrsqrt.f32 %v1844_v12 }
 0x916   :  { %v8260_v13 = vpop.eup %8259 }
 0x917   :  { %v1847_v14 = vmul.f32 %v8260_v13, %v9107_v22  ;;  %v7761_v22 = vld [vmem:[%s10649_s12 + $0x38] sm:$0xff]  }
 0x919   :  { %v1855_v19 = vmul.f32 %v6480_v8, %v1847_v14 }
 0x91a   :  { %v8262_v23 = vpop.eup %8261 }
 0x91b   :  { %v1848_v30 = vmul.f32 %v8262_v23, %v9111_v31  ;;  %v9207_v32 = vadd.f32 %v6481_v20, %v1855_v19  ;;  %v7765_v31 = vld [vmem:[%s10649_s12 + $0x30] sm:$0xff]  }
 0x91d   :  { %v1856_v17 = vmul.f32 %v6480_v8, %v1848_v30 }
 0x91f   :  { %v9209_v34 = vadd.f32 %v6481_v20, %v1856_v17 }
 0x921   :  { %v1865_v59 = vpack.c.bf16 %v9209_v34, %v9207_v32 }
 0x923   :  { %2113 = vmatmul.mubr.bf16.vlgmr.msra.gmra.mxu0 %v1865_v59  ;;  %2156 = vmatmul.mubr.bf16.vlgmr.msra.gmra.mxu1 %v1865_v59 }
 0x924   :  { %7208 = vmatpush3.bf16.msra.mxu0 %v7761_v22  ;;  %7230 = vmatpush3.bf16.msra.mxu1 %v7762_v24 }
 0x925   :  { %7209 = vmatprep.subr.bf16.mxu0 %v7763_v29  ;;  %7231 = vmatprep.subr.bf16.mxu1 %v7764_v45 }
 0x928   :  { %7210 = vmatpush3.bf16.msra.mxu0 %v7765_v31  ;;  %7232 = vmatpush3.bf16.msra.mxu1 %v7766_v37 }
 0x929   :  { %7211 = vmatprep.subr.bf16.mxu0 %v7767_v9  ;;  %7233 = vmatprep.subr.bf16.mxu1 %v7768_v10 }
 0x92c   :  { %7212 = vmatpush3.bf16.msra.mxu0 %v7769_v11  ;;  %7234 = vmatpush3.bf16.msra.mxu1 %v7770_v33 }
 0x92d   :  { %7213 = vmatprep.subr.bf16.mxu0 %v7771_v40  ;;  %7235 = vmatprep.subr.bf16.mxu1 %v7772_v41 }
 0x930   :  { %7214 = vmatpush3.bf16.msra.mxu0 %v7773_v42  ;;  %7236 = vmatpush3.bf16.msra.mxu1 %v7774_v46 }
 0x931   :  { %7215 = vmatprep.subr.bf16.mxu0 %v7775_v48  ;;  %7237 = vmatprep.subr.bf16.mxu1 %v7776_v49 }
 0x934   :  { %7216 = vmatpush3.bf16.msra.mxu0 %v7777_v50  ;;  %7238 = vmatpush3.bf16.msra.mxu1 %v7778_v38 }
 0x935   :  { %7217 = vmatprep.subr.bf16.mxu0 %v7779_v52  ;;  %7239 = vmatprep.subr.bf16.mxu1 %v7780_v53 }
 0x938   :  { %7218 = vmatpush3.bf16.msra.mxu0 %v7781_v47  ;;  %7240 = vmatpush3.bf16.msra.mxu1 %v7782_v55 }
 0x939   :  { %7219 = vmatprep.subr.bf16.mxu0 %v7783_v35  ;;  %7241 = vmatprep.subr.bf16.mxu1 %v7784_v54 }
 0x93c   :  { %7220 = vmatpush3.bf16.msra.mxu0 %v7785_v57  ;;  %7242 = vmatpush3.bf16.msra.mxu1 %v7786_v58 }
 0x93d   :  { %7221 = vmatprep.subr.bf16.mxu0 %v7787_v61  ;;  %7243 = vmatprep.subr.bf16.mxu1 %v7788_v62 }
 0x940   :  { %7222 = vmatpush3.bf16.msra.mxu0 %v7789_v1  ;;  %7244 = vmatpush3.bf16.msra.mxu1 %v7790_v43 }
 0x9e3   :  { %v2114_v63 = vpop.f32.mrf.mxu0  ;;  %v2157_v5 = vpop.f32.mrf.mxu1 }
 0x9e4   :  { %v9316_v6 = vadd.f32 %v2114_v63, %v1903_v25  ;;  %v9318_v7 = vadd.f32 %v2157_v5, %v1911_v36 }
 0x9e5   :  { %v2116_v12 = vpop.f32.mrf.mxu0  ;;  %v2159_v13 = vpop.f32.mrf.mxu1 }
 0x9e6   :  { %v2166_v14 = vmul.f32 %v9316_v6, %v9316_v6  ;;  %v2168_v8 = vmul.f32 %v9318_v7, %v9318_v7  ;;  %v9324_v23 = vadd.f32 %v2116_v12, %v1907_v39  ;;  %v9326_v30 = vadd.f32 %v2159_v13, %v1915_v4 }
 0x9e7   :  { %v2118_v19 = vpop.f32.mrf.mxu0  ;;  %v2161_v20 = vpop.f32.mrf.mxu1 }
 0x9e8   :  { %v2174_v17 = vmul.f32 %v2166_v14, %v9316_v6  ;;  %v2176_v59 = vmul.f32 %v2168_v8, %v9318_v7  ;;  %v2167_v60 = vmul.f32 %v9324_v23, %v9324_v23  ;;  %v2169_v21 = vmul.f32 %v9326_v30, %v9326_v30 }
 0x9e9   :  { %v9334_v22 = vadd.f32 %v2118_v19, %v1903_v25  ;;  %v9336_v24 = vadd.f32 %v2161_v20, %v1911_v36  ;;  %v2120_v29 = vpop.f32.mrf.mxu0  ;;  %v2163_v45 = vpop.f32.mrf.mxu1 }
 0x9ea   :  { %v2182_v31 = vmul.f32 0.044715, %v2174_v17  ;;  %v2184_v37 = vmul.f32 0.044715, %v2176_v59  ;;  %v2175_v9 = vmul.f32 %v2167_v60, %v9324_v23  ;;  %v2177_v10 = vmul.f32 %v2169_v21, %v9326_v30 }
 0x9eb   :  { %v2170_v11 = vmul.f32 %v9334_v22, %v9334_v22  ;;  %v2172_v33 = vmul.f32 %v9336_v24, %v9336_v24  ;;  %v9344_v40 = vadd.f32 %v2120_v29, %v1907_v39  ;;  %v9346_v41 = vadd.f32 %v2163_v45, %v1915_v4 }
 0x9ec   :  { %v2190_v42 = vadd.f32 %v2182_v31, %v9316_v6  ;;  %v2192_v46 = vadd.f32 %v2184_v37, %v9318_v7  ;;  %v2183_v48 = vmul.f32 0.044715, %v2175_v9  ;;  %v2185_v49 = vmul.f32 0.044715, %v2177_v10 }
 0x9ed   :  { %v2178_v50 = vmul.f32 %v2170_v11, %v9334_v22  ;;  %v2180_v38 = vmul.f32 %v2172_v33, %v9336_v24  ;;  %v2171_v52 = vmul.f32 %v9344_v40, %v9344_v40  ;;  %v2173_v53 = vmul.f32 %v9346_v41, %v9346_v41 }
 0x9ee   :  { %v2198_v47 = vmul.f32 0.7978846, %v2190_v42  ;;  %v2200_v55 = vmul.f32 0.7978846, %v2192_v46  ;;  %v2191_v35 = vadd.f32 %v2183_v48, %v9324_v23  ;;  %v2193_v54 = vadd.f32 %v2185_v49, %v9326_v30 }
 0x9ef   :  { %v2186_v57 = vmul.f32 0.044715, %v2178_v50  ;;  %v2188_v58 = vmul.f32 0.044715, %v2180_v38  ;;  %v2179_v61 = vmul.f32 %v2171_v52, %v9344_v40  ;;  %v2181_v62 = vmul.f32 %v2173_v53, %v9346_v41 }
 0x9f0   :  { %8263 = vtanh.f32 %v2198_v47  ;;  %v2199_v1 = vmul.f32 0.7978846, %v2191_v35  ;;  %v2201_v43 = vmul.f32 0.7978846, %v2193_v54 }
 0x9f1   :  { %8265 = vtanh.f32 %v2200_v55  ;;  %v2194_v56 = vadd.f32 %v2186_v57, %v9334_v22  ;;  %v2196_v25 = vadd.f32 %v2188_v58, %v9336_v24  ;;  %v2187_v36 = vmul.f32 0.044715, %v2179_v61 }
 0x9f2   :  { %8267 = vtanh.f32 %v2199_v1  ;;  %v2189_v39 = vmul.f32 0.044715, %v2181_v62 }
 0x9f3   :  { %8269 = vtanh.f32 %v2201_v43  ;;  %v2202_v4 = vmul.f32 0.7978846, %v2194_v56  ;;  %v2204_v63 = vmul.f32 0.7978846, %v2196_v25  ;;  %v2195_v5 = vadd.f32 %v2187_v36, %v9344_v40 }
 0x9f4   :  { %v2197_v12 = vadd.f32 %v2189_v39, %v9346_v41 }
 0x9f5   :  { %8271 = vtanh.f32 %v2202_v4  ;;  %v2203_v13 = vmul.f32 0.7978846, %v2195_v5 }
 0x9f6   :  { %8273 = vtanh.f32 %v2204_v63  ;;  %v2205_v14 = vmul.f32 0.7978846, %v2197_v12 }
 0x9f7   :  { %8275 = vtanh.f32 %v2203_v13 }
 0x9f8   :  { %8277 = vtanh.f32 %v2205_v14 }
 0x9fd   :  { %v8264_v8 = vpop.eup %8263 }
 0x9fe   :  { %v8266_v19 = vpop.eup %8265  ;;  %v2214_v21 = vadd.f32 1.0, %v8264_v8 }
 0x9ff   :  { %v8268_v20 = vpop.eup %8267  ;;  %v2216_v31 = vadd.f32 1.0, %v8266_v19 }
 0xa00   :  { %v8270_v17 = vpop.eup %8269  ;;  %v2215_v59 = vadd.f32 1.0, %v8268_v20  ;;  %v2222_v48 = vmul.f32 0.5, %v2214_v21  ;;  %v7794_v21 = vld [vmem:[%s10689_s0 + $0x5a8] ss:$48 sps:$4 sm:$0xff]  }
 0xa01   :  { %v2217_v29 = vadd.f32 1.0, %v8270_v17  ;;  %v2224_v52 = vmul.f32 0.5, %v2216_v31 }
 0xa02   :  { %v8272_v60 = vpop.eup %8271  ;;  %v2223_v46 = vmul.f32 0.5, %v2215_v59  ;;  %v2230_v58 = vmul.f32 %v2222_v48, %v9316_v6  ;;  %v7791_v59 = vld [vmem:[%s10689_s0 + $0x5a0] ss:$48 sps:$4 sm:$0xff]   ;;  %v7800_v48 = vld [vmem:[%s10689_s0 + $0x548] ss:$48 sps:$4 sm:$0xff]  }
 0xa03   :  { %v8274_v45 = vpop.eup %8273  ;;  %v2218_v37 = vadd.f32 1.0, %v8272_v60  ;;  %v2225_v38 = vmul.f32 0.5, %v2217_v29  ;;  %v2232_v1 = vmul.f32 %v2224_v52, %v9318_v7  ;;  %v7793_v60 = vld [vmem:[%s10689_s0 + $0x5a4] ss:$48 sps:$4 sm:$0xff]   ;;  %v7806_v52 = vld [vmem:[%s10689_s0 + $0x4e8] ss:$48 sps:$4 sm:$0xff]  }
 0xa04   :  { %v8276_v9 = vpop.eup %8275  ;;  %v2220_v10 = vadd.f32 1.0, %v8274_v45  ;;  %v2231_v54 = vmul.f32 %v2223_v46, %v9324_v23  ;;  %3272 = vmatprep.subr.bf16.mxu0 %v7793_v60  ;;  %v7797_v46 = vld [vmem:[%s10689_s0 + $0x540] ss:$48 sps:$4 sm:$0xff]  }
 0xa05   :  { %v8278_v11 = vpop.eup %8277  ;;  %v2226_v33 = vmul.f32 0.5, %v2218_v37  ;;  %v2219_v42 = vadd.f32 1.0, %v8276_v9  ;;  %v2233_v61 = vmul.f32 %v2225_v38, %v9326_v30  ;;  %v6514_v30 = vld [vmem:[%s10650_s13] ss:$0 sm:$0xff] }
 0xa06   :  { %v2228_v49 = vmul.f32 0.5, %v2220_v10  ;;  %v2221_v50 = vadd.f32 1.0, %v8278_v11  ;;  %v7803_v38 = vld [vmem:[%s10689_s0 + $0x4e0] ss:$48 sps:$4 sm:$0xff]  }
 0xa07   :  { %v2227_v53 = vmul.f32 0.5, %v2219_v42  ;;  %v2234_v47 = vmul.f32 %v2226_v33, %v9334_v22  ;;  %v7799_v33 = vld [vmem:[%s10689_s0 + $0x544] ss:$48 sps:$4 sm:$0xff]   ;;  %v7802_v42 = vld [vmem:[%s10689_s0 + $0x54c] ss:$48 sps:$4 sm:$0xff]  }
 0xa08   :  { %v2229_v55 = vmul.f32 0.5, %v2221_v50  ;;  %v2236_v35 = vmul.f32 %v2228_v49, %v9336_v24  ;;  %v7805_v49 = vld [vmem:[%s10689_s0 + $0x4e4] ss:$48 sps:$4 sm:$0xff]   ;;  %v7808_v50 = vld [vmem:[%s10689_s0 + $0x4ec] ss:$48 sps:$4 sm:$0xff]  }
 0xa09   :  { %v2235_v57 = vmul.f32 %v2227_v53, %v9344_v40  ;;  %v2238_v25 = vpack.c.bf16 %v2234_v47, %v2230_v58  ;;  %v7811_v53 = vld [vmem:[%s10689_s0 + $0x484] ss:$48 sps:$4 sm:$0xff]   ;;  %v7814_v47 = vld [vmem:[%s10689_s0 + $0x48c] ss:$48 sps:$4 sm:$0xff]   ;;  %v7815_v58 = vld [vmem:[%s10689_s0 + $0x420] ss:$48 sps:$4 sm:$0xff]  }
 0xa0a   :  { %v2237_v62 = vmul.f32 %v2229_v55, %v9346_v41  ;;  %v2240_v22 = vpack.c.bf16 %v2236_v35, %v2232_v1  ;;  %v7809_v55 = vld [vmem:[%s10689_s0 + $0x480] ss:$48 sps:$4 sm:$0xff]   ;;  %v7812_v35 = vld [vmem:[%s10689_s0 + $0x488] ss:$48 sps:$4 sm:$0xff]   ;;  %v7826_v1 = vld [vmem:[%s10689_s0 + $0x3cc] ss:$48 sps:$4 sm:$0xff]  }
 0xa0b   :  { %v2239_v43 = vpack.c.bf16 %v2235_v57, %v2231_v54  ;;  %v7817_v54 = vld [vmem:[%s10689_s0 + $0x424] ss:$48 sps:$4 sm:$0xff]   ;;  %v7820_v57 = vld [vmem:[%s10689_s0 + $0x42c] ss:$48 sps:$4 sm:$0xff]   ;;  %v6548_v60 = vld [vmem:[%s10652_s15] ss:$0 sm:$0xff] }
 0xa0c   :  { %v2241_v56 = vpack.c.bf16 %v2237_v62, %v2233_v61  ;;  %v7818_v61 = vld [vmem:[%s10689_s0 + $0x428] ss:$48 sps:$4 sm:$0xff]   ;;  %v7823_v62 = vld [vmem:[%s10689_s0 + $0x3c4] ss:$48 sps:$4 sm:$0xff]  }
 0xa0d   :  { %2537 = vmatprep.mubr.bf16.mxu0 %v2239_v43  ;;  %v7821_v43 = vld [vmem:[%s10689_s0 + $0x3c0] ss:$48 sps:$4 sm:$0xff]  }
 0xa0e   :  { %2578 = vmatprep.mubr.bf16.mxu1 %v2241_v56  ;;  %2538 = vmatmul.mubr.bf16.vlgmr.msra.gmra.mxu0 %v2238_v25  ;;  %v7824_v56 = vld [vmem:[%s10689_s0 + $0x3c8] ss:$48 sps:$4 sm:$0xff]   ;;  %v7829_v25 = vld [vmem:[%s10689_s0 + $0x364] ss:$48 sps:$4 sm:$0xff]  }
 0xa0f   :  { %2579 = vmatmul.mubr.bf16.vlgmr.msra.gmra.mxu1 %v2240_v22  ;;  %3304 = vmatprep.mubr.bf16.mxu0 %v8365_v44  ;;  %v7832_v22 = vld [vmem:[%s10689_s0 + $0x36c] ss:$48 sps:$4 sm:$0xff]  }
 0xa10   :  { %3347 = vmatprep.mubr.bf16.mxu1 %v8365_v44  ;;  %3273 = vmatpush1.bf16.msra.mxu0 %v7791_v59 }
 0xa11   :  { %3274 = vmatprep.subr.bf16.mxu0 %v7799_v33  ;;  %v7853_v33 = vld [vmem:[%s10689_s0 + $0x4f4] ss:$48 sps:$4 sm:$0xff]  }
 0xa14   :  { %3275 = vmatpush1.bf16.msra.mxu0 %v7797_v46  ;;  %v7851_v46 = vld [vmem:[%s10689_s0 + $0x4f0] ss:$48 sps:$4 sm:$0xff]  }
 0xa15   :  { %3276 = vmatprep.subr.bf16.mxu0 %v7805_v49  ;;  %v7859_v49 = vld [vmem:[%s10689_s0 + $0x494] ss:$48 sps:$4 sm:$0xff]  }
 0xa18   :  { %3277 = vmatpush1.bf16.msra.mxu0 %v7803_v38  ;;  %v7857_v38 = vld [vmem:[%s10689_s0 + $0x490] ss:$48 sps:$4 sm:$0xff]  }
 0xa19   :  { %3278 = vmatprep.subr.bf16.mxu0 %v7811_v53  ;;  %v7865_v53 = vld [vmem:[%s10689_s0 + $0x434] ss:$48 sps:$4 sm:$0xff]  }
 0xa1c   :  { %3279 = vmatpush1.bf16.msra.mxu0 %v7809_v55  ;;  %v7863_v55 = vld [vmem:[%s10689_s0 + $0x430] ss:$48 sps:$4 sm:$0xff]  }
 0xa1d   :  { %3280 = vmatprep.subr.bf16.mxu0 %v7817_v54  ;;  %v7871_v54 = vld [vmem:[%s10689_s0 + $0x3d4] ss:$48 sps:$4 sm:$0xff]  }
 0xa20   :  { %3281 = vmatpush1.bf16.msra.mxu0 %v7815_v58  ;;  %v7869_v58 = vld [vmem:[%s10689_s0 + $0x3d0] ss:$48 sps:$4 sm:$0xff]  }
 0xa21   :  { %3282 = vmatprep.subr.bf16.mxu0 %v7823_v62  ;;  %v7877_v62 = vld [vmem:[%s10689_s0 + $0x374] ss:$48 sps:$4 sm:$0xff]  }
 0xa24   :  { %3283 = vmatpush1.bf16.msra.mxu0 %v7821_v43  ;;  %v7875_v43 = vld [vmem:[%s10689_s0 + $0x370] ss:$48 sps:$4 sm:$0xff]  }
 0xa25   :  { %3284 = vmatprep.subr.bf16.mxu0 %v7829_v25  ;;  %v7883_v25 = vld [vmem:[%s10689_s0 + $0x314] ss:$48 sps:$4 sm:$0xff]  }
 0xace   :  { %v7223_v23 = vpop.f32.mrf.mxu0 }
 0xacf   :  { %v7245_v6 = vpop.f32.mrf.mxu1 }
 0xad0   :  { %v7224_v24 = vpop.f32.mrf.mxu0 }
 0xad1   :  { %v7225_v7 = vadd.f32 %v7224_v24, %v7223_v23  ;;  %v7246_v40 = vpop.f32.mrf.mxu1  ;;  %v7827_v23 = vld [vmem:[%s10689_s0 + $0x360] ss:$48 sps:$4 sm:$0xff]   ;;  %v7835_v24 = vld [vmem:[%s10689_s0 + $0x304] ss:$48 sps:$4 sm:$0xff]  }
 0xad2   :  { %v7226_v41 = vpop.f32.mrf.mxu0  ;;  %v7247_v39 = vadd.f32 %v7246_v40, %v7245_v6  ;;  %v7830_v6 = vld [vmem:[%s10689_s0 + $0x368] ss:$48 sps:$4 sm:$0xff]   ;;  %3285 = vmatpush1.bf16.msra.mxu0 %v7827_v23  ;;  %v7838_v40 = vld [vmem:[%s10689_s0 + $0x30c] ss:$48 sps:$4 sm:$0xff]   ;;  %v7881_v23 = vld [vmem:[%s10689_s0 + $0x310] ss:$48 sps:$4 sm:$0xff]  }
 0xad3   :  { %v2540_v36 = vadd.f32 %v7225_v7, %v6514_v30  ;;  %v7248_v4 = vpop.f32.mrf.mxu1  ;;  %v7836_v7 = vld [vmem:[%s10689_s0 + $0x308] ss:$48 sps:$4 sm:$0xff]   ;;  %3286 = vmatprep.subr.bf16.mxu0 %v7835_v24  ;;  %v7892_v24 = vld [vmem:[%s10689_s0 + $0x5cc] ss:$48 sps:$4 sm:$0xff]  }
 0xad4   :  { %v7227_v63 = vpop.f32.mrf.mxu0 }
 0xad5   :  { %v2581_v5 = vadd.f32 %v7247_v39, %v2540_v36  ;;  %v7228_v12 = vadd.f32 %v7227_v63, %v7226_v41  ;;  %v7249_v13 = vpop.f32.mrf.mxu1  ;;  %v7841_v41 = vld [vmem:[%s10689_s0 + $0x5b4] ss:$48 sps:$4 sm:$0xff]   ;;  %v7844_v36 = vld [vmem:[%s10689_s0 + $0x5bc] ss:$48 sps:$4 sm:$0xff]  }
 0xad6   :  { %v7250_v8 = vadd.f32 %v7249_v13, %v7248_v4 }
 0xad7   :  { %v2543_v14 = vadd.f32 %v7228_v12, %v6514_v30  ;;  %v2587_v19 = vadd.f32 %v2581_v5, %v9207_v32  ;;  %v7796_v32 = vld [vmem:[%s10689_s0 + $0x5ac] ss:$48 sps:$4 sm:$0xff]   ;;  %v7833_v30 = vld [vmem:[%s10689_s0 + $0x300] ss:$48 sps:$4 sm:$0xff]  }
 0xad8   :  { %3315 = vmatprep.subr.bf16.mxu1 %v7796_v32  ;;  %3287 = vmatpush1.bf16.msra.mxu0 %v7833_v30  ;;  %v7889_v30 = vld [vmem:[%s10689_s0 + $0x5c4] ss:$48 sps:$4 sm:$0xff]  }
 0xad9   :  { %v2584_v20 = vadd.f32 %v7250_v8, %v2543_v14  ;;  %2591 = vadd.xlane.f32.xlu0 %v2587_v19  ;;  %3316 = vmatpush1.bf16.msra.mxu1 %v7794_v21 }
 0xada   :  { %3317 = vmatprep.subr.bf16.mxu1 %v7802_v42  ;;  %3358 = vmatprep.subr.bf16.mxu0 %v7841_v41  ;;  %v7856_v42 = vld [vmem:[%s10689_s0 + $0x4fc] ss:$48 sps:$4 sm:$0xff]   ;;  %v7895_v41 = vld [vmem:[%s10689_s0 + $0x564] ss:$48 sps:$4 sm:$0xff]  }
 0xadb   :  { %v2588_v17 = vadd.f32 %v2584_v20, %v9209_v34 }
 0xadd   :  { %2593 = vadd.xlane.f32.xlu1 %v2588_v17  ;;  %3318 = vmatpush1.bf16.msra.mxu1 %v7800_v48  ;;  %v7854_v48 = vld [vmem:[%s10689_s0 + $0x4f8] ss:$48 sps:$4 sm:$0xff]  }
 0xade   :  { %3319 = vmatprep.subr.bf16.mxu1 %v7808_v50  ;;  %v7862_v50 = vld [vmem:[%s10689_s0 + $0x49c] ss:$48 sps:$4 sm:$0xff]  }
 0xae1   :  { %3320 = vmatpush1.bf16.msra.mxu1 %v7806_v52  ;;  %v7860_v52 = vld [vmem:[%s10689_s0 + $0x498] ss:$48 sps:$4 sm:$0xff]  }
 0xae2   :  { %3321 = vmatprep.subr.bf16.mxu1 %v7814_v47  ;;  %v7868_v47 = vld [vmem:[%s10689_s0 + $0x43c] ss:$48 sps:$4 sm:$0xff]  }
 0xae5   :  { %3322 = vmatpush1.bf16.msra.mxu1 %v7812_v35  ;;  %v7866_v35 = vld [vmem:[%s10689_s0 + $0x438] ss:$48 sps:$4 sm:$0xff]  }
 0xae6   :  { %3323 = vmatprep.subr.bf16.mxu1 %v7820_v57  ;;  %v7874_v57 = vld [vmem:[%s10689_s0 + $0x3dc] ss:$48 sps:$4 sm:$0xff]  }
 0xae9   :  { %3324 = vmatpush1.bf16.msra.mxu1 %v7818_v61  ;;  %v7872_v61 = vld [vmem:[%s10689_s0 + $0x3d8] ss:$48 sps:$4 sm:$0xff]  }
 0xaea   :  { %3325 = vmatprep.subr.bf16.mxu1 %v7826_v1  ;;  %v7880_v1 = vld [vmem:[%s10689_s0 + $0x37c] ss:$48 sps:$4 sm:$0xff]  }
 0xaed   :  { %3326 = vmatpush1.bf16.msra.mxu1 %v7824_v56  ;;  %v7878_v56 = vld [vmem:[%s10689_s0 + $0x378] ss:$48 sps:$4 sm:$0xff]  }
 0xaee   :  { %3327 = vmatprep.subr.bf16.mxu1 %v7832_v22  ;;  %v7886_v22 = vld [vmem:[%s10689_s0 + $0x31c] ss:$48 sps:$4 sm:$0xff]  }
 0xaf1   :  { %3328 = vmatpush1.bf16.msra.mxu1 %v7830_v6  ;;  %v7884_v6 = vld [vmem:[%s10689_s0 + $0x318] ss:$48 sps:$4 sm:$0xff]  }
 0xaf2   :  { %3329 = vmatprep.subr.bf16.mxu1 %v7838_v40  ;;  %v7890_v40 = vld [vmem:[%s10689_s0 + $0x5c8] ss:$48 sps:$4 sm:$0xff]  }
 0xaf5   :  { %3330 = vmatpush1.bf16.msra.mxu1 %v7836_v7  ;;  %v7887_v7 = vld [vmem:[%s10689_s0 + $0x5c0] ss:$48 sps:$4 sm:$0xff]  }
 0xaf6   :  { %3401 = vmatprep.subr.bf16.mxu1 %v7844_v36  ;;  %v7898_v36 = vld [vmem:[%s10689_s0 + $0x56c] ss:$48 sps:$4 sm:$0xff]  }
 0xb62   :  { %v2592_v34 = vpop.xlane.xlu0 %2591 }
 0xb63   :  { %v2595_v29 = vmul.f32 0.0078125, %v2592_v34 }
 0xb65   :  { %v9391_v45 = vsub.f32 %v2587_v19, %v2595_v29  ;;  %v6547_v19 = vld [vmem:[%s10651_s14] ss:$0 sm:$0xff] }
 0xb66   :  { %v2594_v31 = vpop.xlane.xlu1 %2593  ;;  %v7839_v29 = vld [vmem:[%s10689_s0 + $0x5b0] ss:$48 sps:$4 sm:$0xff]  }
 0xb67   :  { %v2596_v37 = vmul.f32 0.0078125, %v2594_v31  ;;  %v2599_v9 = vmul.f32 %v9391_v45, %v9391_v45 }
 0xb69   :  { %v9395_v10 = vsub.f32 %v2588_v17, %v2596_v37  ;;  %2601 = vadd.xlane.f32.xlu0 %v2599_v9  ;;  %v7847_v37 = vld [vmem:[%s10689_s0 + $0x554] ss:$48 sps:$4 sm:$0xff]   ;;  %v7850_v9 = vld [vmem:[%s10689_s0 + $0x55c] ss:$48 sps:$4 sm:$0xff]  }
 0xb6b   :  { %v2600_v11 = vmul.f32 %v9395_v10, %v9395_v10 }
 0xb6d   :  { %2603 = vadd.xlane.f32.xlu1 %v2600_v11  ;;  %v7848_v11 = vld [vmem:[%s10689_s0 + $0x558] ss:$48 sps:$4 sm:$0xff]  }
 0xbf2   :  { %v2602_v39 = vpop.xlane.xlu0 %2601 }
 0xbf3   :  { %v2605_v4 = vmul.f32 0.0078125, %v2602_v39  ;;  %v7893_v39 = vld [vmem:[%s10689_s0 + $0x560] ss:$48 sps:$4 sm:$0xff]  }
 0xbf5   :  { %v2607_v63 = vadd.f32 1e-12, %v2605_v4  ;;  %v7896_v4 = vld [vmem:[%s10689_s0 + $0x568] ss:$48 sps:$4 sm:$0xff]  }
 0xbf6   :  { %v2604_v5 = vpop.xlane.xlu1 %2603 }
 0xbf7   :  { %8279 = vrsqrt.f32 %v2607_v63  ;;  %v2606_v12 = vmul.f32 0.0078125, %v2604_v5  ;;  %v7901_v63 = vld [vmem:[%s10689_s0 + $0x504] ss:$48 sps:$4 sm:$0xff]   ;;  %v7904_v5 = vld [vmem:[%s10689_s0 + $0x50c] ss:$48 sps:$4 sm:$0xff]  }
 0xbf9   :  { %v2608_v13 = vadd.f32 1e-12, %v2606_v12  ;;  %v7899_v12 = vld [vmem:[%s10689_s0 + $0x500] ss:$48 sps:$4 sm:$0xff]  }
 0xbfb   :  { %8281 = vrsqrt.f32 %v2608_v13  ;;  %v7902_v13 = vld [vmem:[%s10689_s0 + $0x508] ss:$48 sps:$4 sm:$0xff]  }
 0xc04   :  { %v8280_v14 = vpop.eup %8279 }
 0xc05   :  { %v2611_v8 = vmul.f32 %v8280_v14, %v9391_v45  ;;  %v7842_v45 = vld [vmem:[%s10689_s0 + $0x5b8] ss:$48 sps:$4 sm:$0xff]   ;;  %v7907_v14 = vld [vmem:[%s10689_s0 + $0x4a4] ss:$48 sps:$4 sm:$0xff]  }
 0xc07   :  { %v2619_v17 = vmul.f32 %v6547_v19, %v2611_v8  ;;  %v7910_v8 = vld [vmem:[%s10689_s0 + $0x4ac] ss:$48 sps:$4 sm:$0xff]  }
 0xc08   :  { %v8282_v20 = vpop.eup %8281 }
 0xc09   :  { %v2612_v59 = vmul.f32 %v8282_v20, %v9395_v10  ;;  %v9497_v32 = vadd.f32 %v6548_v60, %v2619_v17  ;;  %v7845_v10 = vld [vmem:[%s10689_s0 + $0x550] ss:$48 sps:$4 sm:$0xff]   ;;  %v7908_v20 = vld [vmem:[%s10689_s0 + $0x4a8] ss:$48 sps:$4 sm:$0xff]   ;;  %v7913_v17 = vld [vmem:[%s10689_s0 + $0x444] ss:$48 sps:$4 sm:$0xff]  }
 0xc0b   :  { %v2620_v21 = vmul.f32 %v6547_v19, %v2612_v59  ;;  %v7905_v19 = vld [vmem:[%s10689_s0 + $0x4a0] ss:$48 sps:$4 sm:$0xff]   ;;  %v7916_v59 = vld [vmem:[%s10689_s0 + $0x44c] ss:$48 sps:$4 sm:$0xff]  }
 0xc0d   :  { %v9499_v34 = vadd.f32 %v6548_v60, %v2620_v21  ;;  %v7911_v60 = vld [vmem:[%s10689_s0 + $0x440] ss:$48 sps:$4 sm:$0xff]   ;;  %v7914_v21 = vld [vmem:[%s10689_s0 + $0x448] ss:$48 sps:$4 sm:$0xff]  }
 0xc0f   :  { %v9509_v31 = vpack.c.bf16 %v9499_v34, %v9497_v32 }
 0xc11   :  { %3305 = vmatmul.mubr.bf16.vlgmr.msra.gmra.mxu0 %v9509_v31  ;;  %3348 = vmatmul.mubr.bf16.vlgmr.msra.gmra.mxu1 %v9509_v31 }
 0xc12   :  { %3359 = vmatpush1.bf16.msra.mxu0 %v7839_v29  ;;  %3402 = vmatpush1.bf16.msra.mxu1 %v7842_v45  ;;  %v7919_v29 = vld [vmem:[%s10689_s0 + $0x3e4] ss:$48 sps:$4 sm:$0xff]   ;;  %v7922_v45 = vld [vmem:[%s10689_s0 + $0x3ec] ss:$48 sps:$4 sm:$0xff]  }
 0xc13   :  { %3360 = vmatprep.subr.bf16.mxu0 %v7847_v37  ;;  %3403 = vmatprep.subr.bf16.mxu1 %v7850_v9  ;;  %v7917_v37 = vld [vmem:[%s10689_s0 + $0x3e0] ss:$48 sps:$4 sm:$0xff]   ;;  %v7920_v9 = vld [vmem:[%s10689_s0 + $0x3e8] ss:$48 sps:$4 sm:$0xff]  }
 0xc14   :  { %3390 = vmatprep.mubr.bf16.mxu0 %v8365_v44  ;;  %3433 = vmatprep.mubr.bf16.mxu1 %v8365_v44 }
 0xc16   :  { %3361 = vmatpush1.bf16.msra.mxu0 %v7845_v10  ;;  %3404 = vmatpush1.bf16.msra.mxu1 %v7848_v11  ;;  %v7925_v10 = vld [vmem:[%s10689_s0 + $0x384] ss:$48 sps:$4 sm:$0xff]   ;;  %v7928_v11 = vld [vmem:[%s10689_s0 + $0x38c] ss:$48 sps:$4 sm:$0xff]  }
 0xc17   :  { %3362 = vmatprep.subr.bf16.mxu0 %v7853_v33  ;;  %3405 = vmatprep.subr.bf16.mxu1 %v7856_v42  ;;  %v7923_v33 = vld [vmem:[%s10689_s0 + $0x380] ss:$48 sps:$4 sm:$0xff]   ;;  %v7926_v42 = vld [vmem:[%s10689_s0 + $0x388] ss:$48 sps:$4 sm:$0xff]  }
 0xc1a   :  { %3363 = vmatpush1.bf16.msra.mxu0 %v7851_v46  ;;  %3406 = vmatpush1.bf16.msra.mxu1 %v7854_v48  ;;  %v7931_v46 = vld [vmem:[%s10689_s0 + $0x324] ss:$48 sps:$4 sm:$0xff]   ;;  %v7934_v48 = vld [vmem:[%s10689_s0 + $0x32c] ss:$48 sps:$4 sm:$0xff]  }
 0xc1b   :  { %3364 = vmatprep.subr.bf16.mxu0 %v7859_v49  ;;  %3407 = vmatprep.subr.bf16.mxu1 %v7862_v50  ;;  %v7929_v49 = vld [vmem:[%s10689_s0 + $0x320] ss:$48 sps:$4 sm:$0xff]   ;;  %v7932_v50 = vld [vmem:[%s10689_s0 + $0x328] ss:$48 sps:$4 sm:$0xff]  }
 0xc1e   :  { %3365 = vmatpush1.bf16.msra.mxu0 %v7857_v38  ;;  %3408 = vmatpush1.bf16.msra.mxu1 %v7860_v52 }
 0xc1f   :  { %3366 = vmatprep.subr.bf16.mxu0 %v7865_v53  ;;  %3409 = vmatprep.subr.bf16.mxu1 %v7868_v47 }
 0xc22   :  { %3367 = vmatpush1.bf16.msra.mxu0 %v7863_v55  ;;  %3410 = vmatpush1.bf16.msra.mxu1 %v7866_v35 }
 0xc23   :  { %3368 = vmatprep.subr.bf16.mxu0 %v7871_v54  ;;  %3411 = vmatprep.subr.bf16.mxu1 %v7874_v57  ;;  %v6645_v54 = vld [vmem:[%s10692_s2 + $0xc] sm:$0xff] }
 0xc26   :  { %3369 = vmatpush1.bf16.msra.mxu0 %v7869_v58  ;;  %3412 = vmatpush1.bf16.msra.mxu1 %v7872_v61 }
 0xc27   :  { %3370 = vmatprep.subr.bf16.mxu0 %v7877_v62  ;;  %3413 = vmatprep.subr.bf16.mxu1 %v7880_v1 }
 0xc2a   :  { %3371 = vmatpush1.bf16.msra.mxu0 %v7875_v43  ;;  %3414 = vmatpush1.bf16.msra.mxu1 %v7878_v56 }
 0xc2b   :  { %3372 = vmatprep.subr.bf16.mxu0 %v7883_v25  ;;  %3415 = vmatprep.subr.bf16.mxu1 %v7886_v22  ;;  %v2735_v22 = vrot.slane %v6645_v54, %v8865_v26 }
 0xc2e   :  { %3373 = vmatpush1.bf16.msra.mxu0 %v7881_v23  ;;  %3416 = vmatpush1.bf16.msra.mxu1 %v7884_v6 }
 0xc2f   :  { %3444 = vmatprep.subr.bf16.mxu0 %v7889_v30  ;;  %3487 = vmatprep.subr.bf16.mxu1 %v7892_v24  ;;  %v2755_v30 = vrot.slane %v6645_v54, %v253_v18 }
 0xc31   :  { %3391 = vmatmul.mubr.bf16.vlgmr.msra.gmra.mxu0 %v9509_v31  ;;  %3434 = vmatmul.mubr.bf16.vlgmr.msra.gmra.mxu1 %v9509_v31 }
 0xc32   :  { %3445 = vmatpush1.bf16.msra.mxu0 %v7887_v7  ;;  %3488 = vmatpush1.bf16.msra.mxu1 %v7890_v40 }
 0xc33   :  { %3446 = vmatprep.subr.bf16.mxu0 %v7895_v41  ;;  %3489 = vmatprep.subr.bf16.mxu1 %v7898_v36 }
 0xc34   :  { %3476 = vmatprep.mubr.bf16.mxu0 %v8365_v44  ;;  %3519 = vmatprep.mubr.bf16.mxu1 %v8365_v44 }
 0xc36   :  { %3447 = vmatpush1.bf16.msra.mxu0 %v7893_v39  ;;  %3490 = vmatpush1.bf16.msra.mxu1 %v7896_v4  ;;  %v2739_v4 = vrot.slane %v6645_v54, %v8843_v3 }
 0xc37   :  { %3448 = vmatprep.subr.bf16.mxu0 %v7901_v63  ;;  %3491 = vmatprep.subr.bf16.mxu1 %v7904_v5  ;;  %v2759_v5 = vrot.slane %v6645_v54, %v257_v16 }
 0xc3a   :  { %3449 = vmatpush1.bf16.msra.mxu0 %v7899_v12  ;;  %3492 = vmatpush1.bf16.msra.mxu1 %v7902_v13 }
 0xc3b   :  { %3450 = vmatprep.subr.bf16.mxu0 %v7907_v14  ;;  %3493 = vmatprep.subr.bf16.mxu1 %v7910_v8 }
 0xc3e   :  { %3451 = vmatpush1.bf16.msra.mxu0 %v7905_v19  ;;  %3494 = vmatpush1.bf16.msra.mxu1 %v7908_v20  ;;  %v2743_v20 = vrot.slane %v6645_v54, %v8868_v27 }
 0xc3f   :  { %3452 = vmatprep.subr.bf16.mxu0 %v7913_v17  ;;  %3495 = vmatprep.subr.bf16.mxu1 %v7916_v59  ;;  %v2763_v59 = vrot.slane %v6645_v54, %v261_v28  ;;  %v2747_v28 = vrot.slane %v6645_v54, %v8884_v51 }
 0xc42   :  { %3453 = vmatpush1.bf16.msra.mxu0 %v7911_v60  ;;  %3496 = vmatpush1.bf16.msra.mxu1 %v7914_v21 }
 0xc43   :  { %3454 = vmatprep.subr.bf16.mxu0 %v7919_v29  ;;  %3497 = vmatprep.subr.bf16.mxu1 %v7922_v45 }
 0xc46   :  { %3455 = vmatpush1.bf16.msra.mxu0 %v7917_v37  ;;  %3498 = vmatpush1.bf16.msra.mxu1 %v7920_v9  ;;  %v9731_v37 = vld [vmem:[%s10692_s2 + $0x14] sm:$0xf] }
 0xc47   :  { %3456 = vmatprep.subr.bf16.mxu0 %v7925_v10  ;;  %3499 = vmatprep.subr.bf16.mxu1 %v7928_v11  ;;  %v2771_v2 = vrot.slane %v9731_v37, %v8843_v3  ;;  %v2767_v11 = vrot.slane %v9731_v37, %v8865_v26 }
 0xc4a   :  { %3457 = vmatpush1.bf16.msra.mxu0 %v7923_v33  ;;  %3500 = vmatpush1.bf16.msra.mxu1 %v7926_v42 }
 0xc4b   :  { %3458 = vmatprep.subr.bf16.mxu0 %v7931_v46  ;;  %3501 = vmatprep.subr.bf16.mxu1 %v7934_v48 }
 0xc4e   :  { %3459 = vmatpush1.bf16.msra.mxu0 %v7929_v49  ;;  %3502 = vmatpush1.bf16.msra.mxu1 %v7932_v50 }
 0xc4f   :  { %7443 = vmatprep.subr.bf16.mxu0 %v8366_v0  ;;  %7449 = vmatprep.subr.bf16.mxu1 %v8366_v0 }
 0xc51   :  { %3477 = vmatmul.mubr.bf16.vlgmr.msra.gmra.mxu0 %v9509_v31  ;;  %3520 = vmatmul.mubr.bf16.vlgmr.msra.gmra.mxu1 %v9509_v31  ;;  %v2751_v31 = vrot.slane %v6645_v54, %v249_v15 }
 0xc52   :  { %7445 = vmatprep.mubr.msk.bf16.mxu0 %vm8367_vm0, %v8366_v0  ;;  %7451 = vmatprep.mubr.msk.bf16.mxu1 %vm8367_vm0, %v8366_v0 }
 0xcd1   :  { %v3306_v38 = vpop.f32.mrf.mxu0  ;;  %v3349_v53 = vpop.f32.mrf.mxu1 }
 0xcd2   :  { %v3307_v15 = vadd.f32 %v3306_v38, %v2735_v22  ;;  %v3350_v21 = vadd.f32 %v3349_v53, %v2743_v20 }
 0xcd3   :  { %v3308_v52 = vpop.f32.mrf.mxu0  ;;  %v3351_v55 = vpop.f32.mrf.mxu1 }
 0xcd4   :  { %v3309_v13 = vadd.f32 %v3308_v52, %v2739_v4  ;;  %v3352_v48 = vadd.f32 %v3351_v55, %v2747_v28  ;;  %v8341_v55 = vld [vmem:[%s10693_s27] sm:$0xff] }
 0xcd5   :  { %v3310_v47 = vpop.f32.mrf.mxu0  ;;  %v3353_v58 = vpop.f32.mrf.mxu1 }
 0xcd6   :  { %v3311_v24 = vadd.f32 %v3310_v47, %v2735_v22  ;;  %v3354_v16 = vadd.f32 %v3353_v58, %v2743_v20 }
 0xcd7   :  { %v3312_v35 = vpop.f32.mrf.mxu0  ;;  %v3355_v56 = vpop.f32.mrf.mxu1 }
 0xcd8   :  { %v3530_v36 = vpack.c.bf16 %v3311_v24, %v3307_v15  ;;  %v3313_v18 = vadd.f32 %v3312_v35, %v2739_v4  ;;  %v3532_v45 = vpack.c.bf16 %v3354_v16, %v3350_v21  ;;  %v3356_v33 = vadd.f32 %v3355_v56, %v2747_v28 }
 0xcda   :  { %v3531_v8 = vpack.c.bf16 %v3313_v18, %v3309_v13  ;;  %v3533_v52 = vpack.c.bf16 %v3356_v33, %v3352_v48 }
 0xcf1   :  { %v3392_v57 = vpop.f32.mrf.mxu0  ;;  %v3435_v23 = vpop.f32.mrf.mxu1 }
 0xcf2   :  { %v3393_v1 = vadd.f32 %v3392_v57, %v2751_v31  ;;  %v3436_v14 = vadd.f32 %v3435_v23, %v2759_v5 }
 0xcf3   :  { %v3394_v61 = vpop.f32.mrf.mxu0  ;;  %v3437_v40 = vpop.f32.mrf.mxu1 }
 0xcf4   :  { %v3395_v41 = vadd.f32 %v3394_v61, %v2755_v30  ;;  %v3438_v29 = vadd.f32 %v3437_v40, %v2763_v59 }
 0xcf5   :  { %v3396_v62 = vpop.f32.mrf.mxu0  ;;  %v3439_v63 = vpop.f32.mrf.mxu1 }
 0xcf6   :  { %v3397_v43 = vadd.f32 %v3396_v62, %v2751_v31  ;;  %v3440_v12 = vadd.f32 %v3439_v63, %v2759_v5 }
 0xcf7   :  { %v3398_v6 = vpop.f32.mrf.mxu0  ;;  %v3441_v17 = vpop.f32.mrf.mxu1 }
 0xcf8   :  { %v3534_v25 = vpack.c.bf16 %v3397_v43, %v3393_v1  ;;  %v3399_v7 = vadd.f32 %v3398_v6, %v2755_v30  ;;  %v3536_v19 = vpack.c.bf16 %v3440_v12, %v3436_v14  ;;  %v3442_v60 = vadd.f32 %v3441_v17, %v2763_v59  ;;  %v8342_v1 = vld [vmem:[%s10693_s27 + $0x8] sm:$0xff] }
 0xcfa   :  { %7444 = vmatpush3.bf16.xpose.msra.mxu0 %v3534_v25  ;;  %v3535_v39 = vpack.c.bf16 %v3399_v7, %v3395_v41  ;;  %v3537_v9 = vpack.c.bf16 %v3442_v60, %v3438_v29 }
 0xcfb   :  { %7455 = vmatprep.subr.bf16.mxu0 %v8366_v0 }
 0xd01   :  { %7446 = vmatmul.mubr.bf16.vlgmr.msra.gmra.mxu0 %v3530_v36 }
 0xd02   :  { %7456 = vmatpush3.bf16.xpose.msra.mxu0 %v3535_v39  ;;  %7457 = vmatprep.mubr.msk.bf16.mxu0 %vm8367_vm0, %v8366_v0 }
 0xd03   :  { %7467 = vmatprep.subr.bf16.mxu0 %v8366_v0 }
 0xd09   :  { %7458 = vmatmul.mubr.bf16.vlgmr.msra.gmra.mxu0 %v3531_v8 }
 0xd0a   :  { %7468 = vmatpush3.bf16.xpose.msra.mxu0 %v3536_v19  ;;  %7469 = vmatprep.mubr.msk.bf16.mxu0 %vm8367_vm0, %v8366_v0 }
 0xd0b   :  { %7479 = vmatprep.subr.bf16.mxu0 %v8366_v0 }
 0xd11   :  { %v3478_v10 = vpop.f32.mrf.mxu0  ;;  %7470 = vmatmul.mubr.bf16.vlgmr.msra.gmra.mxu0 %v3532_v45 }
 0xd12   :  { %7480 = vmatpush3.bf16.xpose.msra.mxu0 %v3537_v9  ;;  %7481 = vmatprep.mubr.msk.bf16.mxu0 %vm8367_vm0, %v8366_v0  ;;  %v3479_v50 = vadd.f32 %v3478_v10, %v2767_v11 }
 0xd13   :  { %v3480_v42 = vpop.f32.mrf.mxu0 }
 0xd14   :  { %v9740_v46 = vadd.f32 %v3480_v42, %v2771_v2 }
 0xd15   :  { %v3482_v49 = vpop.f32.mrf.mxu0 }
 0xd16   :  { %v3483_v38 = vadd.f32 %v3482_v49, %v2767_v11 }
 0xd17   :  { %v3484_v53 = vpop.f32.mrf.mxu0 }
 0xd18   :  { %v3538_v47 = vpack.c.bf16 %v3483_v38, %v3479_v50  ;;  %v9742_v35 = vadd.f32 %v3484_v53, %v2771_v2 }
 0xd19   :  { %7482 = vmatmul.mubr.bf16.vlgmr.msra.gmra.mxu0 %v3533_v52 }
 0xd1a   :  { %v3539_v54 = vpack.c.bf16 %v9742_v35, %v9740_v46  ;;  %7450 = vmatpush3.bf16.msra.mxu1 %v3538_v47 }
 0xd1b   :  { %7461 = vmatprep.subr.bf16.mxu1 %v8366_v0 }
 0xdc1   :  { %v3576_v57 = vpop.f32.mrf.mxu0 }
 0xdc2   :  { %v3577_v31 = vadd.f32 %v8341_v55, %v3576_v57 }
 0xdc3   :  { %v7447_v58 = vpop.f32.mrf.mxu0 }
 0xdc4   :  { %v3583_v61 = vsel %vm1082_vm1, %v3577_v31, -inf }
 0xdc5   :  { %3584 = vmax.xlane.f32.xlu0 %v3583_v61  ;;  %v3579_v62 = vpop.f32.mrf.mxu0 }
 0xdc6   :  { %v3580_v43 = vadd.f32 %v8342_v1, %v3579_v62 }
 0xdc7   :  { %v7448_v56 = vpop.f32.mrf.mxu0 }
 0xdc8   :  { %v3586_v25 = vsel %vm1082_vm1, %v3580_v43, -inf }
 0xdc9   :  { %3587 = vmax.xlane.f32.xlu1 %v3586_v25  ;;  %v3684_v22 = vpop.f32.mrf.mxu0 }
 0xdca   :  { %v3685_v23 = vadd.f32 %v8341_v55, %v3684_v22 }
 0xdcb   :  { %v7459_v6 = vpop.f32.mrf.mxu0 }
 0xdcc   :  { %v3691_v30 = vsel %vm1082_vm1, %v3685_v23, -inf }
 0xdcd   :  { %3692 = vmax.xlane.f32.xlu0 %v3691_v30  ;;  %v3687_v24 = vpop.f32.mrf.mxu0 }
 0xdce   :  { %v3688_v7 = vadd.f32 %v8342_v1, %v3687_v24 }
 0xdcf   :  { %v7460_v15 = vpop.f32.mrf.mxu0 }
 0xdd0   :  { %v3694_v40 = vsel %vm1082_vm1, %v3688_v7, -inf }
 0xdd1   :  { %3695 = vmax.xlane.f32.xlu1 %v3694_v40  ;;  %v3792_v41 = vpop.f32.mrf.mxu0 }
 0xdd2   :  { %v3793_v36 = vadd.f32 %v8341_v55, %v3792_v41 }
 0xdd3   :  { %v7471_v39 = vpop.f32.mrf.mxu0 }
 0xdd4   :  { %v3799_v4 = vsel %vm1082_vm1, %v3793_v36, -inf }
 0xdd5   :  { %3800 = vmax.xlane.f32.xlu0 %v3799_v4  ;;  %v3795_v63 = vpop.f32.mrf.mxu0 }
 0xdd6   :  { %v3796_v5 = vadd.f32 %v8342_v1, %v3795_v63  ;;  %v7935_v63 = vld [vmem:[%s10694_s4 + $0x178] sm:$0xff]  }
 0xdd7   :  { %v7472_v18 = vpop.f32.mrf.mxu0  ;;  %7267 = vmatprep.subr.bf16.mxu0 %v7935_v63  ;;  %v7951_v63 = vld [vmem:[%s10694_s4 + $0x148] sm:$0xff]  }
 0xdd8   :  { %v3802_v12 = vsel %vm1082_vm1, %v3796_v5, -inf  ;;  %v7937_v18 = vld [vmem:[%s10694_s4 + $0x170] sm:$0xff]  }
 0xdd9   :  { %3803 = vmax.xlane.f32.xlu1 %v3802_v12  ;;  %v3900_v13 = vpop.f32.mrf.mxu0  ;;  %v7938_v12 = vld [vmem:[%s10694_s4 + $0x130] sm:$0xff]  }
 0xdda   :  { %v3901_v14 = vadd.f32 %v8341_v55, %v3900_v13  ;;  %v7939_v13 = vld [vmem:[%s10694_s4 + $0x168] sm:$0xff]  }
 0xddb   :  { %v7483_v8 = vpop.f32.mrf.mxu0 }
 0xddc   :  { %v3907_v19 = vsel %vm1082_vm1, %v3901_v14, -inf  ;;  %v7941_v8 = vld [vmem:[%s10694_s4 + $0x160] sm:$0xff]  }
 0xddd   :  { %3908 = vmax.xlane.f32.xlu0 %v3907_v19  ;;  %v3903_v20 = vpop.f32.mrf.mxu0  ;;  %v7942_v19 = vld [vmem:[%s10694_s4 + $0x120] sm:$0xff]  }
 0xdde   :  { %v3904_v17 = vadd.f32 %v8342_v1, %v3903_v20 }
 0xddf   :  { %v7484_v59 = vpop.f32.mrf.mxu0 }
 0xde0   :  { %v3910_v16 = vsel %vm1082_vm1, %v3904_v17, -inf }
 0xde1   :  { %3911 = vmax.xlane.f32.xlu1 %v3910_v16 }
 0xe4e   :  { %v3585_v60 = vpop.xlane.xlu0 %3584 }
 0xe4f   :  { %v3589_v21 = vsub.f32 %v3577_v31, %v3585_v60  ;;  %v3521_v60 = vpop.f32.mrf.mxu1 }
 0xe51   :  { %v3591_v29 = vmul.f32 1.442695, %v3589_v21 }
 0xe52   :  { %v3588_v45 = vpop.xlane.xlu1 %3587 }
 0xe53   :  { %8283 = vpow2.f32 %v3591_v29  ;;  %v3590_v9 = vsub.f32 %v3580_v43, %v3588_v45 }
 0xe55   :  { %v3593_v2 = vmul.f32 1.442695, %v3590_v9  ;;  %v3523_v9 = vpop.f32.mrf.mxu1 }
 0xe56   :  { %v3693_v28 = vpop.xlane.xlu0 %3692 }
 0xe57   :  { %8285 = vpow2.f32 %v3593_v2  ;;  %v3697_v10 = vsub.f32 %v3685_v23, %v3693_v28 }
 0xe59   :  { %v3699_v11 = vmul.f32 1.442695, %v3697_v10 }
 0xe5a   :  { %v3696_v33 = vpop.xlane.xlu1 %3695 }
 0xe5b   :  { %8287 = vpow2.f32 %v3699_v11  ;;  %v3698_v42 = vsub.f32 %v3688_v7, %v3696_v33  ;;  %v3525_v33 = vpop.f32.mrf.mxu1 }
 0xe5d   :  { %v3701_v48 = vmul.f32 1.442695, %v3698_v42  ;;  %v3527_v46 = vpop.f32.mrf.mxu1 }
 0xe5e   :  { %v3801_v49 = vpop.xlane.xlu0 %3800 }
 0xe5f   :  { %8289 = vpow2.f32 %v3701_v48  ;;  %v3805_v50 = vsub.f32 %v3793_v36, %v3801_v49  ;;  %v2775_v48 = vrot.slane %v9731_v37, %v8868_v27 }
 0xe60   :  { %v9761_v38 = vpop.eup %8283 }
 0xe61   :  { %v3807_v52 = vmul.f32 1.442695, %v3805_v50  ;;  %v3595_v53 = vsel %vm1082_vm1, %v9761_v38, 0.0 }
 0xe62   :  { %v3804_v47 = vpop.xlane.xlu1 %3803  ;;  %3596 = vadd.xlane.f32.xlu0 %v3595_v53 }
 0xe63   :  { %8291 = vpow2.f32 %v3807_v52  ;;  %v3806_v57 = vsub.f32 %v3796_v5, %v3804_v47  ;;  %v7936_v5 = vld [vmem:[%s10694_s4 + $0x138] sm:$0xff]   ;;  %v3522_v47 = vadd.f32 %v3521_v60, %v2775_v48  ;;  %v7963_v60 = vld [vmem:[%s10694_s4 + $0x1c8] sm:$0xff]  }
 0xe64   :  { %v8286_v55 = vpop.eup %8285  ;;  %7268 = vmatpush3.bf16.msra.mxu0 %v7936_v5  ;;  %v7952_v5 = vld [vmem:[%s10694_s4 + $0x1e8] sm:$0xff]  }
 0xe65   :  { %v3809_v31 = vmul.f32 1.442695, %v3806_v57  ;;  %v3598_v58 = vsel %vm1082_vm1, %v8286_v55, 0.0  ;;  %7269 = vmatprep.subr.bf16.mxu0 %v7937_v18  ;;  %v7953_v18 = vld [vmem:[%s10694_s4 + $0x108] sm:$0xff]  }
 0xe66   :  { %v3909_v61 = vpop.xlane.xlu0 %3908  ;;  %3599 = vadd.xlane.f32.xlu1 %v3598_v58 }
 0xe67   :  { %8293 = vpow2.f32 %v3809_v31  ;;  %v3913_v62 = vsub.f32 %v3901_v14, %v3909_v61  ;;  %v7940_v14 = vld [vmem:[%s10694_s4 + $0x128] sm:$0xff]  }
 0xe68   :  { %v9766_v1 = vpop.eup %8287  ;;  %7270 = vmatpush3.bf16.msra.mxu0 %v7938_v12  ;;  %v7954_v12 = vld [vmem:[%s10694_s4 + $0x1a8] sm:$0xff]  }
 0xe69   :  { %v3915_v43 = vmul.f32 1.442695, %v3913_v62  ;;  %v3703_v56 = vsel %vm1082_vm1, %v9766_v1, 0.0  ;;  %7271 = vmatprep.subr.bf16.mxu0 %v7939_v13  ;;  %v7955_v13 = vld [vmem:[%s10694_s4 + $0x140] sm:$0xff]  }
 0xe6a   :  { %3704 = vadd.xlane.f32.xlu0 %v3703_v56  ;;  %v3912_v25 = vpop.xlane.xlu1 %3911 }
 0xe6b   :  { %8295 = vpow2.f32 %v3915_v43  ;;  %v3914_v22 = vsub.f32 %v3904_v17, %v3912_v25 }
 0xe6c   :  { %v9770_v23 = vpop.eup %8289  ;;  %7272 = vmatpush3.bf16.msra.mxu0 %v7940_v14  ;;  %v7956_v14 = vld [vmem:[%s10694_s4 + $0x1e0] sm:$0xff]  }
 0xe6d   :  { %v3917_v6 = vmul.f32 1.442695, %v3914_v22  ;;  %v3706_v30 = vsel %vm1082_vm1, %v9770_v23, 0.0  ;;  %7273 = vmatprep.subr.bf16.mxu0 %v7941_v8  ;;  %v7957_v8 = vld [vmem:[%s10694_s4 + $0x100] sm:$0xff]  }
 0xe6e   :  { %3707 = vadd.xlane.f32.xlu1 %v3706_v30 }
 0xe6f   :  { %8297 = vpow2.f32 %v3917_v6 }
 0xe70   :  { %v9774_v24 = vpop.eup %8291  ;;  %7274 = vmatpush3.bf16.msra.mxu0 %v7942_v19  ;;  %v7958_v19 = vld [vmem:[%s10694_s4 + $0x1a0] sm:$0xff]  }
 0xe71   :  { %v3811_v7 = vsel %vm1082_vm1, %v9774_v24, 0.0 }
 0xe72   :  { %3812 = vadd.xlane.f32.xlu0 %v3811_v7  ;;  %v7944_v7 = vld [vmem:[%s10694_s4 + $0x1f8] sm:$0xff]  }
 0xe74   :  { %v9778_v15 = vpop.eup %8293 }
 0xe75   :  { %v3814_v40 = vsel %vm1082_vm1, %v9778_v15, 0.0 }
 0xe76   :  { %3815 = vadd.xlane.f32.xlu1 %v3814_v40  ;;  %v7946_v40 = vld [vmem:[%s10694_s4 + $0x1b8] sm:$0xff]  }
 0xe78   :  { %v9782_v41 = vpop.eup %8295 }
 0xe79   :  { %v3919_v36 = vsel %vm1082_vm1, %v9782_v41, 0.0 }
 0xe7a   :  { %3920 = vadd.xlane.f32.xlu0 %v3919_v36  ;;  %v7948_v36 = vld [vmem:[%s10694_s4 + $0x1f0] sm:$0xff]  }
 0xe7c   :  { %v9786_v39 = vpop.eup %8297 }
 0xe7d   :  { %v3922_v4 = vsel %vm1082_vm1, %v9786_v39, 0.0 }
 0xe7e   :  { %3923 = vadd.xlane.f32.xlu1 %v3922_v4  ;;  %v7950_v4 = vld [vmem:[%s10694_s4 + $0x1b0] sm:$0xff]  }
 0xeeb   :  { %v3597_v20 = vpop.xlane.xlu0 %3596 }
 0xeec   :  { %8299 = vrcp.f32 %v3597_v20  ;;  %v7959_v20 = vld [vmem:[%s10694_s4 + $0x1d8] sm:$0xff]  }
 0xeef   :  { %v3600_v17 = vpop.xlane.xlu1 %3599 }
 0xef0   :  { %8301 = vrcp.f32 %v3600_v17  ;;  %v7960_v17 = vld [vmem:[%s10694_s4 + $0x198] sm:$0xff]  }
 0xef3   :  { %v3705_v59 = vpop.xlane.xlu0 %3704 }
 0xef4   :  { %8303 = vrcp.f32 %v3705_v59  ;;  %v7961_v59 = vld [vmem:[%s10694_s4 + $0x1d0] sm:$0xff]  }
 0xef7   :  { %v3708_v16 = vpop.xlane.xlu1 %3707 }
 0xef8   :  { %8305 = vrcp.f32 %v3708_v16  ;;  %v7962_v16 = vld [vmem:[%s10694_s4 + $0x190] sm:$0xff]  }
 0xef9   :  { %v8300_v21 = vpop.eup %8299 }
 0xefa   :  { %v3602_v2 = vmul.f32 %v8300_v21, %v9761_v38  ;;  %v3526_v38 = vadd.f32 %v3525_v33, %v2775_v48  ;;  %v7964_v21 = vld [vmem:[%s10694_s4 + $0x188] sm:$0xff]  }
 0xefb   :  { %v3813_v29 = vpop.xlane.xlu0 %3812 }
 0xefc   :  { %8307 = vrcp.f32 %v3813_v29  ;;  %v3540_v31 = vpack.c.bf16 %v3526_v38, %v3522_v47  ;;  %v7965_v29 = vld [vmem:[%s10694_s4 + $0x1c0] sm:$0xff]  }
 0xefd   :  { %v8302_v45 = vpop.eup %8301 }
 0xefe   :  { %v3604_v28 = vmul.f32 %v8302_v45, %v8286_v55  ;;  %v7966_v45 = vld [vmem:[%s10694_s4 + $0x180] sm:$0xff]  }
 0xeff   :  { %v3816_v10 = vpop.xlane.xlu1 %3815 }
 0xf00   :  { %8309 = vrcp.f32 %v3816_v10  ;;  %v3605_v11 = vpack.c.bf16 %v3604_v28, %v3602_v2 }
 0xf01   :  { %v8304_v42 = vpop.eup %8303 }
 0xf02   :  { %7452 = vmatmul.mubr.msk.bf16.vlgmr.msra.gmra.mxu1 %vm1082_vm1, %v3605_v11  ;;  %v3710_v52 = vmul.f32 %v8304_v42, %v9766_v1 }
 0xf03   :  { %7462 = vmatpush3.bf16.msra.mxu1 %v3539_v54  ;;  %v3921_v49 = vpop.xlane.xlu0 %3920  ;;  %7463 = vmatprep.mubr.msk.bf16.mxu1 %vm8367_vm0, %v8366_v0  ;;  %v2779_v54 = vrot.slane %v9731_v37, %v8884_v51 }
 0xf04   :  { %7473 = vmatprep.subr.bf16.mxu1 %v8366_v0  ;;  %8311 = vrcp.f32 %v3921_v49 }
 0xf05   :  { %v8306_v50 = vpop.eup %8305  ;;  %v3528_v61 = vadd.f32 %v3527_v46, %v2779_v54  ;;  %v3524_v43 = vadd.f32 %v3523_v9, %v2779_v54 }
 0xf06   :  { %v3712_v53 = vmul.f32 %v8306_v50, %v9770_v23 }
 0xf07   :  { %v3924_v57 = vpop.xlane.xlu1 %3923  ;;  %v3541_v25 = vpack.c.bf16 %v3528_v61, %v3524_v43  ;;  %v6812_v43 = vld [vmem:[%s10695_s28 + $0x1] ss:$0 sm:$0xff] }
 0xf08   :  { %8313 = vrcp.f32 %v3924_v57  ;;  %v3713_v55 = vpack.c.bf16 %v3712_v53, %v3710_v52 }
 0xf09   :  { %v8308_v35 = vpop.eup %8307 }
 0xf0a   :  { %7464 = vmatmul.mubr.msk.bf16.vlgmr.msra.gmra.mxu1 %vm1082_vm1, %v3713_v55  ;;  %v3818_v62 = vmul.f32 %v8308_v35, %v9774_v24  ;;  %v7943_v24 = vld [vmem:[%s10694_s4 + $0x158] sm:$0xff]  }
 0xf0b   :  { %7474 = vmatpush3.bf16.msra.mxu1 %v3540_v31  ;;  %7475 = vmatprep.mubr.msk.bf16.mxu1 %vm8367_vm0, %v8366_v0 }
 0xf0c   :  { %7485 = vmatprep.subr.bf16.mxu1 %v8366_v0  ;;  %7275 = vmatprep.subr.bf16.mxu0 %v7943_v24 }
 0xf0d   :  { %v8310_v58 = vpop.eup %8309 }
 0xf0e   :  { %v3820_v1 = vmul.f32 %v8310_v58, %v9778_v15  ;;  %v7945_v15 = vld [vmem:[%s10694_s4 + $0x118] sm:$0xff]  }
 0xf0f   :  { %7276 = vmatpush3.bf16.msra.mxu0 %v7945_v15 }
 0xf10   :  { %v3821_v56 = vpack.c.bf16 %v3820_v1, %v3818_v62 }
 0xf11   :  { %v8312_v22 = vpop.eup %8311 }
 0xf12   :  { %7476 = vmatmul.mubr.msk.bf16.vlgmr.msra.gmra.mxu1 %vm1082_vm1, %v3821_v56  ;;  %v3926_v23 = vmul.f32 %v8312_v22, %v9782_v41  ;;  %v7947_v41 = vld [vmem:[%s10694_s4 + $0x150] sm:$0xff]  }
 0xf13   :  { %7486 = vmatpush3.bf16.msra.mxu1 %v3541_v25  ;;  %7487 = vmatprep.mubr.msk.bf16.mxu1 %vm8367_vm0, %v8366_v0 }
 0xf14   :  { %7289 = vmatprep.subr.bf16.mxu1 %v7944_v7  ;;  %7277 = vmatprep.subr.bf16.mxu0 %v7947_v41 }
 0xf15   :  { %v8314_v37 = vpop.eup %8313 }
 0xf16   :  { %v3928_v6 = vmul.f32 %v8314_v37, %v9786_v39  ;;  %v7949_v39 = vld [vmem:[%s10694_s4 + $0x110] sm:$0xff]   ;;  %s10701_s4 = sld [smem:[#allocation18_spill]] }
 0xf17   :  { %7278 = vmatpush3.bf16.msra.mxu0 %v7949_v39 }
 0xf18   :  { %v3929_v30 = vpack.c.bf16 %v3928_v6, %v3926_v23  ;;  %7279 = vmatprep.subr.bf16.mxu0 %v7951_v63  ;;  %v7969_v63 = vld [vmem:[%s10696_s9 + $0x1e4] ss:$16 sps:$4 sm:$0xff]  }
 0xf1a   :  { %7488 = vmatmul.mubr.msk.bf16.vlgmr.msra.gmra.mxu1 %vm1082_vm1, %v3929_v30 }
 0xf1b   :  { %7290 = vmatpush3.bf16.msra.mxu1 %v7946_v40  ;;  %7280 = vmatpush3.bf16.msra.mxu0 %v7953_v18 }
 0xf1c   :  { %7291 = vmatprep.subr.bf16.mxu1 %v7948_v36  ;;  %7281 = vmatprep.subr.bf16.mxu0 %v7955_v13 }
 0xf1f   :  { %7292 = vmatpush3.bf16.msra.mxu1 %v7950_v4  ;;  %7282 = vmatpush3.bf16.msra.mxu0 %v7957_v8  ;;  %v7967_v4 = vld [vmem:[%s10696_s9 + $0x1e0] ss:$16 sps:$4 sm:$0xff]  }
 0xf20   :  { %7293 = vmatprep.subr.bf16.mxu1 %v7952_v5  ;;  %v7970_v5 = vld [vmem:[%s10696_s9 + $0x1e8] ss:$16 sps:$4 sm:$0xff]   ;;  %4586 = vmatprep.subr.bf16.mxu0 %v7969_v63 }
 0xf21   :  { %v8017_v63 = vld [vmem:[%s10649_s12 + $0x138] sm:$0xff]  }
 0xf23   :  { %7294 = vmatpush3.bf16.msra.mxu1 %v7954_v12 }
 0xf24   :  { %7295 = vmatprep.subr.bf16.mxu1 %v7956_v14 }
 0xf27   :  { %7296 = vmatpush3.bf16.msra.mxu1 %v7958_v19 }
 0xf28   :  { %7297 = vmatprep.subr.bf16.mxu1 %v7959_v20 }
 0xf2b   :  { %7298 = vmatpush3.bf16.msra.mxu1 %v7960_v17  ;;  %v7975_v17 = vld [vmem:[%s10696_s9 + $0x1c4] ss:$16 sps:$4 sm:$0xff]  }
 0xf2c   :  { %7299 = vmatprep.subr.bf16.mxu1 %v7961_v59  ;;  %v7978_v59 = vld [vmem:[%s10696_s9 + $0x1cc] ss:$16 sps:$4 sm:$0xff]  }
 0xf2f   :  { %7300 = vmatpush3.bf16.msra.mxu1 %v7962_v16  ;;  %v7973_v16 = vld [vmem:[%s10696_s9 + $0x1c0] ss:$16 sps:$4 sm:$0xff]  }
 0xf30   :  { %7301 = vmatprep.subr.bf16.mxu1 %v7963_v60  ;;  %v7976_v60 = vld [vmem:[%s10696_s9 + $0x1c8] ss:$16 sps:$4 sm:$0xff]  }
 0xf33   :  { %7302 = vmatpush3.bf16.msra.mxu1 %v7964_v21  ;;  %v7981_v21 = vld [vmem:[%s10696_s9 + $0x1a4] ss:$16 sps:$4 sm:$0xff]  }
 0xf34   :  { %7303 = vmatprep.subr.bf16.mxu1 %v7965_v29  ;;  %v7984_v29 = vld [vmem:[%s10696_s9 + $0x1ac] ss:$16 sps:$4 sm:$0xff]  }
 0xf37   :  { %7304 = vmatpush3.bf16.msra.mxu1 %v7966_v45  ;;  %v7979_v45 = vld [vmem:[%s10696_s9 + $0x1a0] ss:$16 sps:$4 sm:$0xff]  }
 0xfc2   :  { %v3643_v9 = vpop.f32.mrf.mxu1 }
 0xfc4   :  { %v7453_v2 = vpop.f32.mrf.mxu1 }
 0xfc5   :  { %v7985_v2 = vld [vmem:[%s10696_s9 + $0x180] ss:$16 sps:$4 sm:$0xff]  }
 0xfc6   :  { %v3646_v28 = vpop.f32.mrf.mxu1 }
 0xfc7   :  { %v3974_v49 = vpack.c.bf16 %v3646_v28, %v3643_v9  ;;  %v7982_v9 = vld [vmem:[%s10696_s9 + $0x1a8] ss:$16 sps:$4 sm:$0xff]   ;;  %v7987_v28 = vld [vmem:[%s10696_s9 + $0x184] ss:$16 sps:$4 sm:$0xff]  }
 0xfc8   :  { %v7454_v10 = vpop.f32.mrf.mxu1 }
 0xfc9   :  { %v7988_v10 = vld [vmem:[%s10696_s9 + $0x188] ss:$16 sps:$4 sm:$0xff]  }
 0xfca   :  { %v3751_v11 = vpop.f32.mrf.mxu1 }
 0xfcc   :  { %v7465_v33 = vpop.f32.mrf.mxu1 }
 0xfcd   :  { %v7993_v33 = vld [vmem:[%s10696_s9 + $0x164] ss:$16 sps:$4 sm:$0xff]  }
 0xfce   :  { %v3754_v42 = vpop.f32.mrf.mxu1 }
 0xfcf   :  { %v3975_v48 = vpack.c.bf16 %v3754_v42, %v3751_v11  ;;  %v7990_v11 = vld [vmem:[%s10696_s9 + $0x18c] ss:$16 sps:$4 sm:$0xff]  }
 0xfd0   :  { %v7466_v50 = vpop.f32.mrf.mxu1  ;;  %v7996_v42 = vld [vmem:[%s10696_s9 + $0x16c] ss:$16 sps:$4 sm:$0xff]  }
 0xfd1   :  { %4275 = vmatprep.mubr.bf16.mxu0 %v3975_v48  ;;  %v7991_v48 = vld [vmem:[%s10696_s9 + $0x160] ss:$16 sps:$4 sm:$0xff]   ;;  %v7999_v50 = vld [vmem:[%s10696_s9 + $0x144] ss:$16 sps:$4 sm:$0xff]  }
 0xfd2   :  { %v3859_v38 = vpop.f32.mrf.mxu1  ;;  %4276 = vmatmul.mubr.bf16.vlgmr.msra.gmra.mxu0 %v3974_v49  ;;  %v7994_v49 = vld [vmem:[%s10696_s9 + $0x168] ss:$16 sps:$4 sm:$0xff]  }
 0xfd3   :  { %4618 = vmatprep.mubr.bf16.mxu0 %v8365_v44  ;;  %4587 = vmatpush1.bf16.msra.mxu0 %v7967_v4  ;;  %v8016_v4 = vld [vmem:[%s10649_s12 + $0x1f8] sm:$0xff]  }
 0xfd4   :  { %v7477_v52 = vpop.f32.mrf.mxu1  ;;  %4588 = vmatprep.subr.bf16.mxu0 %v7975_v17  ;;  %v8028_v17 = vld [vmem:[%s10649_s12 + $0x1e0] sm:$0xff]  }
 0xfd5   :  { %v7997_v52 = vld [vmem:[%s10696_s9 + $0x140] ss:$16 sps:$4 sm:$0xff]  }
 0xfd6   :  { %v3862_v53 = vpop.f32.mrf.mxu1 }
 0xfd7   :  { %v3976_v35 = vpack.c.bf16 %v3862_v53, %v3859_v38  ;;  %4589 = vmatpush1.bf16.msra.mxu0 %v7973_v16  ;;  %v8002_v38 = vld [vmem:[%s10696_s9 + $0x14c] ss:$16 sps:$4 sm:$0xff]   ;;  %v8000_v53 = vld [vmem:[%s10696_s9 + $0x148] ss:$16 sps:$4 sm:$0xff]   ;;  %v8030_v16 = vld [vmem:[%s10649_s12 + $0x1a0] sm:$0xff]  }
 0xfd8   :  { %v7478_v47 = vpop.f32.mrf.mxu1  ;;  %4590 = vmatprep.subr.bf16.mxu0 %v7981_v21  ;;  %v8032_v21 = vld [vmem:[%s10649_s12 + $0x1d8] sm:$0xff]  }
 0xfd9   :  { %v8005_v47 = vld [vmem:[%s10696_s9 + $0x124] ss:$16 sps:$4 sm:$0xff]  }
 0xfda   :  { %v3967_v57 = vpop.f32.mrf.mxu1 }
 0xfdb   :  { %4591 = vmatpush1.bf16.msra.mxu0 %v7979_v45  ;;  %v8034_v45 = vld [vmem:[%s10649_s12 + $0x198] sm:$0xff]  }
 0xfdc   :  { %v7489_v55 = vpop.f32.mrf.mxu1  ;;  %4592 = vmatprep.subr.bf16.mxu0 %v7987_v28  ;;  %v8037_v28 = vld [vmem:[%s10649_s12 + $0x110] sm:$0xff]  }
 0xfdd   :  { %v8003_v55 = vld [vmem:[%s10696_s9 + $0x120] ss:$16 sps:$4 sm:$0xff]  }
 0xfde   :  { %v3970_v31 = vpop.f32.mrf.mxu1 }
 0xfdf   :  { %v3977_v46 = vpack.c.bf16 %v3970_v31, %v3967_v57  ;;  %4593 = vmatpush1.bf16.msra.mxu0 %v7985_v2  ;;  %v8008_v57 = vld [vmem:[%s10696_s9 + $0x12c] ss:$16 sps:$4 sm:$0xff]   ;;  %v8006_v31 = vld [vmem:[%s10696_s9 + $0x128] ss:$16 sps:$4 sm:$0xff]   ;;  %v8036_v2 = vld [vmem:[%s10649_s12 + $0x1d0] sm:$0xff]  }
 0xfe0   :  { %v7490_v54 = vpop.f32.mrf.mxu1  ;;  %4594 = vmatprep.subr.bf16.mxu0 %v7993_v33  ;;  %v8040_v33 = vld [vmem:[%s10649_s12 + $0x1c8] sm:$0xff]  }
 0xfe1   :  { %4316 = vmatprep.mubr.bf16.mxu1 %v3977_v46  ;;  %v8011_v46 = vld [vmem:[%s10696_s9 + $0x104] ss:$16 sps:$4 sm:$0xff]   ;;  %v8009_v54 = vld [vmem:[%s10696_s9 + $0x100] ss:$16 sps:$4 sm:$0xff]  }
 0xfe2   :  { %4317 = vmatmul.mubr.bf16.vlgmr.msra.gmra.mxu1 %v3976_v35  ;;  %v8014_v35 = vld [vmem:[%s10696_s9 + $0x10c] ss:$16 sps:$4 sm:$0xff]  }
 0xfe3   :  { %4661 = vmatprep.mubr.bf16.mxu1 %v8365_v44  ;;  %4595 = vmatpush1.bf16.msra.mxu0 %v7991_v48  ;;  %v8042_v48 = vld [vmem:[%s10649_s12 + $0x188] sm:$0xff]  }
 0xfe4   :  { %4596 = vmatprep.subr.bf16.mxu0 %v7999_v50  ;;  %v8044_v50 = vld [vmem:[%s10649_s12 + $0x1c0] sm:$0xff]  }
 0xfe7   :  { %4597 = vmatpush1.bf16.msra.mxu0 %v7997_v52  ;;  %v8046_v52 = vld [vmem:[%s10649_s12 + $0x180] sm:$0xff]  }
 0xfe8   :  { %4598 = vmatprep.subr.bf16.mxu0 %v8005_v47 }
 0xfeb   :  { %4599 = vmatpush1.bf16.msra.mxu0 %v8003_v55 }
 0xfec   :  { %4600 = vmatprep.subr.bf16.mxu0 %v8011_v46 }
 0xfef   :  { %4601 = vmatpush1.bf16.msra.mxu0 %v8009_v54 }
0x1092   :  { %v7283_v58 = vpop.f32.mrf.mxu0 }
0x1094   :  { %v7284_v61 = vpop.f32.mrf.mxu0 }
0x1095   :  { %v7285_v1 = vadd.f32 %v7284_v61, %v7283_v58  ;;  %v8012_v58 = vld [vmem:[%s10696_s9 + $0x108] ss:$16 sps:$4 sm:$0xff]  }
0x1096   :  { %v7286_v62 = vpop.f32.mrf.mxu0 }
0x1097   :  { %v4278_v37 = vadd.f32 %v7285_v1, %v6812_v43 }
0x1098   :  { %v7287_v56 = vpop.f32.mrf.mxu0 }
0x1099   :  { %v7288_v23 = vadd.f32 %v7287_v56, %v7286_v62 }
0x109b   :  { %v4281_v15 = vadd.f32 %v7288_v23, %v6812_v43  ;;  %v6847_v23 = vld [vmem:[%s10697_s5 + $0x1] ss:$0 sm:$0xff] }
0x10a2   :  { %v7305_v25 = vpop.f32.mrf.mxu1 }
0x10a4   :  { %v7306_v22 = vpop.f32.mrf.mxu1 }
0x10a5   :  { %v7307_v6 = vadd.f32 %v7306_v22, %v7305_v25 }
0x10a6   :  { %v7308_v30 = vpop.f32.mrf.mxu1 }
0x10a7   :  { %v4319_v24 = vadd.f32 %v7307_v6, %v4278_v37 }
0x10a8   :  { %v7309_v7 = vpop.f32.mrf.mxu1 }
0x10a9   :  { %v7310_v40 = vadd.f32 %v7309_v7, %v7308_v30  ;;  %v4325_v41 = vadd.f32 %v4319_v24, %v9497_v32  ;;  %v7972_v32 = vld [vmem:[%s10696_s9 + $0x1ec] ss:$16 sps:$4 sm:$0xff]   ;;  %v6848_v7 = vld [vmem:[%s10698_s1 + $0x1] ss:$0 sm:$0xff] }
0x10aa   :  { %4629 = vmatprep.subr.bf16.mxu1 %v7972_v32  ;;  %v8019_v32 = vld [vmem:[%s10649_s12 + $0x170] sm:$0xff]  }
0x10ab   :  { %v4322_v36 = vadd.f32 %v7310_v40, %v4281_v15  ;;  %4331 = vadd.xlane.f32.xlu0 %v4325_v41  ;;  %4630 = vmatpush1.bf16.msra.mxu1 %v7970_v5  ;;  %v8018_v5 = vld [vmem:[%s10649_s12 + $0x1b8] sm:$0xff]  }
0x10ac   :  { %4631 = vmatprep.subr.bf16.mxu1 %v7978_v59  ;;  %v8029_v59 = vld [vmem:[%s10649_s12 + $0x120] sm:$0xff]  }
0x10ad   :  { %v4326_v39 = vadd.f32 %v4322_v36, %v9499_v34 }
0x10af   :  { %4333 = vadd.xlane.f32.xlu1 %v4326_v39  ;;  %4632 = vmatpush1.bf16.msra.mxu1 %v7976_v60  ;;  %v8031_v60 = vld [vmem:[%s10649_s12 + $0x158] sm:$0xff]  }
0x10b0   :  { %4633 = vmatprep.subr.bf16.mxu1 %v7984_v29  ;;  %v8033_v29 = vld [vmem:[%s10649_s12 + $0x118] sm:$0xff]  }
0x10b3   :  { %4634 = vmatpush1.bf16.msra.mxu1 %v7982_v9  ;;  %v8035_v9 = vld [vmem:[%s10649_s12 + $0x150] sm:$0xff]  }
0x10b4   :  { %4635 = vmatprep.subr.bf16.mxu1 %v7990_v11  ;;  %v8039_v11 = vld [vmem:[%s10649_s12 + $0x148] sm:$0xff]  }
0x10b7   :  { %4636 = vmatpush1.bf16.msra.mxu1 %v7988_v10  ;;  %v8038_v10 = vld [vmem:[%s10649_s12 + $0x190] sm:$0xff]  }
0x10b8   :  { %4637 = vmatprep.subr.bf16.mxu1 %v7996_v42  ;;  %v8041_v42 = vld [vmem:[%s10649_s12 + $0x108] sm:$0xff]  }
0x10bb   :  { %4638 = vmatpush1.bf16.msra.mxu1 %v7994_v49  ;;  %v8043_v49 = vld [vmem:[%s10649_s12 + $0x140] sm:$0xff]  }
0x10bc   :  { %4639 = vmatprep.subr.bf16.mxu1 %v8002_v38  ;;  %v8045_v38 = vld [vmem:[%s10649_s12 + $0x100] sm:$0xff]  }
0x10bf   :  { %4640 = vmatpush1.bf16.msra.mxu1 %v8000_v53  ;;  %v6881_v53 = vld [vmem:[%s10648_s11 + $0x4] sm:$0xf] }
0x10c0   :  { %4641 = vmatprep.subr.bf16.mxu1 %v8008_v57  ;;  %v4409_v47 = vrot.slane %v6881_v53, %v8865_v26  ;;  %v4417_v57 = vrot.slane %v6881_v53, %v8868_v27  ;;  %v4413_v55 = vrot.slane %v6881_v53, %v8843_v3 }
0x10c3   :  { %4642 = vmatpush1.bf16.msra.mxu1 %v8006_v31  ;;  %v4421_v31 = vrot.slane %v6881_v53, %v8884_v51 }
0x10c4   :  { %4643 = vmatprep.subr.bf16.mxu1 %v8014_v35 }
0x10c7   :  { %4644 = vmatpush1.bf16.msra.mxu1 %v8012_v58 }
0x10c8   :  { %7333 = vmatprep.subr.bf16.mxu1 %v8016_v4 }
0x1134   :  { %v4332_v34 = vpop.xlane.xlu0 %4331 }
0x1135   :  { %v4335_v18 = vmul.f32 0.0078125, %v4332_v34  ;;  %v8020_v34 = vld [vmem:[%s10649_s12 + $0x1f0] sm:$0xff]  }
0x1137   :  { %v9931_v12 = vsub.f32 %v4325_v41, %v4335_v18  ;;  %v8021_v18 = vld [vmem:[%s10649_s12 + $0x130] sm:$0xff]  }
0x1138   :  { %v4334_v13 = vpop.xlane.xlu1 %4333 }
0x1139   :  { %v4336_v14 = vmul.f32 0.0078125, %v4334_v13  ;;  %v4339_v8 = vmul.f32 %v9931_v12, %v9931_v12  ;;  %v8023_v13 = vld [vmem:[%s10649_s12 + $0x168] sm:$0xff]  }
0x113b   :  { %v9935_v19 = vsub.f32 %v4326_v39, %v4336_v14  ;;  %4341 = vadd.xlane.f32.xlu0 %v4339_v8  ;;  %v8015_v39 = vld [vmem:[%s10649_s12 + $0x178] sm:$0xff]   ;;  %v8024_v14 = vld [vmem:[%s10649_s12 + $0x1e8] sm:$0xff]  }
0x113c   :  { %7311 = vmatprep.subr.bf16.mxu0 %v8015_v39  ;;  %v8025_v8 = vld [vmem:[%s10649_s12 + $0x128] sm:$0xff]  }
0x113d   :  { %v4340_v20 = vmul.f32 %v9935_v19, %v9935_v19 }
0x113f   :  { %4343 = vadd.xlane.f32.xlu1 %v4340_v20  ;;  %v8027_v20 = vld [vmem:[%s10649_s12 + $0x160] sm:$0xff]  }
0x11c4   :  { %v4342_v61 = vpop.xlane.xlu0 %4341 }
0x11c5   :  { %v4345_v62 = vmul.f32 0.0078125, %v4342_v61 }
0x11c7   :  { %v4347_v1 = vadd.f32 1e-12, %v4345_v62 }
0x11c8   :  { %v4344_v43 = vpop.xlane.xlu1 %4343 }
0x11c9   :  { %8315 = vrsqrt.f32 %v4347_v1  ;;  %v4346_v56 = vmul.f32 0.0078125, %v4344_v43 }
0x11cb   :  { %v4348_v25 = vadd.f32 1e-12, %v4346_v56 }
0x11cd   :  { %8317 = vrsqrt.f32 %v4348_v25 }
0x11d6   :  { %v8316_v22 = vpop.eup %8315 }
0x11d7   :  { %v4351_v37 = vmul.f32 %v8316_v22, %v9931_v12  ;;  %v8022_v12 = vld [vmem:[%s10649_s12 + $0x1b0] sm:$0xff]  }
0x11d9   :  { %v4359_v24 = vmul.f32 %v6847_v23, %v4351_v37 }
0x11da   :  { %v8318_v6 = vpop.eup %8317 }
0x11db   :  { %v4352_v30 = vmul.f32 %v8318_v6, %v9935_v19  ;;  %v10031_v40 = vadd.f32 %v6848_v7, %v4359_v24  ;;  %v8026_v19 = vld [vmem:[%s10649_s12 + $0x1a8] sm:$0xff]  }
0x11dd   :  { %v4360_v15 = vmul.f32 %v6847_v23, %v4352_v30 }
0x11df   :  { %v10033_v41 = vadd.f32 %v6848_v7, %v4360_v15 }
0x11e1   :  { %v4369_v36 = vpack.c.bf16 %v10033_v41, %v10031_v40 }
0x11e3   :  { %4619 = vmatmul.mubr.bf16.vlgmr.msra.gmra.mxu0 %v4369_v36  ;;  %4662 = vmatmul.mubr.bf16.vlgmr.msra.gmra.mxu1 %v4369_v36 }
0x11e4   :  { %7312 = vmatpush3.bf16.msra.mxu0 %v8017_v63  ;;  %7334 = vmatpush3.bf16.msra.mxu1 %v8018_v5 }
0x11e5   :  { %7313 = vmatprep.subr.bf16.mxu0 %v8019_v32  ;;  %7335 = vmatprep.subr.bf16.mxu1 %v8020_v34 }
0x11e8   :  { %7314 = vmatpush3.bf16.msra.mxu0 %v8021_v18  ;;  %7336 = vmatpush3.bf16.msra.mxu1 %v8022_v12 }
0x11e9   :  { %7315 = vmatprep.subr.bf16.mxu0 %v8023_v13  ;;  %7337 = vmatprep.subr.bf16.mxu1 %v8024_v14 }
0x11ec   :  { %7316 = vmatpush3.bf16.msra.mxu0 %v8025_v8  ;;  %7338 = vmatpush3.bf16.msra.mxu1 %v8026_v19 }
0x11ed   :  { %7317 = vmatprep.subr.bf16.mxu0 %v8027_v20  ;;  %7339 = vmatprep.subr.bf16.mxu1 %v8028_v17 }
0x11f0   :  { %7318 = vmatpush3.bf16.msra.mxu0 %v8029_v59  ;;  %7340 = vmatpush3.bf16.msra.mxu1 %v8030_v16 }
0x11f1   :  { %7319 = vmatprep.subr.bf16.mxu0 %v8031_v60  ;;  %7341 = vmatprep.subr.bf16.mxu1 %v8032_v21 }
0x11f4   :  { %7320 = vmatpush3.bf16.msra.mxu0 %v8033_v29  ;;  %7342 = vmatpush3.bf16.msra.mxu1 %v8034_v45 }
0x11f5   :  { %7321 = vmatprep.subr.bf16.mxu0 %v8035_v9  ;;  %7343 = vmatprep.subr.bf16.mxu1 %v8036_v2 }
0x11f8   :  { %7322 = vmatpush3.bf16.msra.mxu0 %v8037_v28  ;;  %7344 = vmatpush3.bf16.msra.mxu1 %v8038_v10 }
0x11f9   :  { %7323 = vmatprep.subr.bf16.mxu0 %v8039_v11  ;;  %7345 = vmatprep.subr.bf16.mxu1 %v8040_v33 }
0x11fc   :  { %7324 = vmatpush3.bf16.msra.mxu0 %v8041_v42  ;;  %7346 = vmatpush3.bf16.msra.mxu1 %v8042_v48 }
0x11fd   :  { %7325 = vmatprep.subr.bf16.mxu0 %v8043_v49  ;;  %7347 = vmatprep.subr.bf16.mxu1 %v8044_v50 }
0x1200   :  { %7326 = vmatpush3.bf16.msra.mxu0 %v8045_v38  ;;  %7348 = vmatpush3.bf16.msra.mxu1 %v8046_v52 }
0x1201   :  { %7491 = vmatprep.subr.bf16.mxu0 %v8366_v0 }
0x12a3   :  { %v4620_v46 = vpop.f32.mrf.mxu0  ;;  %v4663_v35 = vpop.f32.mrf.mxu1 }
0x12a4   :  { %v10141_v54 = vadd.f32 %v4620_v46, %v4409_v47  ;;  %v10143_v58 = vadd.f32 %v4663_v35, %v4417_v57 }
0x12a5   :  { %v4622_v61 = vpop.f32.mrf.mxu0  ;;  %v4665_v62 = vpop.f32.mrf.mxu1 }
0x12a6   :  { %v4672_v1 = vmul.f32 %v10141_v54, %v10141_v54  ;;  %v4674_v43 = vmul.f32 %v10143_v58, %v10143_v58  ;;  %v10149_v56 = vadd.f32 %v4622_v61, %v4413_v55  ;;  %v10151_v25 = vadd.f32 %v4665_v62, %v4421_v31 }
0x12a7   :  { %v4624_v22 = vpop.f32.mrf.mxu0  ;;  %v4667_v37 = vpop.f32.mrf.mxu1 }
0x12a8   :  { %v4680_v23 = vmul.f32 %v4672_v1, %v10141_v54  ;;  %v4682_v6 = vmul.f32 %v4674_v43, %v10143_v58  ;;  %v4673_v30 = vmul.f32 %v10149_v56, %v10149_v56  ;;  %v4675_v24 = vmul.f32 %v10151_v25, %v10151_v25 }
0x12a9   :  { %v10159_v7 = vadd.f32 %v4624_v22, %v4409_v47  ;;  %v10161_v15 = vadd.f32 %v4667_v37, %v4417_v57  ;;  %v4626_v36 = vpop.f32.mrf.mxu0  ;;  %v4669_v39 = vpop.f32.mrf.mxu1 }
0x12aa   :  { %v4688_v4 = vmul.f32 0.044715, %v4680_v23  ;;  %v4690_v63 = vmul.f32 0.044715, %v4682_v6  ;;  %v4681_v5 = vmul.f32 %v4673_v30, %v10149_v56  ;;  %v4683_v32 = vmul.f32 %v4675_v24, %v10151_v25 }
0x12ab   :  { %v4676_v34 = vmul.f32 %v10159_v7, %v10159_v7  ;;  %v4678_v18 = vmul.f32 %v10161_v15, %v10161_v15  ;;  %v10169_v12 = vadd.f32 %v4626_v36, %v4413_v55  ;;  %v10171_v13 = vadd.f32 %v4669_v39, %v4421_v31 }
0x12ac   :  { %v4696_v14 = vadd.f32 %v4688_v4, %v10141_v54  ;;  %v4698_v8 = vadd.f32 %v4690_v63, %v10143_v58  ;;  %v4689_v19 = vmul.f32 0.044715, %v4681_v5  ;;  %v4691_v20 = vmul.f32 0.044715, %v4683_v32 }
0x12ad   :  { %v4684_v17 = vmul.f32 %v4676_v34, %v10159_v7  ;;  %v4686_v59 = vmul.f32 %v4678_v18, %v10161_v15  ;;  %v4677_v16 = vmul.f32 %v10169_v12, %v10169_v12  ;;  %v4679_v60 = vmul.f32 %v10171_v13, %v10171_v13 }
0x12ae   :  { %v4704_v21 = vmul.f32 0.7978846, %v4696_v14  ;;  %v4706_v29 = vmul.f32 0.7978846, %v4698_v8  ;;  %v4697_v45 = vadd.f32 %v4689_v19, %v10149_v56  ;;  %v4699_v9 = vadd.f32 %v4691_v20, %v10151_v25 }
0x12af   :  { %v4692_v2 = vmul.f32 0.044715, %v4684_v17  ;;  %v4694_v28 = vmul.f32 0.044715, %v4686_v59  ;;  %v4685_v10 = vmul.f32 %v4677_v16, %v10169_v12  ;;  %v4687_v11 = vmul.f32 %v4679_v60, %v10171_v13 }
0x12b0   :  { %8319 = vtanh.f32 %v4704_v21  ;;  %v4705_v33 = vmul.f32 0.7978846, %v4697_v45  ;;  %v4707_v42 = vmul.f32 0.7978846, %v4699_v9 }
0x12b1   :  { %8321 = vtanh.f32 %v4706_v29  ;;  %v4700_v48 = vadd.f32 %v4692_v2, %v10159_v7  ;;  %v4702_v49 = vadd.f32 %v4694_v28, %v10161_v15  ;;  %v4693_v50 = vmul.f32 0.044715, %v4685_v10 }
0x12b2   :  { %8323 = vtanh.f32 %v4705_v33  ;;  %v4695_v38 = vmul.f32 0.044715, %v4687_v11 }
0x12b3   :  { %8325 = vtanh.f32 %v4707_v42  ;;  %v4708_v52 = vmul.f32 0.7978846, %v4700_v48  ;;  %v4710_v53 = vmul.f32 0.7978846, %v4702_v49  ;;  %v4701_v47 = vadd.f32 %v4693_v50, %v10169_v12 }
0x12b4   :  { %v4703_v57 = vadd.f32 %v4695_v38, %v10171_v13 }
0x12b5   :  { %8327 = vtanh.f32 %v4708_v52  ;;  %v4709_v55 = vmul.f32 0.7978846, %v4701_v47 }
0x12b6   :  { %8329 = vtanh.f32 %v4710_v53  ;;  %v4711_v31 = vmul.f32 0.7978846, %v4703_v57 }
0x12b7   :  { %8331 = vtanh.f32 %v4709_v55 }
0x12b8   :  { %8333 = vtanh.f32 %v4711_v31 }
0x12bd   :  { %v8320_v46 = vpop.eup %8319 }
0x12be   :  { %v8322_v35 = vpop.eup %8321  ;;  %v4720_v22 = vadd.f32 1.0, %v8320_v46 }
0x12bf   :  { %v8324_v61 = vpop.eup %8323  ;;  %v4722_v6 = vadd.f32 1.0, %v8322_v35 }
0x12c0   :  { %v8326_v62 = vpop.eup %8325  ;;  %v4721_v1 = vadd.f32 1.0, %v8324_v61  ;;  %v4728_v32 = vmul.f32 0.5, %v4720_v22 }
0x12c1   :  { %v4723_v37 = vadd.f32 1.0, %v8326_v62  ;;  %v4730_v8 = vmul.f32 0.5, %v4722_v6  ;;  %v8051_v6 = vld [vmem:[%s10653_s16 + $0x18] sm:$0xff]  }
0x12c2   :  { %v8328_v43 = vpop.eup %8327  ;;  %v4729_v5 = vmul.f32 0.5, %v4721_v1  ;;  %v4736_v21 = vmul.f32 %v4728_v32, %v10141_v54  ;;  %v8061_v32 = vld [vmem:[%s10655_s18 + $0xc0] ss:$16 sps:$4 sm:$0xff]  }
0x12c3   :  { %v8330_v23 = vpop.eup %8329  ;;  %v4724_v30 = vadd.f32 1.0, %v8328_v43  ;;  %v4731_v14 = vmul.f32 0.5, %v4723_v37  ;;  %v4738_v9 = vmul.f32 %v4730_v8, %v10143_v58  ;;  %v8047_v37 = vld [vmem:[%s10653_s16 + $0x38] sm:$0xff]   ;;  %v8073_v8 = vld [vmem:[%s10655_s18 + $0x80] ss:$16 sps:$4 sm:$0xff]  }
0x12c4   :  { %v8332_v24 = vpop.eup %8331  ;;  %v4726_v36 = vadd.f32 1.0, %v8330_v23  ;;  %v4737_v16 = vmul.f32 %v4729_v5, %v10149_v56  ;;  %v8050_v23 = vld [vmem:[%s10653_s16 + $0x20] sm:$0xff]  }
0x12c5   :  { %v8334_v39 = vpop.eup %8333  ;;  %v4732_v4 = vmul.f32 0.5, %v4724_v30  ;;  %v4725_v63 = vadd.f32 1.0, %v8332_v24  ;;  %v4739_v29 = vmul.f32 %v4731_v14, %v10151_v25  ;;  %v6979_v25 = vld [vmem:[%s10650_s13 + $0x1] ss:$0 sm:$0xff]  ;;  %v8052_v30 = vld [vmem:[%s10653_s16 + $0x10] sm:$0xff]   ;;  %v8053_v24 = vld [vmem:[%s10653_s16 + $0x8] sm:$0xff]  }
0x12c6   :  { %v4734_v34 = vmul.f32 0.5, %v4726_v36  ;;  %v4727_v18 = vadd.f32 1.0, %v8334_v39  ;;  %v8054_v36 = vld [vmem:[%s10653_s16] sm:$0xff]  }
0x12c7   :  { %v4733_v19 = vmul.f32 0.5, %v4725_v63  ;;  %v4740_v20 = vmul.f32 %v4732_v4, %v10159_v7  ;;  %v8055_v39 = vld [vmem:[%s10655_s18 + $0xe0] ss:$16 sps:$4 sm:$0xff]   ;;  %v8057_v4 = vld [vmem:[%s10655_s18 + $0xe4] ss:$16 sps:$4 sm:$0xff]  }
0x12c8   :  { %v4735_v17 = vmul.f32 0.5, %v4727_v18  ;;  %v4742_v59 = vmul.f32 %v4734_v34, %v10161_v15  ;;  %v8060_v63 = vld [vmem:[%s10655_s18 + $0xec] ss:$16 sps:$4 sm:$0xff]   ;;  %v8063_v5 = vld [vmem:[%s10655_s18 + $0xc4] ss:$16 sps:$4 sm:$0xff]   ;;  %5472 = vmatprep.subr.bf16.mxu1 %v8057_v4 }
0x12c9   :  { %v4741_v60 = vmul.f32 %v4733_v19, %v10169_v12  ;;  %v4744_v10 = vpack.c.bf16 %v4740_v20, %v4736_v21  ;;  %v8069_v34 = vld [vmem:[%s10655_s18 + $0xa4] ss:$16 sps:$4 sm:$0xff]   ;;  %v8067_v18 = vld [vmem:[%s10655_s18 + $0xa0] ss:$16 sps:$4 sm:$0xff]  }
0x12ca   :  { %v4743_v45 = vmul.f32 %v4735_v17, %v10171_v13  ;;  %v4746_v7 = vpack.c.bf16 %v4742_v59, %v4738_v9  ;;  %v8075_v14 = vld [vmem:[%s10655_s18 + $0x84] ss:$16 sps:$4 sm:$0xff]   ;;  %v7014_v9 = vld [vmem:[%s10651_s14 + $0x1] ss:$0 sm:$0xff]  ;;  %v8103_v4 = vld [vmem:[%s10657_s20 + $0x70] ss:$8 sps:$4 sm:$0xff]  }
0x12cb   :  { %v4745_v2 = vpack.c.bf16 %v4741_v60, %v4737_v16  ;;  %s10699_s14 = sld [smem:[#allocation16_spill]] }
0x12cc   :  { %v4747_v28 = vpack.c.bf16 %v4743_v45, %v4739_v29 }
0x12cd   :  { %5045 = vmatprep.mubr.bf16.mxu0 %v4745_v2 }
0x12ce   :  { %5086 = vmatprep.mubr.bf16.mxu1 %v4747_v28  ;;  %5046 = vmatmul.mubr.bf16.vlgmr.msra.gmra.mxu0 %v4744_v10 }
0x12cf   :  { %5087 = vmatmul.mubr.bf16.vlgmr.msra.gmra.mxu1 %v4746_v7  ;;  %7507 = vmatprep.mubr.msk.bf16.mxu0 %vm8367_vm0, %v8366_v0  ;;  %v7015_v7 = vld [vmem:[%s10652_s15 + $0x1] ss:$0 sm:$0xff] }
0x12d0   :  { %5504 = vmatprep.mubr.bf16.mxu1 %v8365_v44  ;;  %7492 = vmatpush3.bf16.msra.mxu0 %v8047_v37  ;;  %v8105_v37 = vld [vmem:[%s10657_s20 + $0x74] ss:$8 sps:$4 sm:$0xff]  }
0x12d1   :  { %7493 = vmatprep.subr.bf16.mxu0 %v8366_v0  ;;  %5473 = vmatpush1.bf16.msra.mxu1 %v8055_v39 }
0x12d2   :  { %5474 = vmatprep.subr.bf16.mxu1 %v8063_v5 }
0x12d5   :  { %5475 = vmatpush1.bf16.msra.mxu1 %v8061_v32  ;;  %v8111_v32 = vld [vmem:[%s10657_s20 + $0x64] ss:$8 sps:$4 sm:$0xff]  }
0x12d6   :  { %5476 = vmatprep.subr.bf16.mxu1 %v8069_v34  ;;  %v8114_v34 = vld [vmem:[%s10657_s20 + $0x164] ss:$8 sps:$4 sm:$0xff]  }
0x12d9   :  { %5477 = vmatpush1.bf16.msra.mxu1 %v8067_v18  ;;  %v8109_v18 = vld [vmem:[%s10657_s20 + $0x60] ss:$8 sps:$4 sm:$0xff]  }
0x12da   :  { %5478 = vmatprep.subr.bf16.mxu1 %v8075_v14  ;;  %v8112_v14 = vld [vmem:[%s10657_s20 + $0x160] ss:$8 sps:$4 sm:$0xff]  }
0x12dd   :  { %5479 = vmatpush1.bf16.msra.mxu1 %v8073_v8  ;;  %v8117_v8 = vld [vmem:[%s10657_s20 + $0x54] ss:$8 sps:$4 sm:$0xff]  }
0x138e   :  { %v7327_v54 = vpop.f32.mrf.mxu0 }
0x138f   :  { %v7349_v56 = vpop.f32.mrf.mxu1 }
0x1390   :  { %v7328_v58 = vpop.f32.mrf.mxu0 }
0x1391   :  { %v7329_v15 = vadd.f32 %v7328_v58, %v7327_v54  ;;  %v7350_v12 = vpop.f32.mrf.mxu1 }
0x1392   :  { %v7330_v13 = vpop.f32.mrf.mxu0  ;;  %v7351_v33 = vadd.f32 %v7350_v12, %v7349_v56 }
0x1393   :  { %v5048_v11 = vadd.f32 %v7329_v15, %v6979_v25  ;;  %v7352_v42 = vpop.f32.mrf.mxu1  ;;  %v8058_v15 = vld [vmem:[%s10655_s18 + $0xe8] ss:$16 sps:$4 sm:$0xff]  }
0x1394   :  { %v7331_v48 = vpop.f32.mrf.mxu0 }
0x1395   :  { %v5089_v49 = vadd.f32 %v7351_v33, %v5048_v11  ;;  %v7332_v50 = vadd.f32 %v7331_v48, %v7330_v13  ;;  %v7353_v38 = vpop.f32.mrf.mxu1  ;;  %v8066_v13 = vld [vmem:[%s10655_s18 + $0xcc] ss:$16 sps:$4 sm:$0xff]   ;;  %v8064_v11 = vld [vmem:[%s10655_s18 + $0xc8] ss:$16 sps:$4 sm:$0xff]  }
0x1396   :  { %v7354_v53 = vadd.f32 %v7353_v38, %v7352_v42  ;;  %v8072_v33 = vld [vmem:[%s10655_s18 + $0xac] ss:$16 sps:$4 sm:$0xff]   ;;  %v8070_v42 = vld [vmem:[%s10655_s18 + $0xa8] ss:$16 sps:$4 sm:$0xff]   ;;  %v8079_v38 = vld [vmem:[%s10655_s18 + $0x60] ss:$16 sps:$4 sm:$0xff]  }
0x1397   :  { %v5051_v52 = vadd.f32 %v7332_v50, %v6979_v25  ;;  %v5095_v47 = vadd.f32 %v5089_v49, %v10031_v40  ;;  %v8048_v40 = vld [vmem:[%s10653_s16 + $0x30] sm:$0xff]   ;;  %v8078_v48 = vld [vmem:[%s10655_s18 + $0x8c] ss:$16 sps:$4 sm:$0xff]  }
0x1398   :  { %7494 = vmatpush3.bf16.msra.mxu0 %v8048_v40  ;;  %v8081_v49 = vld [vmem:[%s10655_s18 + $0x64] ss:$16 sps:$4 sm:$0xff]   ;;  %v8084_v50 = vld [vmem:[%s10655_s18 + $0x6c] ss:$16 sps:$4 sm:$0xff]  }
0x1399   :  { %v5092_v57 = vadd.f32 %v7354_v53, %v5051_v52  ;;  %5101 = vadd.xlane.f32.xlu1 %v5095_v47  ;;  %7495 = vmatprep.subr.bf16.mxu0 %v8366_v0  ;;  %v8082_v52 = vld [vmem:[%s10655_s18 + $0x68] ss:$16 sps:$4 sm:$0xff]   ;;  %v8087_v53 = vld [vmem:[%s10655_s18 + $0x44] ss:$16 sps:$4 sm:$0xff]  }
0x139a   :  { %5480 = vmatprep.subr.bf16.mxu1 %v8081_v49  ;;  %v8108_v40 = vld [vmem:[%s10657_s20 + $0x174] ss:$8 sps:$4 sm:$0xff]   ;;  %v8154_v49 = vld [vmem:[%s10657_s20 + $0x1f0] ss:$8 sps:$4 sm:$0xff]  }
0x139b   :  { %v5096_v55 = vadd.f32 %v5092_v57, %v10033_v41  ;;  %v8049_v41 = vld [vmem:[%s10653_s16 + $0x28] sm:$0xff]   ;;  %5481 = vmatpush1.bf16.msra.mxu1 %v8079_v38  ;;  %v8085_v57 = vld [vmem:[%s10655_s18 + $0x40] ss:$16 sps:$4 sm:$0xff]  }
0x139c   :  { %7496 = vmatpush3.bf16.msra.mxu0 %v8049_v41  ;;  %5482 = vmatprep.subr.bf16.mxu1 %v8087_v53  ;;  %v7016_v41 = vld [vmem:[%s10654_s17] ss:$0 sm:$0xff]  ;;  %v8162_v38 = vld [vmem:[%s10657_s20 + $0x1e4] ss:$8 sps:$4 sm:$0xff]  }
0x139d   :  { %5103 = vadd.xlane.f32.xlu0 %v5096_v55  ;;  %7497 = vmatprep.subr.bf16.mxu0 %v8366_v0  ;;  %v8160_v53 = vld [vmem:[%s10657_s20 + $0x1e0] ss:$8 sps:$4 sm:$0xff]  }
0x139f   :  { %5483 = vmatpush1.bf16.msra.mxu1 %v8085_v57  ;;  %v8168_v57 = vld [vmem:[%s10657_s20 + $0x1d4] ss:$8 sps:$4 sm:$0xff]  }
0x13a0   :  { %7498 = vmatpush3.bf16.msra.mxu0 %v8050_v23 }
0x13a1   :  { %7499 = vmatprep.subr.bf16.mxu0 %v8366_v0 }
0x13a4   :  { %7500 = vmatpush3.bf16.msra.mxu0 %v8051_v6 }
0x13a5   :  { %7501 = vmatprep.subr.bf16.mxu0 %v8366_v0 }
0x13a8   :  { %7502 = vmatpush3.bf16.msra.mxu0 %v8052_v30 }
0x13a9   :  { %7503 = vmatprep.subr.bf16.mxu0 %v8366_v0 }
0x13ac   :  { %7504 = vmatpush3.bf16.msra.mxu0 %v8053_v24 }
0x13ad   :  { %7505 = vmatprep.subr.bf16.mxu0 %v8366_v0 }
0x13b0   :  { %7506 = vmatpush3.bf16.msra.mxu0 %v8054_v36 }
0x13b1   :  { %5513 = vmatprep.subr.bf16.mxu0 %v8060_v63  ;;  %v8106_v63 = vld [vmem:[%s10657_s20 + $0x170] ss:$8 sps:$4 sm:$0xff]  }
0x1422   :  { %v5102_v31 = vpop.xlane.xlu1 %5101 }
0x1423   :  { %v5105_v46 = vmul.f32 0.0078125, %v5102_v31  ;;  %v8093_v31 = vld [vmem:[%s10655_s18 + $0x24] ss:$16 sps:$4 sm:$0xff]  }
0x1424   :  { %5484 = vmatprep.subr.bf16.mxu1 %v8093_v31  ;;  %v8166_v31 = vld [vmem:[%s10657_s20 + $0x1d0] ss:$8 sps:$4 sm:$0xff]  }
0x1425   :  { %v5107_v35 = vsub.f32 %v5095_v47, %v5105_v46  ;;  %v8090_v47 = vld [vmem:[%s10655_s18 + $0x4c] ss:$16 sps:$4 sm:$0xff]  }
0x1426   :  { %v5104_v61 = vpop.xlane.xlu0 %5103  ;;  %v8096_v46 = vld [vmem:[%s10655_s18 + $0x2c] ss:$16 sps:$4 sm:$0xff]  }
0x1427   :  { %v5106_v62 = vmul.f32 0.0078125, %v5104_v61  ;;  %v5109_v1 = vmul.f32 %v5107_v35, %v5107_v35  ;;  %v8094_v61 = vld [vmem:[%s10655_s18 + $0x28] ss:$16 sps:$4 sm:$0xff]  }
0x1429   :  { %v5108_v43 = vsub.f32 %v5096_v55, %v5106_v62  ;;  %5111 = vadd.xlane.f32.xlu1 %v5109_v1  ;;  %v8088_v55 = vld [vmem:[%s10655_s18 + $0x48] ss:$16 sps:$4 sm:$0xff]   ;;  %v8099_v62 = vld [vmem:[%s10655_s18 + $0x4] ss:$16 sps:$4 sm:$0xff]   ;;  %v8102_v1 = vld [vmem:[%s10655_s18 + $0xc] ss:$16 sps:$4 sm:$0xff]  }
0x142b   :  { %v5110_v22 = vmul.f32 %v5108_v43, %v5108_v43 }
0x142d   :  { %5113 = vadd.xlane.f32.xlu0 %v5110_v22  ;;  %v8100_v22 = vld [vmem:[%s10655_s18 + $0x8] ss:$16 sps:$4 sm:$0xff]  }
0x14b2   :  { %v5112_v19 = vpop.xlane.xlu1 %5111 }
0x14b3   :  { %v5115_v20 = vmul.f32 0.0078125, %v5112_v19  ;;  %v8120_v19 = vld [vmem:[%s10657_s20 + $0x154] ss:$8 sps:$4 sm:$0xff]  }
0x14b5   :  { %v5117_v17 = vadd.f32 1e-12, %v5115_v20  ;;  %v8115_v20 = vld [vmem:[%s10657_s20 + $0x50] ss:$8 sps:$4 sm:$0xff]  }
0x14b6   :  { %v5114_v59 = vpop.xlane.xlu0 %5113 }
0x14b7   :  { %8335 = vrsqrt.f32 %v5117_v17  ;;  %v5116_v16 = vmul.f32 0.0078125, %v5114_v59  ;;  %v8118_v17 = vld [vmem:[%s10657_s20 + $0x150] ss:$8 sps:$4 sm:$0xff]   ;;  %v8123_v59 = vld [vmem:[%s10657_s20 + $0x44] ss:$8 sps:$4 sm:$0xff]  }
0x14b9   :  { %v5118_v60 = vadd.f32 1e-12, %v5116_v16  ;;  %v8126_v16 = vld [vmem:[%s10657_s20 + $0x144] ss:$8 sps:$4 sm:$0xff]  }
0x14bb   :  { %8337 = vrsqrt.f32 %v5118_v60  ;;  %v8121_v60 = vld [vmem:[%s10657_s20 + $0x40] ss:$8 sps:$4 sm:$0xff]  }
0x14c4   :  { %v8336_v21 = vpop.eup %8335 }
0x14c5   :  { %v5121_v29 = vmul.f32 %v8336_v21, %v5107_v35  ;;  %v8091_v35 = vld [vmem:[%s10655_s18 + $0x20] ss:$16 sps:$4 sm:$0xff]  }
0x14c6   :  { %5485 = vmatpush1.bf16.msra.mxu1 %v8091_v35  ;;  %v8124_v21 = vld [vmem:[%s10657_s20 + $0x140] ss:$8 sps:$4 sm:$0xff]   ;;  %v8174_v35 = vld [vmem:[%s10657_s20 + $0x1c4] ss:$8 sps:$4 sm:$0xff]  }
0x14c7   :  { %v5129_v28 = vmul.f32 %v7014_v9, %v5121_v29  ;;  %5486 = vmatprep.subr.bf16.mxu1 %v8099_v62  ;;  %v8129_v29 = vld [vmem:[%s10657_s20 + $0x34] ss:$8 sps:$4 sm:$0xff]   ;;  %v8172_v62 = vld [vmem:[%s10657_s20 + $0x1c0] ss:$8 sps:$4 sm:$0xff]  }
0x14c8   :  { %v8338_v45 = vpop.eup %8337 }
0x14c9   :  { %v5122_v2 = vmul.f32 %v8338_v45, %v5108_v43  ;;  %v5137_v56 = vadd.f32 %v7015_v7, %v5129_v28  ;;  %v8097_v43 = vld [vmem:[%s10655_s18] ss:$16 sps:$4 sm:$0xff]   ;;  %v8132_v45 = vld [vmem:[%s10657_s20 + $0x134] ss:$8 sps:$4 sm:$0xff]   ;;  %v8135_v28 = vld [vmem:[%s10657_s20 + $0x24] ss:$8 sps:$4 sm:$0xff]  }
0x14ca   :  { %5487 = vmatpush1.bf16.msra.mxu1 %v8097_v43  ;;  %v8180_v43 = vld [vmem:[%s10657_s20 + $0x1b4] ss:$8 sps:$4 sm:$0xff]  }
0x14cb   :  { %v5130_v10 = vmul.f32 %v7014_v9, %v5122_v2  ;;  %5958 = vmatprep.subr.bf16.mxu1 %v8105_v37  ;;  %v8127_v9 = vld [vmem:[%s10657_s20 + $0x30] ss:$8 sps:$4 sm:$0xff]  }
0x14cc   :  { %v8130_v2 = vld [vmem:[%s10657_s20 + $0x130] ss:$8 sps:$4 sm:$0xff]  }
0x14cd   :  { %v5138_v54 = vadd.f32 %v7015_v7, %v5130_v10  ;;  %v8138_v10 = vld [vmem:[%s10657_s20 + $0x124] ss:$8 sps:$4 sm:$0xff]   ;;  %v8133_v7 = vld [vmem:[%s10657_s20 + $0x20] ss:$8 sps:$4 sm:$0xff]   ;;  %v8178_v37 = vld [vmem:[%s10657_s20 + $0x1b0] ss:$8 sps:$4 sm:$0xff]  }
0x14cf   :  { %v5140_v25 = vrot.slane %v5138_v54, 7  ;;  %v8136_v54 = vld [vmem:[%s10657_s20 + $0x120] ss:$8 sps:$4 sm:$0xff]  }
0x14d1   :  { %v5143_v58 = vsel %vm5142_vm2, %v5137_v56, %v5140_v25  ;;  %v8141_v56 = vld [vmem:[%s10657_s20 + $0x14] ss:$8 sps:$4 sm:$0xff]  }
0x14d2   :  { %v5144_v12 = vpack.c.bf16 %v5143_v58, %v5143_v58  ;;  %v8144_v25 = vld [vmem:[%s10657_s20 + $0x114] ss:$8 sps:$4 sm:$0xff]   ;;  %v8139_v58 = vld [vmem:[%s10657_s20 + $0x10] ss:$8 sps:$4 sm:$0xff]  }
0x14d4   :  { %7508 = vmatmul.mubr.bf16.vlgmr.msra.gmra.mxu0 %v5144_v12  ;;  %v8147_v12 = vld [vmem:[%s10657_s20 + $0x4] ss:$8 sps:$4 sm:$0xff]  }
0x14d5   :  { %5514 = vmatpush1.bf16.msra.mxu0 %v8058_v15  ;;  %5545 = vmatprep.mubr.bf16.mxu0 %v8365_v44  ;;  %v8076_v44 = vld [vmem:[%s10655_s18 + $0x88] ss:$16 sps:$4 sm:$0xff]  }
0x14d6   :  { %5515 = vmatprep.subr.bf16.mxu0 %v8066_v13  ;;  %v8142_v15 = vld [vmem:[%s10657_s20 + $0x110] ss:$8 sps:$4 sm:$0xff]   ;;  %v8150_v13 = vld [vmem:[%s10657_s20 + $0x104] ss:$8 sps:$4 sm:$0xff]  }
0x14d9   :  { %5516 = vmatpush1.bf16.msra.mxu0 %v8064_v11  ;;  %v8145_v11 = vld [vmem:[%s10657_s20] ss:$8 sps:$4 sm:$0xff]  }
0x14da   :  { %5517 = vmatprep.subr.bf16.mxu0 %v8072_v33  ;;  %v8148_v33 = vld [vmem:[%s10657_s20 + $0x100] ss:$8 sps:$4 sm:$0xff]  }
0x14dd   :  { %5518 = vmatpush1.bf16.msra.mxu0 %v8070_v42  ;;  %v8153_v42 = vld [vmem:[%s10657_s20 + $0xf4] ss:$8 sps:$4 sm:$0xff]  }
0x14de   :  { %5519 = vmatprep.subr.bf16.mxu0 %v8078_v48  ;;  %v8156_v48 = vld [vmem:[%s10657_s20 + $0x1f4] ss:$8 sps:$4 sm:$0xff]  }
0x14e1   :  { %5520 = vmatpush1.bf16.msra.mxu0 %v8076_v44  ;;  %v8151_v44 = vld [vmem:[%s10657_s20 + $0xf0] ss:$8 sps:$4 sm:$0xff]  }
0x14e2   :  { %5521 = vmatprep.subr.bf16.mxu0 %v8084_v50  ;;  %v8159_v50 = vld [vmem:[%s10657_s20 + $0xe4] ss:$8 sps:$4 sm:$0xff]  }
0x14e5   :  { %5522 = vmatpush1.bf16.msra.mxu0 %v8082_v52  ;;  %v8157_v52 = vld [vmem:[%s10657_s20 + $0xe0] ss:$8 sps:$4 sm:$0xff]  }
0x14e6   :  { %5523 = vmatprep.subr.bf16.mxu0 %v8090_v47  ;;  %v8165_v47 = vld [vmem:[%s10657_s20 + $0xd4] ss:$8 sps:$4 sm:$0xff]  }
0x14e9   :  { %5524 = vmatpush1.bf16.msra.mxu0 %v8088_v55  ;;  %v8163_v55 = vld [vmem:[%s10657_s20 + $0xd0] ss:$8 sps:$4 sm:$0xff]  }
0x14ea   :  { %5525 = vmatprep.subr.bf16.mxu0 %v8096_v46  ;;  %v8171_v46 = vld [vmem:[%s10657_s20 + $0xc4] ss:$8 sps:$4 sm:$0xff]  }
0x14ed   :  { %5526 = vmatpush1.bf16.msra.mxu0 %v8094_v61  ;;  %v8169_v61 = vld [vmem:[%s10657_s20 + $0xc0] ss:$8 sps:$4 sm:$0xff]  }
0x14ee   :  { %5527 = vmatprep.subr.bf16.mxu0 %v8102_v1  ;;  %v8177_v1 = vld [vmem:[%s10657_s20 + $0xb4] ss:$8 sps:$4 sm:$0xff]  }
0x14f1   :  { %5528 = vmatpush1.bf16.msra.mxu0 %v8100_v22  ;;  %v8175_v22 = vld [vmem:[%s10657_s20 + $0xb0] ss:$8 sps:$4 sm:$0xff]  }
0x14f2   :  { %5999 = vmatprep.subr.bf16.mxu0 %v8108_v40  ;;  %v8183_v40 = vld [vmem:[%s10657_s20 + $0xa4] ss:$8 sps:$4 sm:$0xff]  }
0x1594   :  { %v5250_v23 = vpop.f32.mrf.mxu0 }
0x1595   :  { %v5251_v6 = vadd.f32 %v7016_v41, %v5250_v23  ;;  %v8186_v41 = vld [vmem:[%s10657_s20 + $0x1a4] ss:$8 sps:$4 sm:$0xff]   ;;  %v8181_v23 = vld [vmem:[%s10657_s20 + $0xa0] ss:$8 sps:$4 sm:$0xff]  }
0x1596   :  { %v7509_v30 = vpop.f32.mrf.mxu0 }
0x1597   :  { %8339 = vtanh.f32 %v5251_v6  ;;  %v8184_v6 = vld [vmem:[%s10657_s20 + $0x1a0] ss:$8 sps:$4 sm:$0xff]   ;;  %v8189_v30 = vld [vmem:[%s10657_s20 + $0x94] ss:$8 sps:$4 sm:$0xff]  }
0x1598   :  { %v5253_v24 = vpop.f32.mrf.mxu0 }
0x1599   :  { %v8192_v24 = vld [vmem:[%s10657_s20 + $0x194] ss:$8 sps:$4 sm:$0xff]  }
0x159a   :  { %v7510_v36 = vpop.f32.mrf.mxu0 }
0x159b   :  { %v8187_v36 = vld [vmem:[%s10657_s20 + $0x90] ss:$8 sps:$4 sm:$0xff]  }
0x15a4   :  { %v8340_v39 = vpop.eup %8339 }
0x15a5   :  { %v5257_v5 = vpack.c.bf16 %v8340_v39, %v8340_v39  ;;  %v8190_v39 = vld [vmem:[%s10657_s20 + $0x190] ss:$8 sps:$4 sm:$0xff]  }
0x15a7   :  { %5505 = vmatmul.mubr.bf16.vlgmr.msra.gmra.mxu1 %v5257_v5  ;;  %5546 = vmatmul.mubr.bf16.vlgmr.msra.gmra.mxu0 %v5257_v5  ;;  %v8193_v5 = vld [vmem:[%s10657_s20 + $0x80] ss:$8 sps:$4 sm:$0xff]  }
0x15a8   :  { %5959 = vmatpush1.bf16.msra.mxu1 %v8103_v4  ;;  %6000 = vmatpush1.bf16.msra.mxu0 %v8106_v63  ;;  %v8195_v4 = vld [vmem:[%s10657_s20 + $0x84] ss:$8 sps:$4 sm:$0xff]  }
0x15a9   :  { %5960 = vmatprep.subr.bf16.mxu1 %v8111_v32  ;;  %6001 = vmatprep.subr.bf16.mxu0 %v8114_v34  ;;  %v8198_v63 = vld [vmem:[%s10657_s20 + $0x184] ss:$8 sps:$4 sm:$0xff]   ;;  %v8196_v32 = vld [vmem:[%s10657_s20 + $0x180] ss:$8 sps:$4 sm:$0xff]   ;;  %v8199_v34 = vld [vmem:[%s10659_s22 + $0x78] sm:$0xff]  }
0x15ac   :  { %5961 = vmatpush1.bf16.msra.mxu1 %v8109_v18  ;;  %6002 = vmatpush1.bf16.msra.mxu0 %v8112_v14  ;;  %v5290_v18 = vld [vmem:[%s10656_s19] sm:$0xf] }
0x15ad   :  { %5962 = vmatprep.subr.bf16.mxu1 %v8117_v8  ;;  %6003 = vmatprep.subr.bf16.mxu0 %v8120_v19  ;;  %v5295_v14 = vrot.slane %v5290_v18, %v8865_v26  ;;  %v5303_v8 = vrot.slane %v5290_v18, %v8868_v27  ;;  %v5299_v19 = vrot.slane %v5290_v18, %v8843_v3 }
0x15b0   :  { %5963 = vmatpush1.bf16.msra.mxu1 %v8115_v20  ;;  %6004 = vmatpush1.bf16.msra.mxu0 %v8118_v17  ;;  %v5307_v20 = vrot.slane %v5290_v18, %v8884_v51  ;;  %v8200_v51 = vld [vmem:[%s10659_s22 + $0x38] sm:$0xff]  }
0x15b1   :  { %5964 = vmatprep.subr.bf16.mxu1 %v8123_v59  ;;  %6005 = vmatprep.subr.bf16.mxu0 %v8126_v16 }
0x15b4   :  { %5965 = vmatpush1.bf16.msra.mxu1 %v8121_v60  ;;  %6006 = vmatpush1.bf16.msra.mxu0 %v8124_v21 }
0x15b5   :  { %5966 = vmatprep.subr.bf16.mxu1 %v8129_v29  ;;  %6007 = vmatprep.subr.bf16.mxu0 %v8132_v45 }
0x15b8   :  { %5967 = vmatpush1.bf16.msra.mxu1 %v8127_v9  ;;  %6008 = vmatpush1.bf16.msra.mxu0 %v8130_v2 }
0x15b9   :  { %5968 = vmatprep.subr.bf16.mxu1 %v8135_v28  ;;  %6009 = vmatprep.subr.bf16.mxu0 %v8138_v10 }
0x15bc   :  { %5969 = vmatpush1.bf16.msra.mxu1 %v8133_v7  ;;  %6010 = vmatpush1.bf16.msra.mxu0 %v8136_v54 }
0x15bd   :  { %5970 = vmatprep.subr.bf16.mxu1 %v8141_v56  ;;  %6011 = vmatprep.subr.bf16.mxu0 %v8144_v25 }
0x15c0   :  { %5971 = vmatpush1.bf16.msra.mxu1 %v8139_v58  ;;  %6012 = vmatpush1.bf16.msra.mxu0 %v8142_v15 }
0x15c1   :  { %5972 = vmatprep.subr.bf16.mxu1 %v8147_v12  ;;  %6013 = vmatprep.subr.bf16.mxu0 %v8150_v13 }
0x15c4   :  { %5973 = vmatpush1.bf16.msra.mxu1 %v8145_v11  ;;  %6014 = vmatpush1.bf16.msra.mxu0 %v8148_v33  ;;  %v8201_v11 = vld [vmem:[%s10659_s22 + $0x70] sm:$0xff]  }
0x15c5   :  { %5974 = vmatprep.subr.bf16.mxu1 %v8153_v42  ;;  %6015 = vmatprep.subr.bf16.mxu0 %v8156_v48  ;;  %v8202_v33 = vld [vmem:[%s10659_s22 + $0x30] sm:$0xff]   ;;  %v8203_v42 = vld [vmem:[%s10659_s22 + $0x68] sm:$0xff]  }
0x15c6   :  { %v8204_v48 = vld [vmem:[%s10659_s22 + $0x28] sm:$0xff]  }
0x15c8   :  { %5975 = vmatpush2.bf16.msra.mxu1 %v8151_v44  ;;  %6016 = vmatpush2.bf16.msra.mxu0 %v8154_v49  ;;  %v8205_v44 = vld [vmem:[%s10659_s22 + $0x60] sm:$0xff]  }
0x15c9   :  { %5976 = vmatprep.subr.bf16.mxu1 %v8159_v50  ;;  %6017 = vmatprep.subr.bf16.mxu0 %v8162_v38  ;;  %v8206_v49 = vld [vmem:[%s10659_s22 + $0x20] sm:$0xff]   ;;  %v8207_v50 = vld [vmem:[%s10659_s22 + $0x58] sm:$0xff]  }
0x15ca   :  { %v8208_v38 = vld [vmem:[%s10659_s22 + $0x18] sm:$0xff]  }
0x15cc   :  { %5977 = vmatpush2.bf16.msra.mxu1 %v8157_v52  ;;  %6018 = vmatpush2.bf16.msra.mxu0 %v8160_v53  ;;  %v8209_v52 = vld [vmem:[%s10659_s22 + $0x50] sm:$0xff]  }
0x15cd   :  { %5978 = vmatprep.subr.bf16.mxu1 %v8165_v47  ;;  %6019 = vmatprep.subr.bf16.mxu0 %v8168_v57  ;;  %v8210_v53 = vld [vmem:[%s10659_s22 + $0x10] sm:$0xff]   ;;  %v8211_v47 = vld [vmem:[%s10659_s22 + $0x48] sm:$0xff]  }
0x15ce   :  { %v8212_v57 = vld [vmem:[%s10659_s22 + $0x8] sm:$0xff]  }
0x15d0   :  { %5979 = vmatpush2.bf16.msra.mxu1 %v8163_v55  ;;  %6020 = vmatpush2.bf16.msra.mxu0 %v8166_v31  ;;  %v8213_v55 = vld [vmem:[%s10659_s22 + $0x40] sm:$0xff]  }
0x15d1   :  { %5980 = vmatprep.subr.bf16.mxu1 %v8171_v46  ;;  %6021 = vmatprep.subr.bf16.mxu0 %v8174_v35  ;;  %v8214_v31 = vld [vmem:[%s10659_s22] sm:$0xff]   ;;  %v8215_v46 = vld [vmem:[%s10661_s24 + $0x38] sm:$0xff]   ;;  %v8216_v35 = vld [vmem:[%s10661_s24 + $0x30] sm:$0xff]  }
0x15d4   :  { %5981 = vmatpush2.bf16.msra.mxu1 %v8169_v61  ;;  %6022 = vmatpush2.bf16.msra.mxu0 %v8172_v62  ;;  %v8217_v61 = vld [vmem:[%s10661_s24 + $0x28] sm:$0xff]   ;;  %v8218_v62 = vld [vmem:[%s10661_s24 + $0x20] sm:$0xff]  }
0x15d5   :  { %5982 = vmatprep.subr.bf16.mxu1 %v8177_v1  ;;  %6023 = vmatprep.subr.bf16.mxu0 %v8180_v43  ;;  %v8219_v1 = vld [vmem:[%s10661_s24 + $0x18] sm:$0xff]   ;;  %v5626_v43 = vld [vmem:[%s10699_s14] sm:$0x3] }
0x15d8   :  { %5983 = vmatpush2.bf16.msra.mxu1 %v8175_v22  ;;  %6024 = vmatpush2.bf16.msra.mxu0 %v8178_v37  ;;  %v5631_v22 = vrot.slane %v5626_v43, %v8865_v26  ;;  %v5635_v37 = vrot.slane %v5626_v43, %v8843_v3  ;;  %v8220_v3 = vld [vmem:[%s10661_s24 + $0x10] sm:$0xff]   ;;  %v8221_v26 = vld [vmem:[%s10661_s24 + $0x8] sm:$0xff]  }
0x15d9   :  { %5984 = vmatprep.subr.bf16.mxu1 %v8183_v40  ;;  %6025 = vmatprep.subr.bf16.mxu0 %v8186_v41 }
0x15dc   :  { %5985 = vmatpush2.bf16.msra.mxu1 %v8181_v23  ;;  %6026 = vmatpush2.bf16.msra.mxu0 %v8184_v6 }
0x15dd   :  { %5986 = vmatprep.subr.bf16.mxu1 %v8189_v30  ;;  %6027 = vmatprep.subr.bf16.mxu0 %v8192_v24 }
0x15e0   :  { %5987 = vmatpush2.bf16.msra.mxu1 %v8187_v36  ;;  %6028 = vmatpush2.bf16.msra.mxu0 %v8190_v39 }
0x15e1   :  { %5988 = vmatprep.subr.bf16.mxu1 %v8195_v4  ;;  %6029 = vmatprep.subr.bf16.mxu0 %v8198_v63 }
0x15e4   :  { %5989 = vmatpush2.bf16.msra.mxu1 %v8193_v5  ;;  %6030 = vmatpush2.bf16.msra.mxu0 %v8196_v32 }
0x15e5   :  { %7511 = vmatprep.subr.bf16.mxu0 %v8366_v0  ;;  %7364 = vmatprep.subr.bf16.mxu1 %v8199_v34 }
0x1667   :  { %v5506_v17 = vpop.f32.mrf.mxu1  ;;  %v5547_v59 = vpop.f32.mrf.mxu0 }
0x1668   :  { %v5507_v16 = vadd.f32 %v5506_v17, %v5295_v14  ;;  %v5548_v60 = vadd.f32 %v5547_v59, %v5303_v8  ;;  %v8222_v14 = vld [vmem:[%s10661_s24] sm:$0xff]   ;;  %s6337_s24 = sshll.u32 %s8368_s7, 4  ;;  %s6338_s24 = int_to_ptr.vmem [resolvable:$true] %s6337_s24 }
0x1669   :  { %v5508_v21 = vpop.f32.mrf.mxu1  ;;  %v5549_v29 = vpop.f32.mrf.mxu0  ;;  %s8343_s8 = scalar_lea.vmem %s6338_s24, 32  ;;  %p8348_p1 = scmp.lt.s32.totalorder %s6338_s24, %s6338_s24 }
0x166a   :  { %v5509_v45 = vadd.f32 %v5508_v21, %v5299_v19  ;;  %v5550_v9 = vadd.f32 %v5549_v29, %v5307_v20  ;;  %v5554_v2 = vmax.f32 %v5507_v16, 0.0  ;;  %v5556_v28 = vmax.f32 %v5548_v60, 0.0  ;;  %v7121_v19 = vld [vmem:[%s10700_s26] ss:$0 sm:$0xff]  ;;  %p8344_p0 = scmp.ne.s32.totalorder %s6338_s24, %s8343_s8  ;;  %p8349_p2 = scmp.lt.s32.totalorder %s8343_s8, %s8343_s8 }
0x166b   :  { %v5510_v10 = vpop.f32.mrf.mxu1  ;;  %v5551_v7 = vpop.f32.mrf.mxu0 }
0x166c   :  { %v5555_v54 = vmax.f32 %v5509_v45, 0.0  ;;  %v5557_v56 = vmax.f32 %v5550_v9, 0.0  ;;  %v5558_v12 = vpack.c.bf16 %v5554_v2, %v5554_v2  ;;  %v5560_v13 = vpack.c.bf16 %v5556_v28, %v5556_v28  ;;  %p8350_p3 = por %p8349_p2, %p8348_p1 }
0x166d   :  { %v5511_v25 = vpop.f32.mrf.mxu1  ;;  %v5552_v27 = vpop.f32.mrf.mxu0 }
0x166e   :  { %v5559_v58 = vpack.c.bf16 %v5555_v54, %v5555_v54  ;;  %v5561_v15 = vpack.c.bf16 %v5557_v56, %v5557_v56  ;;  %p8351_p4 = pnand %p8350_p3, %p8344_p0 }
0x1670   :  { %5990 = vmatprep.mubr.bf16.mxu1 %v5559_v58  ;;  %6031 = vmatprep.mubr.bf16.mxu0 %v5561_v15 }
0x1671   :  { %5991 = vmatmul.mubr.bf16.vlgmr.msra.gmra.mxu1 %v5558_v12  ;;  %6032 = vmatmul.mubr.bf16.vlgmr.msra.gmra.mxu0 %v5560_v13 }
0x1672   :  { %7365 = vmatpush3.bf16.msra.mxu1 %v8200_v51  ;;  %7527 = vmatprep.mubr.msk.bf16.mxu0 %vm8367_vm0, %v8366_v0 }
0x1673   :  { %7366 = vmatprep.subr.bf16.mxu1 %v8201_v11  ;;  %7512 = vmatpush3.bf16.msra.mxu0 %v8215_v46 }
0x1674   :  { %7513 = vmatprep.subr.bf16.mxu0 %v8366_v0 }
0x1676   :  { %7367 = vmatpush3.bf16.msra.mxu1 %v8202_v33 }
0x1677   :  { %7368 = vmatprep.subr.bf16.mxu1 %v8203_v42  ;;  %7514 = vmatpush3.bf16.msra.mxu0 %v8216_v35 }
0x1678   :  { %7515 = vmatprep.subr.bf16.mxu0 %v8366_v0 }
0x167a   :  { %7369 = vmatpush3.bf16.msra.mxu1 %v8204_v48 }
0x167b   :  { %7370 = vmatprep.subr.bf16.mxu1 %v8205_v44  ;;  %7516 = vmatpush3.bf16.msra.mxu0 %v8217_v61 }
0x167c   :  { %7517 = vmatprep.subr.bf16.mxu0 %v8366_v0 }
0x167e   :  { %7371 = vmatpush3.bf16.msra.mxu1 %v8206_v49 }
0x167f   :  { %7372 = vmatprep.subr.bf16.mxu1 %v8207_v50  ;;  %7518 = vmatpush3.bf16.msra.mxu0 %v8218_v62 }
0x1680   :  { %7519 = vmatprep.subr.bf16.mxu0 %v8366_v0 }
0x1682   :  { %7373 = vmatpush3.bf16.msra.mxu1 %v8208_v38 }
0x1683   :  { %7374 = vmatprep.subr.bf16.mxu1 %v8209_v52  ;;  %7520 = vmatpush3.bf16.msra.mxu0 %v8219_v1 }
0x1684   :  { %7521 = vmatprep.subr.bf16.mxu0 %v8366_v0 }
0x1686   :  { %7375 = vmatpush3.bf16.msra.mxu1 %v8210_v53 }
0x1687   :  { %7376 = vmatprep.subr.bf16.mxu1 %v8211_v47  ;;  %7522 = vmatpush3.bf16.msra.mxu0 %v8220_v3 }
0x1688   :  { %7523 = vmatprep.subr.bf16.mxu0 %v8366_v0 }
0x168a   :  { %7377 = vmatpush3.bf16.msra.mxu1 %v8212_v57 }
0x168b   :  { %7378 = vmatprep.subr.bf16.mxu1 %v8213_v55  ;;  %7524 = vmatpush3.bf16.msra.mxu0 %v8221_v26 }
0x168c   :  { %7525 = vmatprep.subr.bf16.mxu0 %v8366_v0  ;;  %v7138_v0 = vld [vmem:[%s10701_s4] ss:$0 sm:$0xff] }
0x168e   :  { %7379 = vmatpush3.bf16.msra.mxu1 %v8214_v31 }
0x168f   :  { %7526 = vmatpush3.bf16.msra.mxu0 %v8222_v14 }
0x1731   :  { %v5992_v40 = vpop.f32.mrf.mxu1  ;;  %v6033_v41 = vpop.f32.mrf.mxu0 }
0x1732   :  { %v5993_v23 = vadd.f32 %v5992_v40, %v5631_v22 }
0x1733   :  { %v5994_v6 = vpop.f32.mrf.mxu1  ;;  %v6035_v30 = vpop.f32.mrf.mxu0 }
0x1734   :  { %v5995_v24 = vadd.f32 %v5994_v6, %v5635_v37  ;;  %v6034_v36 = vadd.f32 %v6033_v41, %v5993_v23 }
0x1735   :  { %v5996_v39 = vpop.f32.mrf.mxu1  ;;  %v6037_v4 = vpop.f32.mrf.mxu0 }
0x1736   :  { %v6036_v63 = vadd.f32 %v6035_v30, %v5995_v24  ;;  %v6040_v18 = vpack.c.bf16 %v6034_v36, %v6034_v36 }
0x1737   :  { %v5997_v5 = vpop.f32.mrf.mxu1  ;;  %v6038_v32 = vpop.f32.mrf.mxu0 }
0x1738   :  { %v6041_v34 = vpack.c.bf16 %v6036_v63, %v6036_v63 }
0x173a   :  { %6209 = vmatprep.mubr.bf16.mxu1 %v6041_v34 }
0x173b   :  { %6210 = vmatmul.mubr.bf16.vlgmr.msra.gmra.mxu1 %v6040_v18 }
0x17fb   :  { %v7380_v8 = vpop.f32.mrf.mxu1 }
0x17fd   :  { %v7381_v20 = vpop.f32.mrf.mxu1 }
0x17fe   :  { %v7382_v17 = vadd.f32 %v7381_v20, %v7380_v8 }
0x17ff   :  { %v7383_v59 = vpop.f32.mrf.mxu1 }
0x1800   :  { %v6212_v16 = vadd.f32 %v7382_v17, %v7121_v19 }
0x1801   :  { %v7384_v60 = vpop.f32.mrf.mxu1 }
0x1802   :  { %v6217_v21 = vmax.f32 %v6212_v16, 0.0 }
0x1804   :  { %v6218_v29 = vpack.c.bf16 %v6217_v21, %v6217_v21 }
0x1806   :  { %7528 = vmatmul.mubr.bf16.vlgmr.msra.gmra.mxu0 %v6218_v29 }
0x18c6   :  { %v6324_v45 = vpop.f32.mrf.mxu0 }
0x18c7   :  { %v6325_v9 = vadd.f32 %v7138_v0, %v6324_v45 }
0x18c8   :  { %v7529_v2 = vpop.f32.mrf.mxu0 }
0x18c9   :  { %6330 = vst [vmem:[#allocation2] sm:$0x3] %v6325_v9 }
0x18ca   :  { %v6327_v28 = vpop.f32.mrf.mxu0 }
0x18cb   :  { %8354 = shalt.err (!%p8351_p4)
}
0x18cc   :  { %s10702_s19 = sld [smem:[#allocation19_spill]]  ;;  %v7530_v10 = vpop.f32.mrf.mxu0 }
0x18d2   :  { %6340 = dma.vmem_to_hbm [thread:$0]  %s6338_s24, 32, %s10702_s19, [#allocation3]  }
0x18d3   :  { %8363 = dma.done.wait [#allocation3], 32  }
0x18d4   :  { %8364 = vsyncadd [#allocation3], 4294967264 }
0x18d5   :  { %6344 = vsyncpa [#allocation3], 1 }

</bundles_post_ra>
